<compile_context>
chip_gen: v5e
topology: v5e:2x2
jax: 0.10.0
libtpu: 0.0.40
codegen_flags: <defaults>
</compile_context>

<pallas_src>
import functools

import jax
import jax.numpy as jnp
from jax import lax
from jax.experimental import pallas as pl
from jax.experimental.pallas import tpu as pltpu

_LANES = 128      # vreg lane width == per-gate column slab width
_SUBLANES = 8     # vreg sublane count; chains A/B/img live on sublanes 0/1/2
_NGATES = 4       # LSTM gates i, f, g, o (torch order)


def _round_up(x, m):
    return ((x + m - 1) // m) * m


# ----------------------- packed (kernel-layout) parameter construction -----------------------

def build_packed_params(lstm_v, lstm_i, hidden_size):
    """Pack torch-layout LSTM weights for the sublane-batched 3-chain kernel.

    Per LSTM the inputs are (w_ih_t [I,4H], w_hh_t [H,4H], bias [1,4H]=b_ih+b_hh),
    torch gate order i,f,g,o.  Gate k occupies packed columns [k*128, (k+1)*128):
    voice values in lanes k*128 : k*128+H, img values in lanes k*128+H : k*128+2H.
    """
    w_ih_v, w_hh_v, b_v = lstm_v
    w_ih_i, w_hh_i, b_i = lstm_i
    H = hidden_size
    assert 2 * H <= _LANES, "voice+img hidden must fit one 128-lane gate slab"
    I_v = w_ih_v.shape[0]
    I_i = w_ih_i.shape[0]
    IVP = _round_up(I_v, _LANES)          # lane-aligned K for the voice input dots
    IIP = _round_up(I_i, _LANES)          # lane-aligned K for the img input dot
    G = _NGATES * _LANES

    wv_g = jnp.zeros((IVP, G), jnp.float32)    # voice input weights (gate-padded)
    wi_g = jnp.zeros((IIP, G), jnp.float32)    # img input weights (gate-padded)
    whh = jnp.zeros((_LANES, G), jnp.float32)  # stacked recurrent weights [128, 512]
    bv_g = jnp.zeros((1, G), jnp.float32)
    bi_g = jnp.zeros((1, G), jnp.float32)
    for k in range(_NGATES):
        cv = k * _LANES          # voice columns of gate k
        ci = k * _LANES + H      # img columns of gate k
        wv_g = wv_g.at[:I_v, cv:cv + H].set(w_ih_v[:, k * H:(k + 1) * H])
        wi_g = wi_g.at[:I_i, ci:ci + H].set(w_ih_i[:, k * H:(k + 1) * H])
        whh = whh.at[0:H, cv:cv + H].set(w_hh_v[:, k * H:(k + 1) * H])
        whh = whh.at[H:2 * H, ci:ci + H].set(w_hh_i[:, k * H:(k + 1) * H])
        bv_g = bv_g.at[:, cv:cv + H].set(b_v[:, k * H:(k + 1) * H])
        bi_g = bi_g.at[:, ci:ci + H].set(b_i[:, k * H:(k + 1) * H])
    return wv_g, wi_g, whh, bv_g, bi_g


# --------------------------------- Pallas fused kernel ---------------------------------

def _fused_lstm3_kernel(xa_ref, xb_ref, xi_ref, wv_ref, wi_ref, whh_ref,
                        bv_ref, bi_ref, out_ref, xga_ref, xgb_ref, xgi_ref,
                        *, hidden):
    """Advance voiceA / voiceB / img LSTMs together (sublane-batched).

    xa/xb/xi: [T, I*]        lane-padded inputs for the three chains
    wv/wi:    [I*, 512]      gate-padded input weights (voice shared by A and B)
    whh:      [128, 512]     stacked recurrent weights
    bv/bi:    [1, 512]       gate-padded biases (f32)
    out:      [2T, 128] f32  row 2t = [hA | hB], row 2t+1 = [hImg | junk]
    xga/xgb/xgi: [T, 512]    VMEM scratch for the staged input projections
    """
    H = hidden
    T = xa_ref.shape[0]

    # Input projections: three small dense MXU dots, off the serial recurrence path.
    xga_ref[...] = (jnp.dot(xa_ref[...], wv_ref[...],
                            preferred_element_type=jnp.float32) + bv_ref[...])
    xgb_ref[...] = (jnp.dot(xb_ref[...], wv_ref[...],
                            preferred_element_type=jnp.float32) + bv_ref[...])
    xgi_ref[...] = (jnp.dot(xi_ref[...], wi_ref[...],
                            preferred_element_type=jnp.float32) + bi_ref[...])

    # Masks hoisted out of the step loop (computed once, reused every iteration).
    row_ids = lax.broadcasted_iota(jnp.int32, (_SUBLANES, 1), 0)
    is_row0 = row_ids == 0                                    # chain-A sublane
    lane_ids = lax.broadcasted_iota(jnp.int32, (1, _LANES), 1)
    lane_lo = lane_ids < H                                    # voice half of a gate slab

    def step(t, carry):
        h, c = carry                                          # [8, 128] f32 each
        ga = xga_ref[pl.ds(t, 1), :]                          # [1, 512]
        gb = xgb_ref[pl.ds(t, 1), :]
        gi = xgi_ref[pl.ds(t, 1), :]
        # Row 0 <- voiceA projection, all other rows <- voiceB projection; the img
        # projection only occupies the (disjoint) img gate columns, so it is added
        # unmasked.  Wrong-row contributions land only in never-emitted pad lanes.
        gx = jnp.where(is_row0, ga, gb) + gi                  # [8, 512]
        # One small MXU matmul drives all three recurrences: [8,128] x [128,512].
        g = gx + jnp.dot(h.astype(whh_ref.dtype), whh_ref[...],
                         preferred_element_type=jnp.float32)
        # Each gate is exactly one [8,128] vreg (128-lane aligned slices).
        i_g = jax.nn.sigmoid(g[:, 0 * _LANES:1 * _LANES])
        f_g = jax.nn.sigmoid(g[:, 1 * _LANES:2 * _LANES])
        g_g = jnp.tanh(g[:, 2 * _LANES:3 * _LANES])
        o_g = jax.nn.sigmoid(g[:, 3 * _LANES:4 * _LANES])
        c_new = f_g * c + i_g * g_g
        h_new = o_g * jnp.tanh(c_new)                         # [8, 128]
        # In-kernel repack: XLU roll (free slot, overlaps next step's MXU work).
        h_roll = pltpu.roll(h_new, shift=H, axis=1)
        out_ref[pl.ds(2 * t, 1), :] = jnp.where(lane_lo, h_new[0:1, :], h_roll[1:2, :])
        out_ref[pl.ds(2 * t + 1, 1), :] = h_roll[2:3, :]
        return (h_new, c_new)

    h0 = jnp.zeros((_SUBLANES, _LANES), jnp.float32)
    c0 = jnp.zeros((_SUBLANES, _LANES), jnp.float32)
    # Fully unroll the short, serial recurrence so the LLO scheduler can overlap
    # loads / rolls / stores with the MXU+EUP dependency chain.
    lax.fori_loop(0, T, step, (h0, c0), unroll=True)


def fused_encoder_pallas(voiceA, voiceB, img, packed, hidden_size,
                         matmul_dtype=jnp.bfloat16):
    """Run the fused 3-LSTM kernel.  Returns (1, T, 3H), matching the torch output."""
    wv_g, wi_g, whh, bv_g, bi_g = packed
    H = hidden_size
    T = voiceA.shape[0]
    IVP = wv_g.shape[0]
    IIP = wi_g.shape[0]
    G = _NGATES * _LANES

    # Lane-align the inputs (img 65 -> 128; voice already 128) and pick MXU operand dtype.
    xa = jnp.pad(voiceA, ((0, 0), (0, IVP - voiceA.shape[1]))).astype(matmul_dtype)
    xb = jnp.pad(voiceB, ((0, 0), (0, IVP - voiceB.shape[1]))).astype(matmul_dtype)
    xi = jnp.pad(img, ((0, 0), (0, IIP - img.shape[1]))).astype(matmul_dtype)
    wv = wv_g.astype(matmul_dtype)
    wi = wi_g.astype(matmul_dtype)
    wh = whh.astype(matmul_dtype)

    kernel = functools.partial(_fused_lstm3_kernel, hidden=H)
    vmem = pl.BlockSpec(memory_space=pltpu.MemorySpace.VMEM)
    out = pl.pallas_call(
        kernel,
        out_shape=jax.ShapeDtypeStruct((2 * T, _LANES), jnp.float32),
        in_specs=[vmem] * 8,
        out_specs=vmem,
        scratch_shapes=[pltpu.VMEM((T, G), jnp.float32) for _ in range(3)],
    )(xa, xb, xi, wv, wi, wh, bv_g, bi_g)

    # Row-major: [2T,128] -> [T,256] where each row is [hA | hB | hImg | junk].
    out_rows = out.reshape(T, 2 * _LANES)
    if 2 * H == _LANES:
        return out_rows[:, :3 * H][None]                      # contiguous slice, no concat
    return jnp.concatenate([out_rows[:, :2 * H],
                            out_rows[:, _LANES:_LANES + H]], axis=-1)[None]


# ----------------------------------- pure-JAX reference ---------------------------------

def lstm_ref(x, w_ih_t, w_hh_t, bias):
    H = w_hh_t.shape[0]

    def step(carry, x_t):
        h, c = carry
        g = x_t[None, :] @ w_ih_t + h @ w_hh_t + bias
        i_g = jax.nn.sigmoid(g[:, 0 * H:1 * H])
        f_g = jax.nn.sigmoid(g[:, 1 * H:2 * H])
        g_g = jnp.tanh(g[:, 2 * H:3 * H])
        o_g = jax.nn.sigmoid(g[:, 3 * H:4 * H])
        c = f_g * c + i_g * g_g
        h = o_g * jnp.tanh(c)
        return (h, c), h[0]

    h0 = jnp.zeros((1, H), jnp.float32)
    c0 = jnp.zeros((1, H), jnp.float32)
    _, hs = lax.scan(step, (h0, c0), x)
    return hs


def encoder_forward_ref(batch, params):
    hA = lstm_ref(batch["voiceA"], *params["lstm_v"])
    hB = lstm_ref(batch["voiceB"], *params["lstm_v"])
    hImg = lstm_ref(batch["img"], *params["lstm_i"])
    return jnp.concatenate([hA, hB, hImg], axis=-1)[None]


# ------------------------------------------ main ----------------------------------------

def make_lstm_params(key, input_size, hidden_size):
    k1, k2, k3 = jax.random.split(key, 3)
    scale = 1.0 / jnp.sqrt(hidden_size)
    w_ih_t = jax.random.uniform(k1, (input_size, 4 * hidden_size),
                                jnp.float32, -scale, scale)
    w_hh_t = jax.random.uniform(k2, (hidden_size, 4 * hidden_size),
                                jnp.float32, -scale, scale)
    bias = jax.random.uniform(k3, (1, 4 * hidden_size), jnp.float32, -scale, scale)
    return (w_ih_t, w_hh_t, bias)


if __name__ == "__main__":
    # Module defaults (already small): input_size=128, input_img_size=65, hidden=64; T=8.
    T = 8
    INPUT_SIZE = 128       # voice feature dim
    INPUT_IMG_SIZE = 65    # image feature dim
    HIDDEN = 64            # per-LSTM hidden size (concatenated output is 3H = 192)

    key = jax.random.PRNGKey(0)
    k_v, k_i, k_a, k_b, k_img = jax.random.split(key, 5)

    params = {
        "lstm_v": make_lstm_params(k_v, INPUT_SIZE, HIDDEN),
        "lstm_i": make_lstm_params(k_i, INPUT_IMG_SIZE, HIDDEN),
    }
    packed = build_packed_params(params["lstm_v"], params["lstm_i"], HIDDEN)

    batch = {
        "voiceA": jax.random.normal(k_a, (T, INPUT_SIZE), jnp.float32),
        "voiceB": jax.random.normal(k_b, (T, INPUT_SIZE), jnp.float32),
        "img": jax.random.normal(k_img, (T, INPUT_IMG_SIZE), jnp.float32),
    }

    run = jax.jit(fused_encoder_pallas,
                  static_argnames=("hidden_size", "matmul_dtype"))

    ref = jax.block_until_ready(encoder_forward_ref(batch, params))

    # f32 parity path: exact-layout check against the f32 reference.
    out_f32 = jax.block_until_ready(
        run(batch["voiceA"], batch["voiceB"], batch["img"], packed,
            hidden_size=HIDDEN, matmul_dtype=jnp.float32))
    assert out_f32.shape == (1, T, 3 * HIDDEN), out_f32.shape
    err32 = float(jnp.max(jnp.abs(out_f32 - ref)))
    assert jnp.allclose(out_f32, ref, atol=1e-4, rtol=1e-4), err32

    # bf16-operand path (default for v6e/v7x): f32 accumulation & gate math, loose tol.
    out_bf16 = jax.block_until_ready(
        run(batch["voiceA"], batch["voiceB"], batch["img"], packed,
            hidden_size=HIDDEN, matmul_dtype=jnp.bfloat16))
    err16 = float(jnp.max(jnp.abs(out_bf16 - ref)))
    assert err16 < 1e-1, err16

    print("KERNEL_OK")
</pallas_src>

<mosaic_0001>
module attributes {stable_mosaic.version = 11 : i64} {
  func.func @_fused_lstm3_kernel(%arg0: memref<8x128xf32, #tpu.memory_space<vmem>>, %arg1: memref<8x128xf32, #tpu.memory_space<vmem>>, %arg2: memref<8x128xf32, #tpu.memory_space<vmem>>, %arg3: memref<128x512xf32, #tpu.memory_space<vmem>>, %arg4: memref<128x512xf32, #tpu.memory_space<vmem>>, %arg5: memref<128x512xf32, #tpu.memory_space<vmem>>, %arg6: memref<1x512xf32, #tpu.memory_space<vmem>>, %arg7: memref<1x512xf32, #tpu.memory_space<vmem>>, %arg8: memref<16x128xf32, #tpu.memory_space<vmem>>, %arg9: memref<8x512xf32, #tpu.memory_space<vmem>>, %arg10: memref<8x512xf32, #tpu.memory_space<vmem>>, %arg11: memref<8x512xf32, #tpu.memory_space<vmem>>) attributes {dimension_semantics = [], scalar_prefetch = 0 : i64, scratch_operands = 3 : i64, tpu.core_type = #tpu.core_type<tc>} {
    %c0 = arith.constant 0 : index
    %c0_0 = arith.constant 0 : index
    %0 = vector.load %arg0[%c0, %c0_0] : memref<8x128xf32, #tpu.memory_space<vmem>>, vector<8x128xf32>
    %c0_1 = arith.constant 0 : index
    %c0_2 = arith.constant 0 : index
    %1 = vector.load %arg3[%c0_1, %c0_2] : memref<128x512xf32, #tpu.memory_space<vmem>>, vector<128x512xf32>
    %cst = arith.constant dense<0.000000e+00> : vector<8x512xf32>
    %2 = tpu.matmul %0, %1, %cst {dimension_numbers = #tpu.dot_dimension_numbers<[1], [0], [0], [1], [0, 0, 1, 1], [], []>} : vector<8x128xf32>, vector<128x512xf32>, vector<8x512xf32> -> vector<8x512xf32>
    %c0_3 = arith.constant 0 : index
    %c0_4 = arith.constant 0 : index
    %3 = vector.load %arg6[%c0_3, %c0_4] : memref<1x512xf32, #tpu.memory_space<vmem>>, vector<1x512xf32>
    %4 = vector.broadcast %3 : vector<1x512xf32> to vector<8x512xf32>
    %5 = arith.addf %2, %4 : vector<8x512xf32>
    %c0_5 = arith.constant 0 : index
    %c0_6 = arith.constant 0 : index
    %6 = vector.load %arg9[%c0_5, %c0_6] : memref<8x512xf32, #tpu.memory_space<vmem>>, vector<8x512xf32>
    tpu.vector_store %arg9[%c0_5, %c0_6], %5 {strides = array<i32>} : memref<8x512xf32, #tpu.memory_space<vmem>>, vector<8x512xf32>,
    %c0_7 = arith.constant 0 : index
    %c0_8 = arith.constant 0 : index
    %7 = vector.load %arg1[%c0_7, %c0_8] : memref<8x128xf32, #tpu.memory_space<vmem>>, vector<8x128xf32>
    %c0_9 = arith.constant 0 : index
    %c0_10 = arith.constant 0 : index
    %8 = vector.load %arg3[%c0_9, %c0_10] : memref<128x512xf32, #tpu.memory_space<vmem>>, vector<128x512xf32>
    %cst_11 = arith.constant dense<0.000000e+00> : vector<8x512xf32>
    %9 = tpu.matmul %7, %8, %cst_11 {dimension_numbers = #tpu.dot_dimension_numbers<[1], [0], [0], [1], [0, 0, 1, 1], [], []>} : vector<8x128xf32>, vector<128x512xf32>, vector<8x512xf32> -> vector<8x512xf32>
    %c0_12 = arith.constant 0 : index
    %c0_13 = arith.constant 0 : index
    %10 = vector.load %arg6[%c0_12, %c0_13] : memref<1x512xf32, #tpu.memory_space<vmem>>, vector<1x512xf32>
    %11 = vector.broadcast %10 : vector<1x512xf32> to vector<8x512xf32>
    %12 = arith.addf %9, %11 : vector<8x512xf32>
    %c0_14 = arith.constant 0 : index
    %c0_15 = arith.constant 0 : index
    %13 = vector.load %arg10[%c0_14, %c0_15] : memref<8x512xf32, #tpu.memory_space<vmem>>, vector<8x512xf32>
    tpu.vector_store %arg10[%c0_14, %c0_15], %12 {strides = array<i32>} : memref<8x512xf32, #tpu.memory_space<vmem>>, vector<8x512xf32>,
    %c0_16 = arith.constant 0 : index
    %c0_17 = arith.constant 0 : index
    %14 = vector.load %arg2[%c0_16, %c0_17] : memref<8x128xf32, #tpu.memory_space<vmem>>, vector<8x128xf32>
    %c0_18 = arith.constant 0 : index
    %c0_19 = arith.constant 0 : index
    %15 = vector.load %arg4[%c0_18, %c0_19] : memref<128x512xf32, #tpu.memory_space<vmem>>, vector<128x512xf32>
    %cst_20 = arith.constant dense<0.000000e+00> : vector<8x512xf32>
    %16 = tpu.matmul %14, %15, %cst_20 {dimension_numbers = #tpu.dot_dimension_numbers<[1], [0], [0], [1], [0, 0, 1, 1], [], []>} : vector<8x128xf32>, vector<128x512xf32>, vector<8x512xf32> -> vector<8x512xf32>
    %c0_21 = arith.constant 0 : index
    %c0_22 = arith.constant 0 : index
    %17 = vector.load %arg7[%c0_21, %c0_22] : memref<1x512xf32, #tpu.memory_space<vmem>>, vector<1x512xf32>
    %18 = vector.broadcast %17 : vector<1x512xf32> to vector<8x512xf32>
    %19 = arith.addf %16, %18 : vector<8x512xf32>
    %c0_23 = arith.constant 0 : index
    %c0_24 = arith.constant 0 : index
    %20 = vector.load %arg11[%c0_23, %c0_24] : memref<8x512xf32, #tpu.memory_space<vmem>>, vector<8x512xf32>
    tpu.vector_store %arg11[%c0_23, %c0_24], %19 {strides = array<i32>} : memref<8x512xf32, #tpu.memory_space<vmem>>, vector<8x512xf32>,
    %21 = tpu.iota {dimensions = array<i32: 0>} : vector<8x1xi32>
    %c0_i32 = arith.constant 0 : i32
    %22 = vector.broadcast %c0_i32 : i32 to vector<8x1xi32>
    %23 = arith.cmpi eq, %21, %22 : vector<8x1xi32>
    %24 = tpu.iota {dimensions = array<i32: 1>} : vector<1x128xi32>
    %c64_i32 = arith.constant 64 : i32
    %25 = vector.broadcast %c64_i32 : i32 to vector<1x128xi32>
    %26 = arith.cmpi slt, %24, %25 : vector<1x128xi32>
    %cst_25 = arith.constant 0.000000e+00 : f32
    %27 = vector.broadcast %cst_25 : f32 to vector<8x128xf32>
    %cst_26 = arith.constant 0.000000e+00 : f32
    %28 = vector.broadcast %cst_26 : f32 to vector<8x128xf32>
    %c0_i32_27 = arith.constant 0 : i32
    %29 = arith.index_cast %c0_i32_27 : i32 to index
    %c0_28 = arith.constant 0 : index
    %30 = vector.load %arg9[%29, %c0_28] : memref<8x512xf32, #tpu.memory_space<vmem>>, vector<1x512xf32>
    %31 = arith.index_cast %c0_i32_27 : i32 to index
    %c0_29 = arith.constant 0 : index
    %32 = vector.load %arg10[%31, %c0_29] : memref<8x512xf32, #tpu.memory_space<vmem>>, vector<1x512xf32>
    %33 = arith.index_cast %c0_i32_27 : i32 to index
    %c0_30 = arith.constant 0 : index
    %34 = vector.load %arg11[%33, %c0_30] : memref<8x512xf32, #tpu.memory_space<vmem>>, vector<1x512xf32>
    %35 = vector.shape_cast %23 : vector<8x1xi1> to vector<8x1xi1>
    %36 = vector.broadcast %35 : vector<8x1xi1> to vector<8x512xi1>
    %37 = vector.shape_cast %30 : vector<1x512xf32> to vector<1x512xf32>
    %38 = vector.broadcast %37 : vector<1x512xf32> to vector<8x512xf32>
    %39 = vector.shape_cast %32 : vector<1x512xf32> to vector<1x512xf32>
    %40 = vector.broadcast %39 : vector<1x512xf32> to vector<8x512xf32>
    %41 = arith.select %36, %38, %40 : vector<8x512xi1>, vector<8x512xf32>
    %42 = vector.broadcast %34 : vector<1x512xf32> to vector<8x512xf32>
    %43 = arith.addf %41, %42 : vector<8x512xf32>
    %c0_31 = arith.constant 0 : index
    %c0_32 = arith.constant 0 : index
    %44 = vector.load %arg5[%c0_31, %c0_32] : memref<128x512xf32, #tpu.memory_space<vmem>>, vector<128x512xf32>
    %cst_33 = arith.constant dense<0.000000e+00> : vector<8x512xf32>
    %45 = tpu.matmul %27, %44, %cst_33 {dimension_numbers = #tpu.dot_dimension_numbers<[1], [0], [0], [1], [0, 0, 1, 1], [], []>} : vector<8x128xf32>, vector<128x512xf32>, vector<8x512xf32> -> vector<8x512xf32>
    %46 = arith.addf %43, %45 : vector<8x512xf32>
    %47 = vector.extract_strided_slice %46 {offsets = [0, 0], sizes = [8, 128], strides = [1, 1]} : vector<8x512xf32> to vector<8x128xf32>
    %48 = arith.negf %47 : vector<8x128xf32>
    %49 = math.exp %48 : vector<8x128xf32>
    %cst_34 = arith.constant 1.000000e+00 : f32
    %50 = vector.broadcast %cst_34 : f32 to vector<8x128xf32>
    %51 = arith.addf %50, %49 : vector<8x128xf32>
    %52 = arith.divf %50, %51 : vector<8x128xf32>
    %53 = vector.extract_strided_slice %46 {offsets = [0, 128], sizes = [8, 128], strides = [1, 1]} : vector<8x512xf32> to vector<8x128xf32>
    %54 = arith.negf %53 : vector<8x128xf32>
    %55 = math.exp %54 : vector<8x128xf32>
    %cst_35 = arith.constant 1.000000e+00 : f32
    %56 = vector.broadcast %cst_35 : f32 to vector<8x128xf32>
    %57 = arith.addf %56, %55 : vector<8x128xf32>
    %58 = arith.divf %56, %57 : vector<8x128xf32>
    %59 = vector.extract_strided_slice %46 {offsets = [0, 256], sizes = [8, 128], strides = [1, 1]} : vector<8x512xf32> to vector<8x128xf32>
    %60 = math.tanh %59 : vector<8x128xf32>
    %61 = vector.extract_strided_slice %46 {offsets = [0, 384], sizes = [8, 128], strides = [1, 1]} : vector<8x512xf32> to vector<8x128xf32>
    %62 = arith.negf %61 : vector<8x128xf32>
    %63 = math.exp %62 : vector<8x128xf32>
    %cst_36 = arith.constant 1.000000e+00 : f32
    %64 = vector.broadcast %cst_36 : f32 to vector<8x128xf32>
    %65 = arith.addf %64, %63 : vector<8x128xf32>
    %66 = arith.divf %64, %65 : vector<8x128xf32>
    %67 = arith.mulf %58, %28 : vector<8x128xf32>
    %68 = arith.mulf %52, %60 : vector<8x128xf32>
    %69 = arith.addf %67, %68 : vector<8x128xf32>
    %70 = math.tanh %69 : vector<8x128xf32>
    %71 = arith.mulf %66, %70 : vector<8x128xf32>
    %c64_i32_37 = arith.constant 64 : i32
    %72 = tpu.dynamic_rotate %71 by %c64_i32_37 dim 1 : vector<8x128xf32>, i32 -> vector<8x128xf32>
    %73 = vector.extract_strided_slice %71 {offsets = [0, 0], sizes = [1, 128], strides = [1, 1]} : vector<8x128xf32> to vector<1x128xf32>
    %74 = vector.extract_strided_slice %72 {offsets = [1, 0], sizes = [1, 128], strides = [1, 1]} : vector<8x128xf32> to vector<1x128xf32>
    %75 = arith.select %26, %73, %74 : vector<1x128xi1>, vector<1x128xf32>
    %c2_i32 = arith.constant 2 : i32
    %76 = arith.muli %c2_i32, %c0_i32_27 : i32
    %77 = arith.index_cast %76 : i32 to index
    %c0_38 = arith.constant 0 : index
    %78 = vector.load %arg8[%77, %c0_38] : memref<16x128xf32, #tpu.memory_space<vmem>>, vector<1x128xf32>
    tpu.vector_store %arg8[%77, %c0_38], %75 {strides = array<i32>} : memref<16x128xf32, #tpu.memory_space<vmem>>, vector<1x128xf32>,
    %79 = vector.extract_strided_slice %72 {offsets = [2, 0], sizes = [1, 128], strides = [1, 1]} : vector<8x128xf32> to vector<1x128xf32>
    %c2_i32_39 = arith.constant 2 : i32
    %80 = arith.muli %c2_i32_39, %c0_i32_27 : i32
    %c1_i32 = arith.constant 1 : i32
    %81 = arith.addi %80, %c1_i32 : i32
    %82 = arith.index_cast %81 : i32 to index
    %c0_40 = arith.constant 0 : index
    %83 = vector.load %arg8[%82, %c0_40] : memref<16x128xf32, #tpu.memory_space<vmem>>, vector<1x128xf32>
    tpu.vector_store %arg8[%82, %c0_40], %79 {strides = array<i32>} : memref<16x128xf32, #tpu.memory_space<vmem>>, vector<1x128xf32>,
    %c1_i32_41 = arith.constant 1 : i32
    %84 = arith.index_cast %c1_i32_41 : i32 to index
    %c0_42 = arith.constant 0 : index
    %85 = vector.load %arg9[%84, %c0_42] : memref<8x512xf32, #tpu.memory_space<vmem>>, vector<1x512xf32>
    %86 = arith.index_cast %c1_i32_41 : i32 to index
    %c0_43 = arith.constant 0 : index
    %87 = vector.load %arg10[%86, %c0_43] : memref<8x512xf32, #tpu.memory_space<vmem>>, vector<1x512xf32>
    %88 = arith.index_cast %c1_i32_41 : i32 to index
    %c0_44 = arith.constant 0 : index
    %89 = vector.load %arg11[%88, %c0_44] : memref<8x512xf32, #tpu.memory_space<vmem>>, vector<1x512xf32>
    %90 = vector.shape_cast %23 : vector<8x1xi1> to vector<8x1xi1>
    %91 = vector.broadcast %90 : vector<8x1xi1> to vector<8x512xi1>
    %92 = vector.shape_cast %85 : vector<1x512xf32> to vector<1x512xf32>
    %93 = vector.broadcast %92 : vector<1x512xf32> to vector<8x512xf32>
    %94 = vector.shape_cast %87 : vector<1x512xf32> to vector<1x512xf32>
    %95 = vector.broadcast %94 : vector<1x512xf32> to vector<8x512xf32>
    %96 = arith.select %91, %93, %95 : vector<8x512xi1>, vector<8x512xf32>
    %97 = vector.broadcast %89 : vector<1x512xf32> to vector<8x512xf32>
    %98 = arith.addf %96, %97 : vector<8x512xf32>
    %c0_45 = arith.constant 0 : index
    %c0_46 = arith.constant 0 : index
    %99 = vector.load %arg5[%c0_45, %c0_46] : memref<128x512xf32, #tpu.memory_space<vmem>>, vector<128x512xf32>
    %cst_47 = arith.constant dense<0.000000e+00> : vector<8x512xf32>
    %100 = tpu.matmul %71, %99, %cst_47 {dimension_numbers = #tpu.dot_dimension_numbers<[1], [0], [0], [1], [0, 0, 1, 1], [], []>} : vector<8x128xf32>, vector<128x512xf32>, vector<8x512xf32> -> vector<8x512xf32>
    %101 = arith.addf %98, %100 : vector<8x512xf32>
    %102 = vector.extract_strided_slice %101 {offsets = [0, 0], sizes = [8, 128], strides = [1, 1]} : vector<8x512xf32> to vector<8x128xf32>
    %103 = arith.negf %102 : vector<8x128xf32>
    %104 = math.exp %103 : vector<8x128xf32>
    %cst_48 = arith.constant 1.000000e+00 : f32
    %105 = vector.broadcast %cst_48 : f32 to vector<8x128xf32>
    %106 = arith.addf %105, %104 : vector<8x128xf32>
    %107 = arith.divf %105, %106 : vector<8x128xf32>
    %108 = vector.extract_strided_slice %101 {offsets = [0, 128], sizes = [8, 128], strides = [1, 1]} : vector<8x512xf32> to vector<8x128xf32>
    %109 = arith.negf %108 : vector<8x128xf32>
    %110 = math.exp %109 : vector<8x128xf32>
    %cst_49 = arith.constant 1.000000e+00 : f32
    %111 = vector.broadcast %cst_49 : f32 to vector<8x128xf32>
    %112 = arith.addf %111, %110 : vector<8x128xf32>
    %113 = arith.divf %111, %112 : vector<8x128xf32>
    %114 = vector.extract_strided_slice %101 {offsets = [0, 256], sizes = [8, 128], strides = [1, 1]} : vector<8x512xf32> to vector<8x128xf32>
    %115 = math.tanh %114 : vector<8x128xf32>
    %116 = vector.extract_strided_slice %101 {offsets = [0, 384], sizes = [8, 128], strides = [1, 1]} : vector<8x512xf32> to vector<8x128xf32>
    %117 = arith.negf %116 : vector<8x128xf32>
    %118 = math.exp %117 : vector<8x128xf32>
    %cst_50 = arith.constant 1.000000e+00 : f32
    %119 = vector.broadcast %cst_50 : f32 to vector<8x128xf32>
    %120 = arith.addf %119, %118 : vector<8x128xf32>
    %121 = arith.divf %119, %120 : vector<8x128xf32>
    %122 = arith.mulf %113, %69 : vector<8x128xf32>
    %123 = arith.mulf %107, %115 : vector<8x128xf32>
    %124 = arith.addf %122, %123 : vector<8x128xf32>
    %125 = math.tanh %124 : vector<8x128xf32>
    %126 = arith.mulf %121, %125 : vector<8x128xf32>
    %c64_i32_51 = arith.constant 64 : i32
    %127 = tpu.dynamic_rotate %126 by %c64_i32_51 dim 1 : vector<8x128xf32>, i32 -> vector<8x128xf32>
    %128 = vector.extract_strided_slice %126 {offsets = [0, 0], sizes = [1, 128], strides = [1, 1]} : vector<8x128xf32> to vector<1x128xf32>
    %129 = vector.extract_strided_slice %127 {offsets = [1, 0], sizes = [1, 128], strides = [1, 1]} : vector<8x128xf32> to vector<1x128xf32>
    %130 = arith.select %26, %128, %129 : vector<1x128xi1>, vector<1x128xf32>
    %c2_i32_52 = arith.constant 2 : i32
    %131 = arith.muli %c2_i32_52, %c1_i32_41 : i32
    %132 = arith.index_cast %131 : i32 to index
    %c0_53 = arith.constant 0 : index
    %133 = vector.load %arg8[%132, %c0_53] : memref<16x128xf32, #tpu.memory_space<vmem>>, vector<1x128xf32>
    tpu.vector_store %arg8[%132, %c0_53], %130 {strides = array<i32>} : memref<16x128xf32, #tpu.memory_space<vmem>>, vector<1x128xf32>,
    %134 = vector.extract_strided_slice %127 {offsets = [2, 0], sizes = [1, 128], strides = [1, 1]} : vector<8x128xf32> to vector<1x128xf32>
    %c2_i32_54 = arith.constant 2 : i32
    %135 = arith.muli %c2_i32_54, %c1_i32_41 : i32
    %c1_i32_55 = arith.constant 1 : i32
    %136 = arith.addi %135, %c1_i32_55 : i32
    %137 = arith.index_cast %136 : i32 to index
    %c0_56 = arith.constant 0 : index
    %138 = vector.load %arg8[%137, %c0_56] : memref<16x128xf32, #tpu.memory_space<vmem>>, vector<1x128xf32>
    tpu.vector_store %arg8[%137, %c0_56], %134 {strides = array<i32>} : memref<16x128xf32, #tpu.memory_space<vmem>>, vector<1x128xf32>,
    %c2_i32_57 = arith.constant 2 : i32
    %139 = arith.index_cast %c2_i32_57 : i32 to index
    %c0_58 = arith.constant 0 : index
    %140 = vector.load %arg9[%139, %c0_58] : memref<8x512xf32, #tpu.memory_space<vmem>>, vector<1x512xf32>
    %141 = arith.index_cast %c2_i32_57 : i32 to index
    %c0_59 = arith.constant 0 : index
    %142 = vector.load %arg10[%141, %c0_59] : memref<8x512xf32, #tpu.memory_space<vmem>>, vector<1x512xf32>
    %143 = arith.index_cast %c2_i32_57 : i32 to index
    %c0_60 = arith.constant 0 : index
    %144 = vector.load %arg11[%143, %c0_60] : memref<8x512xf32, #tpu.memory_space<vmem>>, vector<1x512xf32>
    %145 = vector.shape_cast %23 : vector<8x1xi1> to vector<8x1xi1>
    %146 = vector.broadcast %145 : vector<8x1xi1> to vector<8x512xi1>
    %147 = vector.shape_cast %140 : vector<1x512xf32> to vector<1x512xf32>
    %148 = vector.broadcast %147 : vector<1x512xf32> to vector<8x512xf32>
    %149 = vector.shape_cast %142 : vector<1x512xf32> to vector<1x512xf32>
    %150 = vector.broadcast %149 : vector<1x512xf32> to vector<8x512xf32>
    %151 = arith.select %146, %148, %150 : vector<8x512xi1>, vector<8x512xf32>
    %152 = vector.broadcast %144 : vector<1x512xf32> to vector<8x512xf32>
    %153 = arith.addf %151, %152 : vector<8x512xf32>
    %c0_61 = arith.constant 0 : index
    %c0_62 = arith.constant 0 : index
    %154 = vector.load %arg5[%c0_61, %c0_62] : memref<128x512xf32, #tpu.memory_space<vmem>>, vector<128x512xf32>
    %cst_63 = arith.constant dense<0.000000e+00> : vector<8x512xf32>
    %155 = tpu.matmul %126, %154, %cst_63 {dimension_numbers = #tpu.dot_dimension_numbers<[1], [0], [0], [1], [0, 0, 1, 1], [], []>} : vector<8x128xf32>, vector<128x512xf32>, vector<8x512xf32> -> vector<8x512xf32>
    %156 = arith.addf %153, %155 : vector<8x512xf32>
    %157 = vector.extract_strided_slice %156 {offsets = [0, 0], sizes = [8, 128], strides = [1, 1]} : vector<8x512xf32> to vector<8x128xf32>
    %158 = arith.negf %157 : vector<8x128xf32>
    %159 = math.exp %158 : vector<8x128xf32>
    %cst_64 = arith.constant 1.000000e+00 : f32
    %160 = vector.broadcast %cst_64 : f32 to vector<8x128xf32>
    %161 = arith.addf %160, %159 : vector<8x128xf32>
    %162 = arith.divf %160, %161 : vector<8x128xf32>
    %163 = vector.extract_strided_slice %156 {offsets = [0, 128], sizes = [8, 128], strides = [1, 1]} : vector<8x512xf32> to vector<8x128xf32>
    %164 = arith.negf %163 : vector<8x128xf32>
    %165 = math.exp %164 : vector<8x128xf32>
    %cst_65 = arith.constant 1.000000e+00 : f32
    %166 = vector.broadcast %cst_65 : f32 to vector<8x128xf32>
    %167 = arith.addf %166, %165 : vector<8x128xf32>
    %168 = arith.divf %166, %167 : vector<8x128xf32>
    %169 = vector.extract_strided_slice %156 {offsets = [0, 256], sizes = [8, 128], strides = [1, 1]} : vector<8x512xf32> to vector<8x128xf32>
    %170 = math.tanh %169 : vector<8x128xf32>
    %171 = vector.extract_strided_slice %156 {offsets = [0, 384], sizes = [8, 128], strides = [1, 1]} : vector<8x512xf32> to vector<8x128xf32>
    %172 = arith.negf %171 : vector<8x128xf32>
    %173 = math.exp %172 : vector<8x128xf32>
    %cst_66 = arith.constant 1.000000e+00 : f32
    %174 = vector.broadcast %cst_66 : f32 to vector<8x128xf32>
    %175 = arith.addf %174, %173 : vector<8x128xf32>
    %176 = arith.divf %174, %175 : vector<8x128xf32>
    %177 = arith.mulf %168, %124 : vector<8x128xf32>
    %178 = arith.mulf %162, %170 : vector<8x128xf32>
    %179 = arith.addf %177, %178 : vector<8x128xf32>
    %180 = math.tanh %179 : vector<8x128xf32>
    %181 = arith.mulf %176, %180 : vector<8x128xf32>
    %c64_i32_67 = arith.constant 64 : i32
    %182 = tpu.dynamic_rotate %181 by %c64_i32_67 dim 1 : vector<8x128xf32>, i32 -> vector<8x128xf32>
    %183 = vector.extract_strided_slice %181 {offsets = [0, 0], sizes = [1, 128], strides = [1, 1]} : vector<8x128xf32> to vector<1x128xf32>
    %184 = vector.extract_strided_slice %182 {offsets = [1, 0], sizes = [1, 128], strides = [1, 1]} : vector<8x128xf32> to vector<1x128xf32>
    %185 = arith.select %26, %183, %184 : vector<1x128xi1>, vector<1x128xf32>
    %c2_i32_68 = arith.constant 2 : i32
    %186 = arith.muli %c2_i32_68, %c2_i32_57 : i32
    %187 = arith.index_cast %186 : i32 to index
    %c0_69 = arith.constant 0 : index
    %188 = vector.load %arg8[%187, %c0_69] : memref<16x128xf32, #tpu.memory_space<vmem>>, vector<1x128xf32>
    tpu.vector_store %arg8[%187, %c0_69], %185 {strides = array<i32>} : memref<16x128xf32, #tpu.memory_space<vmem>>, vector<1x128xf32>,
    %189 = vector.extract_strided_slice %182 {offsets = [2, 0], sizes = [1, 128], strides = [1, 1]} : vector<8x128xf32> to vector<1x128xf32>
    %c2_i32_70 = arith.constant 2 : i32
    %190 = arith.muli %c2_i32_70, %c2_i32_57 : i32
    %c1_i32_71 = arith.constant 1 : i32
    %191 = arith.addi %190, %c1_i32_71 : i32
    %192 = arith.index_cast %191 : i32 to index
    %c0_72 = arith.constant 0 : index
    %193 = vector.load %arg8[%192, %c0_72] : memref<16x128xf32, #tpu.memory_space<vmem>>, vector<1x128xf32>
    tpu.vector_store %arg8[%192, %c0_72], %189 {strides = array<i32>} : memref<16x128xf32, #tpu.memory_space<vmem>>, vector<1x128xf32>,
    %c3_i32 = arith.constant 3 : i32
    %194 = arith.index_cast %c3_i32 : i32 to index
    %c0_73 = arith.constant 0 : index
    %195 = vector.load %arg9[%194, %c0_73] : memref<8x512xf32, #tpu.memory_space<vmem>>, vector<1x512xf32>
    %196 = arith.index_cast %c3_i32 : i32 to index
    %c0_74 = arith.constant 0 : index
    %197 = vector.load %arg10[%196, %c0_74] : memref<8x512xf32, #tpu.memory_space<vmem>>, vector<1x512xf32>
    %198 = arith.index_cast %c3_i32 : i32 to index
    %c0_75 = arith.constant 0 : index
    %199 = vector.load %arg11[%198, %c0_75] : memref<8x512xf32, #tpu.memory_space<vmem>>, vector<1x512xf32>
    %200 = vector.shape_cast %23 : vector<8x1xi1> to vector<8x1xi1>
    %201 = vector.broadcast %200 : vector<8x1xi1> to vector<8x512xi1>
    %202 = vector.shape_cast %195 : vector<1x512xf32> to vector<1x512xf32>
    %203 = vector.broadcast %202 : vector<1x512xf32> to vector<8x512xf32>
    %204 = vector.shape_cast %197 : vector<1x512xf32> to vector<1x512xf32>
    %205 = vector.broadcast %204 : vector<1x512xf32> to vector<8x512xf32>
    %206 = arith.select %201, %203, %205 : vector<8x512xi1>, vector<8x512xf32>
    %207 = vector.broadcast %199 : vector<1x512xf32> to vector<8x512xf32>
    %208 = arith.addf %206, %207 : vector<8x512xf32>
    %c0_76 = arith.constant 0 : index
    %c0_77 = arith.constant 0 : index
    %209 = vector.load %arg5[%c0_76, %c0_77] : memref<128x512xf32, #tpu.memory_space<vmem>>, vector<128x512xf32>
    %cst_78 = arith.constant dense<0.000000e+00> : vector<8x512xf32>
    %210 = tpu.matmul %181, %209, %cst_78 {dimension_numbers = #tpu.dot_dimension_numbers<[1], [0], [0], [1], [0, 0, 1, 1], [], []>} : vector<8x128xf32>, vector<128x512xf32>, vector<8x512xf32> -> vector<8x512xf32>
    %211 = arith.addf %208, %210 : vector<8x512xf32>
    %212 = vector.extract_strided_slice %211 {offsets = [0, 0], sizes = [8, 128], strides = [1, 1]} : vector<8x512xf32> to vector<8x128xf32>
    %213 = arith.negf %212 : vector<8x128xf32>
    %214 = math.exp %213 : vector<8x128xf32>
    %cst_79 = arith.constant 1.000000e+00 : f32
    %215 = vector.broadcast %cst_79 : f32 to vector<8x128xf32>
    %216 = arith.addf %215, %214 : vector<8x128xf32>
    %217 = arith.divf %215, %216 : vector<8x128xf32>
    %218 = vector.extract_strided_slice %211 {offsets = [0, 128], sizes = [8, 128], strides = [1, 1]} : vector<8x512xf32> to vector<8x128xf32>
    %219 = arith.negf %218 : vector<8x128xf32>
    %220 = math.exp %219 : vector<8x128xf32>
    %cst_80 = arith.constant 1.000000e+00 : f32
    %221 = vector.broadcast %cst_80 : f32 to vector<8x128xf32>
    %222 = arith.addf %221, %220 : vector<8x128xf32>
    %223 = arith.divf %221, %222 : vector<8x128xf32>
    %224 = vector.extract_strided_slice %211 {offsets = [0, 256], sizes = [8, 128], strides = [1, 1]} : vector<8x512xf32> to vector<8x128xf32>
    %225 = math.tanh %224 : vector<8x128xf32>
    %226 = vector.extract_strided_slice %211 {offsets = [0, 384], sizes = [8, 128], strides = [1, 1]} : vector<8x512xf32> to vector<8x128xf32>
    %227 = arith.negf %226 : vector<8x128xf32>
    %228 = math.exp %227 : vector<8x128xf32>
    %cst_81 = arith.constant 1.000000e+00 : f32
    %229 = vector.broadcast %cst_81 : f32 to vector<8x128xf32>
    %230 = arith.addf %229, %228 : vector<8x128xf32>
    %231 = arith.divf %229, %230 : vector<8x128xf32>
    %232 = arith.mulf %223, %179 : vector<8x128xf32>
    %233 = arith.mulf %217, %225 : vector<8x128xf32>
    %234 = arith.addf %232, %233 : vector<8x128xf32>
    %235 = math.tanh %234 : vector<8x128xf32>
    %236 = arith.mulf %231, %235 : vector<8x128xf32>
    %c64_i32_82 = arith.constant 64 : i32
    %237 = tpu.dynamic_rotate %236 by %c64_i32_82 dim 1 : vector<8x128xf32>, i32 -> vector<8x128xf32>
    %238 = vector.extract_strided_slice %236 {offsets = [0, 0], sizes = [1, 128], strides = [1, 1]} : vector<8x128xf32> to vector<1x128xf32>
    %239 = vector.extract_strided_slice %237 {offsets = [1, 0], sizes = [1, 128], strides = [1, 1]} : vector<8x128xf32> to vector<1x128xf32>
    %240 = arith.select %26, %238, %239 : vector<1x128xi1>, vector<1x128xf32>
    %c2_i32_83 = arith.constant 2 : i32
    %241 = arith.muli %c2_i32_83, %c3_i32 : i32
    %242 = arith.index_cast %241 : i32 to index
    %c0_84 = arith.constant 0 : index
    %243 = vector.load %arg8[%242, %c0_84] : memref<16x128xf32, #tpu.memory_space<vmem>>, vector<1x128xf32>
    tpu.vector_store %arg8[%242, %c0_84], %240 {strides = array<i32>} : memref<16x128xf32, #tpu.memory_space<vmem>>, vector<1x128xf32>,
    %244 = vector.extract_strided_slice %237 {offsets = [2, 0], sizes = [1, 128], strides = [1, 1]} : vector<8x128xf32> to vector<1x128xf32>
    %c2_i32_85 = arith.constant 2 : i32
    %245 = arith.muli %c2_i32_85, %c3_i32 : i32
    %c1_i32_86 = arith.constant 1 : i32
    %246 = arith.addi %245, %c1_i32_86 : i32
    %247 = arith.index_cast %246 : i32 to index
    %c0_87 = arith.constant 0 : index
    %248 = vector.load %arg8[%247, %c0_87] : memref<16x128xf32, #tpu.memory_space<vmem>>, vector<1x128xf32>
    tpu.vector_store %arg8[%247, %c0_87], %244 {strides = array<i32>} : memref<16x128xf32, #tpu.memory_space<vmem>>, vector<1x128xf32>,
    %c4_i32 = arith.constant 4 : i32
    %249 = arith.index_cast %c4_i32 : i32 to index
    %c0_88 = arith.constant 0 : index
    %250 = vector.load %arg9[%249, %c0_88] : memref<8x512xf32, #tpu.memory_space<vmem>>, vector<1x512xf32>
    %251 = arith.index_cast %c4_i32 : i32 to index
    %c0_89 = arith.constant 0 : index
    %252 = vector.load %arg10[%251, %c0_89] : memref<8x512xf32, #tpu.memory_space<vmem>>, vector<1x512xf32>
    %253 = arith.index_cast %c4_i32 : i32 to index
    %c0_90 = arith.constant 0 : index
    %254 = vector.load %arg11[%253, %c0_90] : memref<8x512xf32, #tpu.memory_space<vmem>>, vector<1x512xf32>
    %255 = vector.shape_cast %23 : vector<8x1xi1> to vector<8x1xi1>
    %256 = vector.broadcast %255 : vector<8x1xi1> to vector<8x512xi1>
    %257 = vector.shape_cast %250 : vector<1x512xf32> to vector<1x512xf32>
    %258 = vector.broadcast %257 : vector<1x512xf32> to vector<8x512xf32>
    %259 = vector.shape_cast %252 : vector<1x512xf32> to vector<1x512xf32>
    %260 = vector.broadcast %259 : vector<1x512xf32> to vector<8x512xf32>
    %261 = arith.select %256, %258, %260 : vector<8x512xi1>, vector<8x512xf32>
    %262 = vector.broadcast %254 : vector<1x512xf32> to vector<8x512xf32>
    %263 = arith.addf %261, %262 : vector<8x512xf32>
    %c0_91 = arith.constant 0 : index
    %c0_92 = arith.constant 0 : index
    %264 = vector.load %arg5[%c0_91, %c0_92] : memref<128x512xf32, #tpu.memory_space<vmem>>, vector<128x512xf32>
    %cst_93 = arith.constant dense<0.000000e+00> : vector<8x512xf32>
    %265 = tpu.matmul %236, %264, %cst_93 {dimension_numbers = #tpu.dot_dimension_numbers<[1], [0], [0], [1], [0, 0, 1, 1], [], []>} : vector<8x128xf32>, vector<128x512xf32>, vector<8x512xf32> -> vector<8x512xf32>
    %266 = arith.addf %263, %265 : vector<8x512xf32>
    %267 = vector.extract_strided_slice %266 {offsets = [0, 0], sizes = [8, 128], strides = [1, 1]} : vector<8x512xf32> to vector<8x128xf32>
    %268 = arith.negf %267 : vector<8x128xf32>
    %269 = math.exp %268 : vector<8x128xf32>
    %cst_94 = arith.constant 1.000000e+00 : f32
    %270 = vector.broadcast %cst_94 : f32 to vector<8x128xf32>
    %271 = arith.addf %270, %269 : vector<8x128xf32>
    %272 = arith.divf %270, %271 : vector<8x128xf32>
    %273 = vector.extract_strided_slice %266 {offsets = [0, 128], sizes = [8, 128], strides = [1, 1]} : vector<8x512xf32> to vector<8x128xf32>
    %274 = arith.negf %273 : vector<8x128xf32>
    %275 = math.exp %274 : vector<8x128xf32>
    %cst_95 = arith.constant 1.000000e+00 : f32
    %276 = vector.broadcast %cst_95 : f32 to vector<8x128xf32>
    %277 = arith.addf %276, %275 : vector<8x128xf32>
    %278 = arith.divf %276, %277 : vector<8x128xf32>
    %279 = vector.extract_strided_slice %266 {offsets = [0, 256], sizes = [8, 128], strides = [1, 1]} : vector<8x512xf32> to vector<8x128xf32>
    %280 = math.tanh %279 : vector<8x128xf32>
    %281 = vector.extract_strided_slice %266 {offsets = [0, 384], sizes = [8, 128], strides = [1, 1]} : vector<8x512xf32> to vector<8x128xf32>
    %282 = arith.negf %281 : vector<8x128xf32>
    %283 = math.exp %282 : vector<8x128xf32>
    %cst_96 = arith.constant 1.000000e+00 : f32
    %284 = vector.broadcast %cst_96 : f32 to vector<8x128xf32>
    %285 = arith.addf %284, %283 : vector<8x128xf32>
    %286 = arith.divf %284, %285 : vector<8x128xf32>
    %287 = arith.mulf %278, %234 : vector<8x128xf32>
    %288 = arith.mulf %272, %280 : vector<8x128xf32>
    %289 = arith.addf %287, %288 : vector<8x128xf32>
    %290 = math.tanh %289 : vector<8x128xf32>
    %291 = arith.mulf %286, %290 : vector<8x128xf32>
    %c64_i32_97 = arith.constant 64 : i32
    %292 = tpu.dynamic_rotate %291 by %c64_i32_97 dim 1 : vector<8x128xf32>, i32 -> vector<8x128xf32>
    %293 = vector.extract_strided_slice %291 {offsets = [0, 0], sizes = [1, 128], strides = [1, 1]} : vector<8x128xf32> to vector<1x128xf32>
    %294 = vector.extract_strided_slice %292 {offsets = [1, 0], sizes = [1, 128], strides = [1, 1]} : vector<8x128xf32> to vector<1x128xf32>
    %295 = arith.select %26, %293, %294 : vector<1x128xi1>, vector<1x128xf32>
    %c2_i32_98 = arith.constant 2 : i32
    %296 = arith.muli %c2_i32_98, %c4_i32 : i32
    %297 = arith.index_cast %296 : i32 to index
    %c0_99 = arith.constant 0 : index
    %298 = vector.load %arg8[%297, %c0_99] : memref<16x128xf32, #tpu.memory_space<vmem>>, vector<1x128xf32>
    tpu.vector_store %arg8[%297, %c0_99], %295 {strides = array<i32>} : memref<16x128xf32, #tpu.memory_space<vmem>>, vector<1x128xf32>,
    %299 = vector.extract_strided_slice %292 {offsets = [2, 0], sizes = [1, 128], strides = [1, 1]} : vector<8x128xf32> to vector<1x128xf32>
    %c2_i32_100 = arith.constant 2 : i32
    %300 = arith.muli %c2_i32_100, %c4_i32 : i32
    %c1_i32_101 = arith.constant 1 : i32
    %301 = arith.addi %300, %c1_i32_101 : i32
    %302 = arith.index_cast %301 : i32 to index
    %c0_102 = arith.constant 0 : index
    %303 = vector.load %arg8[%302, %c0_102] : memref<16x128xf32, #tpu.memory_space<vmem>>, vector<1x128xf32>
    tpu.vector_store %arg8[%302, %c0_102], %299 {strides = array<i32>} : memref<16x128xf32, #tpu.memory_space<vmem>>, vector<1x128xf32>,
    %c5_i32 = arith.constant 5 : i32
    %304 = arith.index_cast %c5_i32 : i32 to index
    %c0_103 = arith.constant 0 : index
    %305 = vector.load %arg9[%304, %c0_103] : memref<8x512xf32, #tpu.memory_space<vmem>>, vector<1x512xf32>
    %306 = arith.index_cast %c5_i32 : i32 to index
    %c0_104 = arith.constant 0 : index
    %307 = vector.load %arg10[%306, %c0_104] : memref<8x512xf32, #tpu.memory_space<vmem>>, vector<1x512xf32>
    %308 = arith.index_cast %c5_i32 : i32 to index
    %c0_105 = arith.constant 0 : index
    %309 = vector.load %arg11[%308, %c0_105] : memref<8x512xf32, #tpu.memory_space<vmem>>, vector<1x512xf32>
    %310 = vector.shape_cast %23 : vector<8x1xi1> to vector<8x1xi1>
    %311 = vector.broadcast %310 : vector<8x1xi1> to vector<8x512xi1>
    %312 = vector.shape_cast %305 : vector<1x512xf32> to vector<1x512xf32>
    %313 = vector.broadcast %312 : vector<1x512xf32> to vector<8x512xf32>
    %314 = vector.shape_cast %307 : vector<1x512xf32> to vector<1x512xf32>
    %315 = vector.broadcast %314 : vector<1x512xf32> to vector<8x512xf32>
    %316 = arith.select %311, %313, %315 : vector<8x512xi1>, vector<8x512xf32>
    %317 = vector.broadcast %309 : vector<1x512xf32> to vector<8x512xf32>
    %318 = arith.addf %316, %317 : vector<8x512xf32>
    %c0_106 = arith.constant 0 : index
    %c0_107 = arith.constant 0 : index
    %319 = vector.load %arg5[%c0_106, %c0_107] : memref<128x512xf32, #tpu.memory_space<vmem>>, vector<128x512xf32>
    %cst_108 = arith.constant dense<0.000000e+00> : vector<8x512xf32>
    %320 = tpu.matmul %291, %319, %cst_108 {dimension_numbers = #tpu.dot_dimension_numbers<[1], [0], [0], [1], [0, 0, 1, 1], [], []>} : vector<8x128xf32>, vector<128x512xf32>, vector<8x512xf32> -> vector<8x512xf32>
    %321 = arith.addf %318, %320 : vector<8x512xf32>
    %322 = vector.extract_strided_slice %321 {offsets = [0, 0], sizes = [8, 128], strides = [1, 1]} : vector<8x512xf32> to vector<8x128xf32>
    %323 = arith.negf %322 : vector<8x128xf32>
    %324 = math.exp %323 : vector<8x128xf32>
    %cst_109 = arith.constant 1.000000e+00 : f32
    %325 = vector.broadcast %cst_109 : f32 to vector<8x128xf32>
    %326 = arith.addf %325, %324 : vector<8x128xf32>
    %327 = arith.divf %325, %326 : vector<8x128xf32>
    %328 = vector.extract_strided_slice %321 {offsets = [0, 128], sizes = [8, 128], strides = [1, 1]} : vector<8x512xf32> to vector<8x128xf32>
    %329 = arith.negf %328 : vector<8x128xf32>
    %330 = math.exp %329 : vector<8x128xf32>
    %cst_110 = arith.constant 1.000000e+00 : f32
    %331 = vector.broadcast %cst_110 : f32 to vector<8x128xf32>
    %332 = arith.addf %331, %330 : vector<8x128xf32>
    %333 = arith.divf %331, %332 : vector<8x128xf32>
    %334 = vector.extract_strided_slice %321 {offsets = [0, 256], sizes = [8, 128], strides = [1, 1]} : vector<8x512xf32> to vector<8x128xf32>
    %335 = math.tanh %334 : vector<8x128xf32>
    %336 = vector.extract_strided_slice %321 {offsets = [0, 384], sizes = [8, 128], strides = [1, 1]} : vector<8x512xf32> to vector<8x128xf32>
    %337 = arith.negf %336 : vector<8x128xf32>
    %338 = math.exp %337 : vector<8x128xf32>
    %cst_111 = arith.constant 1.000000e+00 : f32
    %339 = vector.broadcast %cst_111 : f32 to vector<8x128xf32>
    %340 = arith.addf %339, %338 : vector<8x128xf32>
    %341 = arith.divf %339, %340 : vector<8x128xf32>
    %342 = arith.mulf %333, %289 : vector<8x128xf32>
    %343 = arith.mulf %327, %335 : vector<8x128xf32>
    %344 = arith.addf %342, %343 : vector<8x128xf32>
    %345 = math.tanh %344 : vector<8x128xf32>
    %346 = arith.mulf %341, %345 : vector<8x128xf32>
    %c64_i32_112 = arith.constant 64 : i32
    %347 = tpu.dynamic_rotate %346 by %c64_i32_112 dim 1 : vector<8x128xf32>, i32 -> vector<8x128xf32>
    %348 = vector.extract_strided_slice %346 {offsets = [0, 0], sizes = [1, 128], strides = [1, 1]} : vector<8x128xf32> to vector<1x128xf32>
    %349 = vector.extract_strided_slice %347 {offsets = [1, 0], sizes = [1, 128], strides = [1, 1]} : vector<8x128xf32> to vector<1x128xf32>
    %350 = arith.select %26, %348, %349 : vector<1x128xi1>, vector<1x128xf32>
    %c2_i32_113 = arith.constant 2 : i32
    %351 = arith.muli %c2_i32_113, %c5_i32 : i32
    %352 = arith.index_cast %351 : i32 to index
    %c0_114 = arith.constant 0 : index
    %353 = vector.load %arg8[%352, %c0_114] : memref<16x128xf32, #tpu.memory_space<vmem>>, vector<1x128xf32>
    tpu.vector_store %arg8[%352, %c0_114], %350 {strides = array<i32>} : memref<16x128xf32, #tpu.memory_space<vmem>>, vector<1x128xf32>,
    %354 = vector.extract_strided_slice %347 {offsets = [2, 0], sizes = [1, 128], strides = [1, 1]} : vector<8x128xf32> to vector<1x128xf32>
    %c2_i32_115 = arith.constant 2 : i32
    %355 = arith.muli %c2_i32_115, %c5_i32 : i32
    %c1_i32_116 = arith.constant 1 : i32
    %356 = arith.addi %355, %c1_i32_116 : i32
    %357 = arith.index_cast %356 : i32 to index
    %c0_117 = arith.constant 0 : index
    %358 = vector.load %arg8[%357, %c0_117] : memref<16x128xf32, #tpu.memory_space<vmem>>, vector<1x128xf32>
    tpu.vector_store %arg8[%357, %c0_117], %354 {strides = array<i32>} : memref<16x128xf32, #tpu.memory_space<vmem>>, vector<1x128xf32>,
    %c6_i32 = arith.constant 6 : i32
    %359 = arith.index_cast %c6_i32 : i32 to index
    %c0_118 = arith.constant 0 : index
    %360 = vector.load %arg9[%359, %c0_118] : memref<8x512xf32, #tpu.memory_space<vmem>>, vector<1x512xf32>
    %361 = arith.index_cast %c6_i32 : i32 to index
    %c0_119 = arith.constant 0 : index
    %362 = vector.load %arg10[%361, %c0_119] : memref<8x512xf32, #tpu.memory_space<vmem>>, vector<1x512xf32>
    %363 = arith.index_cast %c6_i32 : i32 to index
    %c0_120 = arith.constant 0 : index
    %364 = vector.load %arg11[%363, %c0_120] : memref<8x512xf32, #tpu.memory_space<vmem>>, vector<1x512xf32>
    %365 = vector.shape_cast %23 : vector<8x1xi1> to vector<8x1xi1>
    %366 = vector.broadcast %365 : vector<8x1xi1> to vector<8x512xi1>
    %367 = vector.shape_cast %360 : vector<1x512xf32> to vector<1x512xf32>
    %368 = vector.broadcast %367 : vector<1x512xf32> to vector<8x512xf32>
    %369 = vector.shape_cast %362 : vector<1x512xf32> to vector<1x512xf32>
    %370 = vector.broadcast %369 : vector<1x512xf32> to vector<8x512xf32>
    %371 = arith.select %366, %368, %370 : vector<8x512xi1>, vector<8x512xf32>
    %372 = vector.broadcast %364 : vector<1x512xf32> to vector<8x512xf32>
    %373 = arith.addf %371, %372 : vector<8x512xf32>
    %c0_121 = arith.constant 0 : index
    %c0_122 = arith.constant 0 : index
    %374 = vector.load %arg5[%c0_121, %c0_122] : memref<128x512xf32, #tpu.memory_space<vmem>>, vector<128x512xf32>
    %cst_123 = arith.constant dense<0.000000e+00> : vector<8x512xf32>
    %375 = tpu.matmul %346, %374, %cst_123 {dimension_numbers = #tpu.dot_dimension_numbers<[1], [0], [0], [1], [0, 0, 1, 1], [], []>} : vector<8x128xf32>, vector<128x512xf32>, vector<8x512xf32> -> vector<8x512xf32>
    %376 = arith.addf %373, %375 : vector<8x512xf32>
    %377 = vector.extract_strided_slice %376 {offsets = [0, 0], sizes = [8, 128], strides = [1, 1]} : vector<8x512xf32> to vector<8x128xf32>
    %378 = arith.negf %377 : vector<8x128xf32>
    %379 = math.exp %378 : vector<8x128xf32>
    %cst_124 = arith.constant 1.000000e+00 : f32
    %380 = vector.broadcast %cst_124 : f32 to vector<8x128xf32>
    %381 = arith.addf %380, %379 : vector<8x128xf32>
    %382 = arith.divf %380, %381 : vector<8x128xf32>
    %383 = vector.extract_strided_slice %376 {offsets = [0, 128], sizes = [8, 128], strides = [1, 1]} : vector<8x512xf32> to vector<8x128xf32>
    %384 = arith.negf %383 : vector<8x128xf32>
    %385 = math.exp %384 : vector<8x128xf32>
    %cst_125 = arith.constant 1.000000e+00 : f32
    %386 = vector.broadcast %cst_125 : f32 to vector<8x128xf32>
    %387 = arith.addf %386, %385 : vector<8x128xf32>
    %388 = arith.divf %386, %387 : vector<8x128xf32>
    %389 = vector.extract_strided_slice %376 {offsets = [0, 256], sizes = [8, 128], strides = [1, 1]} : vector<8x512xf32> to vector<8x128xf32>
    %390 = math.tanh %389 : vector<8x128xf32>
    %391 = vector.extract_strided_slice %376 {offsets = [0, 384], sizes = [8, 128], strides = [1, 1]} : vector<8x512xf32> to vector<8x128xf32>
    %392 = arith.negf %391 : vector<8x128xf32>
    %393 = math.exp %392 : vector<8x128xf32>
    %cst_126 = arith.constant 1.000000e+00 : f32
    %394 = vector.broadcast %cst_126 : f32 to vector<8x128xf32>
    %395 = arith.addf %394, %393 : vector<8x128xf32>
    %396 = arith.divf %394, %395 : vector<8x128xf32>
    %397 = arith.mulf %388, %344 : vector<8x128xf32>
    %398 = arith.mulf %382, %390 : vector<8x128xf32>
    %399 = arith.addf %397, %398 : vector<8x128xf32>
    %400 = math.tanh %399 : vector<8x128xf32>
    %401 = arith.mulf %396, %400 : vector<8x128xf32>
    %c64_i32_127 = arith.constant 64 : i32
    %402 = tpu.dynamic_rotate %401 by %c64_i32_127 dim 1 : vector<8x128xf32>, i32 -> vector<8x128xf32>
    %403 = vector.extract_strided_slice %401 {offsets = [0, 0], sizes = [1, 128], strides = [1, 1]} : vector<8x128xf32> to vector<1x128xf32>
    %404 = vector.extract_strided_slice %402 {offsets = [1, 0], sizes = [1, 128], strides = [1, 1]} : vector<8x128xf32> to vector<1x128xf32>
    %405 = arith.select %26, %403, %404 : vector<1x128xi1>, vector<1x128xf32>
    %c2_i32_128 = arith.constant 2 : i32
    %406 = arith.muli %c2_i32_128, %c6_i32 : i32
    %407 = arith.index_cast %406 : i32 to index
    %c0_129 = arith.constant 0 : index
    %408 = vector.load %arg8[%407, %c0_129] : memref<16x128xf32, #tpu.memory_space<vmem>>, vector<1x128xf32>
    tpu.vector_store %arg8[%407, %c0_129], %405 {strides = array<i32>} : memref<16x128xf32, #tpu.memory_space<vmem>>, vector<1x128xf32>,
    %409 = vector.extract_strided_slice %402 {offsets = [2, 0], sizes = [1, 128], strides = [1, 1]} : vector<8x128xf32> to vector<1x128xf32>
    %c2_i32_130 = arith.constant 2 : i32
    %410 = arith.muli %c2_i32_130, %c6_i32 : i32
    %c1_i32_131 = arith.constant 1 : i32
    %411 = arith.addi %410, %c1_i32_131 : i32
    %412 = arith.index_cast %411 : i32 to index
    %c0_132 = arith.constant 0 : index
    %413 = vector.load %arg8[%412, %c0_132] : memref<16x128xf32, #tpu.memory_space<vmem>>, vector<1x128xf32>
    tpu.vector_store %arg8[%412, %c0_132], %409 {strides = array<i32>} : memref<16x128xf32, #tpu.memory_space<vmem>>, vector<1x128xf32>,
    %c7_i32 = arith.constant 7 : i32
    %414 = arith.index_cast %c7_i32 : i32 to index
    %c0_133 = arith.constant 0 : index
    %415 = vector.load %arg9[%414, %c0_133] : memref<8x512xf32, #tpu.memory_space<vmem>>, vector<1x512xf32>
    %416 = arith.index_cast %c7_i32 : i32 to index
    %c0_134 = arith.constant 0 : index
    %417 = vector.load %arg10[%416, %c0_134] : memref<8x512xf32, #tpu.memory_space<vmem>>, vector<1x512xf32>
    %418 = arith.index_cast %c7_i32 : i32 to index
    %c0_135 = arith.constant 0 : index
    %419 = vector.load %arg11[%418, %c0_135] : memref<8x512xf32, #tpu.memory_space<vmem>>, vector<1x512xf32>
    %420 = vector.shape_cast %23 : vector<8x1xi1> to vector<8x1xi1>
    %421 = vector.broadcast %420 : vector<8x1xi1> to vector<8x512xi1>
    %422 = vector.shape_cast %415 : vector<1x512xf32> to vector<1x512xf32>
    %423 = vector.broadcast %422 : vector<1x512xf32> to vector<8x512xf32>
    %424 = vector.shape_cast %417 : vector<1x512xf32> to vector<1x512xf32>
    %425 = vector.broadcast %424 : vector<1x512xf32> to vector<8x512xf32>
    %426 = arith.select %421, %423, %425 : vector<8x512xi1>, vector<8x512xf32>
    %427 = vector.broadcast %419 : vector<1x512xf32> to vector<8x512xf32>
    %428 = arith.addf %426, %427 : vector<8x512xf32>
    %c0_136 = arith.constant 0 : index
    %c0_137 = arith.constant 0 : index
    %429 = vector.load %arg5[%c0_136, %c0_137] : memref<128x512xf32, #tpu.memory_space<vmem>>, vector<128x512xf32>
    %cst_138 = arith.constant dense<0.000000e+00> : vector<8x512xf32>
    %430 = tpu.matmul %401, %429, %cst_138 {dimension_numbers = #tpu.dot_dimension_numbers<[1], [0], [0], [1], [0, 0, 1, 1], [], []>} : vector<8x128xf32>, vector<128x512xf32>, vector<8x512xf32> -> vector<8x512xf32>
    %431 = arith.addf %428, %430 : vector<8x512xf32>
    %432 = vector.extract_strided_slice %431 {offsets = [0, 0], sizes = [8, 128], strides = [1, 1]} : vector<8x512xf32> to vector<8x128xf32>
    %433 = arith.negf %432 : vector<8x128xf32>
    %434 = math.exp %433 : vector<8x128xf32>
    %cst_139 = arith.constant 1.000000e+00 : f32
    %435 = vector.broadcast %cst_139 : f32 to vector<8x128xf32>
    %436 = arith.addf %435, %434 : vector<8x128xf32>
    %437 = arith.divf %435, %436 : vector<8x128xf32>
    %438 = vector.extract_strided_slice %431 {offsets = [0, 128], sizes = [8, 128], strides = [1, 1]} : vector<8x512xf32> to vector<8x128xf32>
    %439 = arith.negf %438 : vector<8x128xf32>
    %440 = math.exp %439 : vector<8x128xf32>
    %cst_140 = arith.constant 1.000000e+00 : f32
    %441 = vector.broadcast %cst_140 : f32 to vector<8x128xf32>
    %442 = arith.addf %441, %440 : vector<8x128xf32>
    %443 = arith.divf %441, %442 : vector<8x128xf32>
    %444 = vector.extract_strided_slice %431 {offsets = [0, 256], sizes = [8, 128], strides = [1, 1]} : vector<8x512xf32> to vector<8x128xf32>
    %445 = math.tanh %444 : vector<8x128xf32>
    %446 = vector.extract_strided_slice %431 {offsets = [0, 384], sizes = [8, 128], strides = [1, 1]} : vector<8x512xf32> to vector<8x128xf32>
    %447 = arith.negf %446 : vector<8x128xf32>
    %448 = math.exp %447 : vector<8x128xf32>
    %cst_141 = arith.constant 1.000000e+00 : f32
    %449 = vector.broadcast %cst_141 : f32 to vector<8x128xf32>
    %450 = arith.addf %449, %448 : vector<8x128xf32>
    %451 = arith.divf %449, %450 : vector<8x128xf32>
    %452 = arith.mulf %443, %399 : vector<8x128xf32>
    %453 = arith.mulf %437, %445 : vector<8x128xf32>
    %454 = arith.addf %452, %453 : vector<8x128xf32>
    %455 = math.tanh %454 : vector<8x128xf32>
    %456 = arith.mulf %451, %455 : vector<8x128xf32>
    %c64_i32_142 = arith.constant 64 : i32
    %457 = tpu.dynamic_rotate %456 by %c64_i32_142 dim 1 : vector<8x128xf32>, i32 -> vector<8x128xf32>
    %458 = vector.extract_strided_slice %456 {offsets = [0, 0], sizes = [1, 128], strides = [1, 1]} : vector<8x128xf32> to vector<1x128xf32>
    %459 = vector.extract_strided_slice %457 {offsets = [1, 0], sizes = [1, 128], strides = [1, 1]} : vector<8x128xf32> to vector<1x128xf32>
    %460 = arith.select %26, %458, %459 : vector<1x128xi1>, vector<1x128xf32>
    %c2_i32_143 = arith.constant 2 : i32
    %461 = arith.muli %c2_i32_143, %c7_i32 : i32
    %462 = arith.index_cast %461 : i32 to index
    %c0_144 = arith.constant 0 : index
    %463 = vector.load %arg8[%462, %c0_144] : memref<16x128xf32, #tpu.memory_space<vmem>>, vector<1x128xf32>
    tpu.vector_store %arg8[%462, %c0_144], %460 {strides = array<i32>} : memref<16x128xf32, #tpu.memory_space<vmem>>, vector<1x128xf32>,
    %464 = vector.extract_strided_slice %457 {offsets = [2, 0], sizes = [1, 128], strides = [1, 1]} : vector<8x128xf32> to vector<1x128xf32>
    %c2_i32_145 = arith.constant 2 : i32
    %465 = arith.muli %c2_i32_145, %c7_i32 : i32
    %c1_i32_146 = arith.constant 1 : i32
    %466 = arith.addi %465, %c1_i32_146 : i32
    %467 = arith.index_cast %466 : i32 to index
    %c0_147 = arith.constant 0 : index
    %468 = vector.load %arg8[%467, %c0_147] : memref<16x128xf32, #tpu.memory_space<vmem>>, vector<1x128xf32>
    tpu.vector_store %arg8[%467, %c0_147], %464 {strides = array<i32>} : memref<16x128xf32, #tpu.memory_space<vmem>>, vector<1x128xf32>,
    %c8_i32 = arith.constant 8 : i32
    return
  }
}

</mosaic_0001>

<bundles_post_ra>
// kernel: fused_encoder_pallas.1
= control target key start
LH: loop header
LB: loop body
LE: loop exit
PB: predicated region body
PF: predicated region fallthrough
CT: control target
= control target key end

     0   :  { %13 = vsyncpa [#allocation6], 0  ;;  %s4415_s0 = inlined_call_operand.vmem [shape: f32[8,128], index: 0, kind: input, shape index: {}]   ;;  %s4416_s1 = inlined_call_operand.vmem [shape: f32[8,128], index: 1, kind: input, shape index: {}]   ;;  %s4417_s2 = inlined_call_operand.vmem [shape: f32[8,128], index: 2, kind: input, shape index: {}]   ;;  %s4418_s3 = inlined_call_operand.hbm [shape: f32[128,512], index: 3, kind: input, shape index: {}]   ;;  %s4419_s4 = inlined_call_operand.hbm [shape: f32[128,512], index: 4, kind: input, shape index: {}]   ;;  %s4420_s5 = inlined_call_operand.hbm [shape: f32[128,512], index: 5, kind: input, shape index: {}]   ;;  %s4421_s6 = inlined_call_operand.vmem [shape: f32[1,512], index: 6, kind: input, shape index: {}]   ;;  %s4422_s7 = inlined_call_operand.hbm [shape: f32[1,512], index: 7, kind: input, shape index: {}]   ;;  %s4423_s8 = inlined_call_operand.vmem [shape: f32[16,128], index: 8, kind: output, shape index: {}]  }
   0x1   :  { %14 = vsyncpa [#allocation8], 0 }
   0x2   :  { %15 = vsyncpa [#allocation11], 0  ;;  %s39_s29 = sshll.u32 %s4419_s4, 4  ;;  %s2921_s30 = smov [#allocation7]   ;;  %s40_s29 = int_to_ptr.hbm [resolvable:$true] %s39_s29 }
   0x3   :  { %s41_s9 = sshll.u32 %s2921_s30, 4  ;;  %s26_s12 = sshll.u32 %s4418_s3, 4  ;;  %s42_s9 = int_to_ptr.vmem [resolvable:$true] %s41_s9  ;;  %s27_s12 = int_to_ptr.hbm [resolvable:$true] %s26_s12 }
   0x4   :  { %s2922_s13 = smov 512   ;;  %s2923_s14 = smov 32  }
   0x5   :  { %47 = dma.hbm_to_vmem [thread:$0]  %s40_s29, 8192, %s42_s9, [#allocation8], %s2922_s13, %s2922_s13, %s2923_s14  }
   0x6   :  { %s2924_s15 = smov [#allocation5]   ;;  %s52_s19 = sshll.u32 %s4420_s5, 4  ;;  %s53_s19 = int_to_ptr.hbm [resolvable:$true] %s52_s19 }
   0x7   :  { %s28_s16 = sshll.u32 %s2924_s15, 4  ;;  %s68_s21 = sshll.u32 %s4422_s7, 4  ;;  %s29_s16 = int_to_ptr.vmem [resolvable:$true] %s28_s16  ;;  %s69_s21 = int_to_ptr.hbm [resolvable:$true] %s68_s21 }
   0x8   :  { %34 = dma.hbm_to_vmem [thread:$0]  %s27_s12, 8192, %s29_s16, [#allocation6], %s2922_s13, %s2922_s13, %s2923_s14  }
   0x9   :  { %s2925_s22 = smov [#allocation9]   ;;  %s2926_s3 = smov [#allocation10]  }
   0xa   :  { %s54_s23 = sshll.u32 %s2925_s22, 4  ;;  %s70_s24 = sshll.u32 %s2926_s3, 4  ;;  %s55_s23 = int_to_ptr.vmem [resolvable:$true] %s54_s23  ;;  %s71_s24 = int_to_ptr.vmem [resolvable:$true] %s70_s24 }
   0xb   :  { %60 = dma.hbm_to_vmem [thread:$0]  %s53_s19, 8192, %s55_s23, [#allocation8], %s2922_s13, %s2922_s13, %s2923_s14  }
   0xc   :  { %73 = dma.hbm_to_vmem [thread:$0]  %s69_s21, 64, %s71_s24, [#allocation11]  }
   0xd   :  { %2915 = dma.done.wait [#allocation6], 8192  }
   0xe   :  { %2916 = vsyncadd [#allocation6], 4294959104 }
   0xf   :  { %2917 = dma.done.wait [#allocation8], 16384  }
  0x10   :  { %2918 = vsyncadd [#allocation8], 4294950912 }
  0x11   :  { %2919 = dma.done.wait [#allocation11], 64  }
  0x12   :  { %2920 = vsyncadd [#allocation11], 4294967232  ;;  %v2986_v0 = vld [vmem:[#allocation5 + $0x1e0] sm:$0xff]  ;;  %v2988_v1 = vld [vmem:[#allocation5 + $0x1e8] sm:$0xff] }
  0x13   :  { %v2990_v2 = vld [vmem:[#allocation5 + $0x1f0] sm:$0xff]  ;;  %165 = vmatpush.msra.mxu0 %v2986_v0  ;;  %185 = vmatpush.msra.mxu1 %v2988_v1  ;;  %v2994_v3 = vld [vmem:[#allocation5 + $0x1f8] sm:$0xff]  ;;  %v2996_v4 = vld [vmem:[#allocation5 + $0x1c0] sm:$0xff] }
  0x14   :  { %v2998_v5 = vld [vmem:[#allocation5 + $0x1c8] sm:$0xff]  ;;  %205 = vmatpush.msra.mxu2 %v2990_v2  ;;  %225 = vmatpush.msra.mxu3 %v2994_v3  ;;  %v3002_v6 = vld [vmem:[#allocation5 + $0x1d0] sm:$0xff]  ;;  %v3004_v7 = vld [vmem:[#allocation5 + $0x1d8] sm:$0xff] }
  0x15   :  { %v3006_v8 = vld [vmem:[#allocation5 + $0x1a0] sm:$0xff]  ;;  %166 = vmatpush.msra.mxu0 %v2996_v4  ;;  %186 = vmatpush.msra.mxu1 %v2998_v5  ;;  %v3010_v9 = vld [vmem:[#allocation5 + $0x1a8] sm:$0xff]  ;;  %v3012_v10 = vld [vmem:[#allocation5 + $0x1b0] sm:$0xff] }
  0x16   :  { %v3014_v11 = vld [vmem:[#allocation5 + $0x1b8] sm:$0xff]  ;;  %206 = vmatpush.msra.mxu2 %v3002_v6  ;;  %226 = vmatpush.msra.mxu3 %v3004_v7  ;;  %v3018_v12 = vld [vmem:[#allocation5 + $0x180] sm:$0xff]  ;;  %v3020_v13 = vld [vmem:[#allocation5 + $0x188] sm:$0xff] }
  0x17   :  { %167 = vmatpush.msra.mxu0 %v3006_v8  ;;  %187 = vmatpush.msra.mxu1 %v3010_v9  ;;  %v3024_v14 = vld [vmem:[#allocation5 + $0x190] sm:$0xff]  ;;  %v3026_v15 = vld [vmem:[#allocation5 + $0x198] sm:$0xff]  ;;  %v3030_v16 = vld [vmem:[#allocation5 + $0x160] sm:$0xff] }
  0x18   :  { %207 = vmatpush.msra.mxu2 %v3012_v10  ;;  %227 = vmatpush.msra.mxu3 %v3014_v11  ;;  %v3032_v17 = vld [vmem:[#allocation5 + $0x168] sm:$0xff]  ;;  %v3036_v18 = vld [vmem:[#allocation5 + $0x170] sm:$0xff]  ;;  %v3038_v19 = vld [vmem:[#allocation5 + $0x178] sm:$0xff] }
  0x19   :  { %168 = vmatpush.msra.mxu0 %v3018_v12  ;;  %188 = vmatpush.msra.mxu1 %v3020_v13  ;;  %v3042_v20 = vld [vmem:[#allocation5 + $0x140] sm:$0xff]  ;;  %v3044_v21 = vld [vmem:[#allocation5 + $0x148] sm:$0xff]  ;;  %v3048_v22 = vld [vmem:[#allocation5 + $0x150] sm:$0xff] }
  0x1a   :  { %208 = vmatpush.msra.mxu2 %v3024_v14  ;;  %228 = vmatpush.msra.mxu3 %v3026_v15  ;;  %v3050_v23 = vld [vmem:[#allocation5 + $0x158] sm:$0xff]  ;;  %v3054_v24 = vld [vmem:[#allocation5 + $0x120] sm:$0xff]  ;;  %v3056_v25 = vld [vmem:[#allocation5 + $0x128] sm:$0xff] }
  0x1b   :  { %169 = vmatpush.msra.mxu0 %v3030_v16  ;;  %189 = vmatpush.msra.mxu1 %v3032_v17  ;;  %v3060_v26 = vld [vmem:[#allocation5 + $0x130] sm:$0xff]  ;;  %v3062_v27 = vld [vmem:[#allocation5 + $0x138] sm:$0xff]  ;;  %v3066_v28 = vld [vmem:[#allocation5 + $0x100] sm:$0xff] }
  0x1c   :  { %209 = vmatpush.msra.mxu2 %v3036_v18  ;;  %229 = vmatpush.msra.mxu3 %v3038_v19  ;;  %v3068_v29 = vld [vmem:[#allocation5 + $0x108] sm:$0xff]  ;;  %v3072_v30 = vld [vmem:[#allocation5 + $0x110] sm:$0xff]  ;;  %v3074_v31 = vld [vmem:[#allocation5 + $0x118] sm:$0xff] }
  0x1d   :  { %170 = vmatpush.msra.mxu0 %v3042_v20  ;;  %190 = vmatpush.msra.mxu1 %v3044_v21  ;;  %v3078_v32 = vld [vmem:[#allocation5 + $0xe0] sm:$0xff]  ;;  %v3080_v33 = vld [vmem:[#allocation5 + $0xe8] sm:$0xff]  ;;  %v3084_v34 = vld [vmem:[#allocation5 + $0xf0] sm:$0xff] }
  0x1e   :  { %210 = vmatpush.msra.mxu2 %v3048_v22  ;;  %230 = vmatpush.msra.mxu3 %v3050_v23  ;;  %v3086_v35 = vld [vmem:[#allocation5 + $0xf8] sm:$0xff]  ;;  %v3090_v36 = vld [vmem:[#allocation5 + $0xc0] sm:$0xff]  ;;  %v3092_v37 = vld [vmem:[#allocation5 + $0xc8] sm:$0xff] }
  0x1f   :  { %171 = vmatpush.msra.mxu0 %v3054_v24  ;;  %191 = vmatpush.msra.mxu1 %v3056_v25  ;;  %v3096_v38 = vld [vmem:[#allocation5 + $0xd0] sm:$0xff]  ;;  %v3098_v39 = vld [vmem:[#allocation5 + $0xd8] sm:$0xff]  ;;  %v3102_v40 = vld [vmem:[#allocation5 + $0xa0] sm:$0xff] }
  0x20   :  { %211 = vmatpush.msra.mxu2 %v3060_v26  ;;  %231 = vmatpush.msra.mxu3 %v3062_v27  ;;  %v3104_v41 = vld [vmem:[#allocation5 + $0xa8] sm:$0xff]  ;;  %v3108_v42 = vld [vmem:[#allocation5 + $0xb0] sm:$0xff]  ;;  %v3110_v43 = vld [vmem:[#allocation5 + $0xb8] sm:$0xff] }
  0x21   :  { %172 = vmatpush.msra.mxu0 %v3066_v28  ;;  %192 = vmatpush.msra.mxu1 %v3068_v29  ;;  %v3114_v44 = vld [vmem:[#allocation5 + $0x80] sm:$0xff]  ;;  %v3116_v45 = vld [vmem:[#allocation5 + $0x88] sm:$0xff]  ;;  %v3120_v46 = vld [vmem:[#allocation5 + $0x90] sm:$0xff] }
  0x22   :  { %212 = vmatpush.msra.mxu2 %v3072_v30  ;;  %232 = vmatpush.msra.mxu3 %v3074_v31  ;;  %v3122_v47 = vld [vmem:[#allocation5 + $0x98] sm:$0xff]  ;;  %v3126_v48 = vld [vmem:[#allocation5 + $0x60] sm:$0xff]  ;;  %v3128_v49 = vld [vmem:[#allocation5 + $0x68] sm:$0xff] }
  0x23   :  { %173 = vmatpush.msra.mxu0 %v3078_v32  ;;  %193 = vmatpush.msra.mxu1 %v3080_v33  ;;  %v3132_v50 = vld [vmem:[#allocation5 + $0x70] sm:$0xff]  ;;  %v3134_v51 = vld [vmem:[#allocation5 + $0x78] sm:$0xff]  ;;  %v3138_v52 = vld [vmem:[#allocation5 + $0x40] sm:$0xff] }
  0x24   :  { %213 = vmatpush.msra.mxu2 %v3084_v34  ;;  %233 = vmatpush.msra.mxu3 %v3086_v35  ;;  %v3140_v53 = vld [vmem:[#allocation5 + $0x48] sm:$0xff]  ;;  %v3144_v54 = vld [vmem:[#allocation5 + $0x50] sm:$0xff]  ;;  %v3146_v55 = vld [vmem:[#allocation5 + $0x58] sm:$0xff] }
  0x25   :  { %174 = vmatpush.msra.mxu0 %v3090_v36  ;;  %194 = vmatpush.msra.mxu1 %v3092_v37  ;;  %v3150_v56 = vld [vmem:[#allocation5 + $0x20] sm:$0xff]  ;;  %v3152_v57 = vld [vmem:[#allocation5 + $0x28] sm:$0xff]  ;;  %v3156_v58 = vld [vmem:[#allocation5 + $0x30] sm:$0xff] }
  0x26   :  { %214 = vmatpush.msra.mxu2 %v3096_v38  ;;  %234 = vmatpush.msra.mxu3 %v3098_v39  ;;  %v3158_v59 = vld [vmem:[#allocation5 + $0x38] sm:$0xff]  ;;  %v3162_v60 = vld [vmem:[#allocation5] sm:$0xff]  ;;  %v3164_v61 = vld [vmem:[#allocation5 + $0x8] sm:$0xff] }
  0x27   :  { %175 = vmatpush.msra.mxu0 %v3102_v40  ;;  %195 = vmatpush.msra.mxu1 %v3104_v41  ;;  %v3168_v62 = vld [vmem:[#allocation5 + $0x10] sm:$0xff]  ;;  %v3170_v63 = vld [vmem:[#allocation5 + $0x18] sm:$0xff] }
  0x28   :  { %215 = vmatpush.msra.mxu2 %v3108_v42  ;;  %235 = vmatpush.msra.mxu3 %v3110_v43 }
  0x29   :  { %176 = vmatpush.msra.mxu0 %v3114_v44  ;;  %196 = vmatpush.msra.mxu1 %v3116_v45 }
  0x2a   :  { %216 = vmatpush.msra.mxu2 %v3120_v46  ;;  %236 = vmatpush.msra.mxu3 %v3122_v47 }
  0x2b   :  { %177 = vmatpush.msra.mxu0 %v3126_v48  ;;  %197 = vmatpush.msra.mxu1 %v3128_v49 }
  0x2c   :  { %217 = vmatpush.msra.mxu2 %v3132_v50  ;;  %237 = vmatpush.msra.mxu3 %v3134_v51 }
  0x2d   :  { %178 = vmatpush.msra.mxu0 %v3138_v52  ;;  %198 = vmatpush.msra.mxu1 %v3140_v53 }
  0x2e   :  { %218 = vmatpush.msra.mxu2 %v3144_v54  ;;  %238 = vmatpush.msra.mxu3 %v3146_v55 }
  0x2f   :  { %179 = vmatpush.msra.mxu0 %v3150_v56  ;;  %199 = vmatpush.msra.mxu1 %v3152_v57 }
  0x30   :  { %219 = vmatpush.msra.mxu2 %v3156_v58  ;;  %239 = vmatpush.msra.mxu3 %v3158_v59 }
  0x31   :  { %180 = vmatpush.msra.mxu0 %v3162_v60  ;;  %200 = vmatpush.msra.mxu1 %v3164_v61 }
  0x32   :  { %220 = vmatpush.msra.mxu2 %v3168_v62  ;;  %240 = vmatpush.msra.mxu3 %v3170_v63 }
  0x33   :  { %324 = vmatpush.msrb.mxu0 %v2986_v0  ;;  %344 = vmatpush.msrb.mxu1 %v2988_v1  ;;  %v90_v0 = vld [vmem:[%s4415_s0] sm:$0xff] }
  0x34   :  { %364 = vmatpush.msrb.mxu2 %v2990_v2  ;;  %384 = vmatpush.msrb.mxu3 %v2994_v3  ;;  %v249_v1 = vld [vmem:[%s4416_s1] sm:$0xff]  ;;  %v470_v3 = vld [vmem:[#allocation7 + $0x1e8] sm:$0xff] }
  0x35   :  { %325 = vmatpush.msrb.mxu0 %v2996_v4  ;;  %345 = vmatpush.msrb.mxu1 %v2998_v5  ;;  %v469_v2 = vld [vmem:[#allocation7 + $0x1e0] sm:$0xff]  ;;  %v471_v4 = vld [vmem:[#allocation7 + $0x1f0] sm:$0xff]  ;;  %v472_v5 = vld [vmem:[#allocation7 + $0x1f8] sm:$0xff] }
  0x36   :  { %365 = vmatpush.msrb.mxu2 %v3002_v6  ;;  %385 = vmatpush.msrb.mxu3 %v3004_v7  ;;  %v465_v6 = vld [vmem:[#allocation7 + $0x1c0] sm:$0xff]  ;;  %v466_v7 = vld [vmem:[#allocation7 + $0x1c8] sm:$0xff] }
  0x37   :  { %326 = vmatpush.msrb.mxu0 %v3006_v8  ;;  %346 = vmatpush.msrb.mxu1 %v3010_v9  ;;  %v467_v8 = vld [vmem:[#allocation7 + $0x1d0] sm:$0xff]  ;;  %v468_v9 = vld [vmem:[#allocation7 + $0x1d8] sm:$0xff] }
  0x38   :  { %366 = vmatpush.msrb.mxu2 %v3012_v10  ;;  %386 = vmatpush.msrb.mxu3 %v3014_v11  ;;  %v461_v10 = vld [vmem:[#allocation7 + $0x1a0] sm:$0xff]  ;;  %v462_v11 = vld [vmem:[#allocation7 + $0x1a8] sm:$0xff] }
  0x39   :  { %327 = vmatpush.msrb.mxu0 %v3018_v12  ;;  %347 = vmatpush.msrb.mxu1 %v3020_v13  ;;  %v463_v12 = vld [vmem:[#allocation7 + $0x1b0] sm:$0xff]  ;;  %v464_v13 = vld [vmem:[#allocation7 + $0x1b8] sm:$0xff] }
  0x3a   :  { %367 = vmatpush.msrb.mxu2 %v3024_v14  ;;  %387 = vmatpush.msrb.mxu3 %v3026_v15  ;;  %v457_v14 = vld [vmem:[#allocation7 + $0x180] sm:$0xff]  ;;  %v458_v15 = vld [vmem:[#allocation7 + $0x188] sm:$0xff] }
  0x3b   :  { %328 = vmatpush.msrb.mxu0 %v3030_v16  ;;  %348 = vmatpush.msrb.mxu1 %v3032_v17  ;;  %v459_v16 = vld [vmem:[#allocation7 + $0x190] sm:$0xff]  ;;  %v460_v17 = vld [vmem:[#allocation7 + $0x198] sm:$0xff] }
  0x3c   :  { %368 = vmatpush.msrb.mxu2 %v3036_v18  ;;  %388 = vmatpush.msrb.mxu3 %v3038_v19  ;;  %v453_v18 = vld [vmem:[#allocation7 + $0x160] sm:$0xff]  ;;  %v454_v19 = vld [vmem:[#allocation7 + $0x168] sm:$0xff] }
  0x3d   :  { %329 = vmatpush.msrb.mxu0 %v3042_v20  ;;  %349 = vmatpush.msrb.mxu1 %v3044_v21  ;;  %v455_v20 = vld [vmem:[#allocation7 + $0x170] sm:$0xff]  ;;  %v456_v21 = vld [vmem:[#allocation7 + $0x178] sm:$0xff] }
  0x3e   :  { %369 = vmatpush.msrb.mxu2 %v3048_v22  ;;  %389 = vmatpush.msrb.mxu3 %v3050_v23  ;;  %v449_v22 = vld [vmem:[#allocation7 + $0x140] sm:$0xff]  ;;  %v450_v23 = vld [vmem:[#allocation7 + $0x148] sm:$0xff] }
  0x3f   :  { %330 = vmatpush.msrb.mxu0 %v3054_v24  ;;  %350 = vmatpush.msrb.mxu1 %v3056_v25  ;;  %v451_v24 = vld [vmem:[#allocation7 + $0x150] sm:$0xff]  ;;  %v452_v25 = vld [vmem:[#allocation7 + $0x158] sm:$0xff] }
  0x40   :  { %370 = vmatpush.msrb.mxu2 %v3060_v26  ;;  %390 = vmatpush.msrb.mxu3 %v3062_v27  ;;  %v445_v26 = vld [vmem:[#allocation7 + $0x120] sm:$0xff]  ;;  %v446_v27 = vld [vmem:[#allocation7 + $0x128] sm:$0xff] }
  0x41   :  { %331 = vmatpush.msrb.mxu0 %v3066_v28  ;;  %351 = vmatpush.msrb.mxu1 %v3068_v29  ;;  %v447_v28 = vld [vmem:[#allocation7 + $0x130] sm:$0xff]  ;;  %v448_v29 = vld [vmem:[#allocation7 + $0x138] sm:$0xff] }
  0x42   :  { %371 = vmatpush.msrb.mxu2 %v3072_v30  ;;  %391 = vmatpush.msrb.mxu3 %v3074_v31  ;;  %v441_v30 = vld [vmem:[#allocation7 + $0x100] sm:$0xff]  ;;  %v442_v31 = vld [vmem:[#allocation7 + $0x108] sm:$0xff] }
  0x43   :  { %332 = vmatpush.msrb.mxu0 %v3078_v32  ;;  %352 = vmatpush.msrb.mxu1 %v3080_v33  ;;  %v443_v32 = vld [vmem:[#allocation7 + $0x110] sm:$0xff]  ;;  %v444_v33 = vld [vmem:[#allocation7 + $0x118] sm:$0xff] }
  0x44   :  { %372 = vmatpush.msrb.mxu2 %v3084_v34  ;;  %392 = vmatpush.msrb.mxu3 %v3086_v35  ;;  %v437_v34 = vld [vmem:[#allocation7 + $0xe0] sm:$0xff]  ;;  %v438_v35 = vld [vmem:[#allocation7 + $0xe8] sm:$0xff] }
  0x45   :  { %333 = vmatpush.msrb.mxu0 %v3090_v36  ;;  %353 = vmatpush.msrb.mxu1 %v3092_v37  ;;  %v439_v36 = vld [vmem:[#allocation7 + $0xf0] sm:$0xff]  ;;  %v440_v37 = vld [vmem:[#allocation7 + $0xf8] sm:$0xff] }
  0x46   :  { %373 = vmatpush.msrb.mxu2 %v3096_v38  ;;  %393 = vmatpush.msrb.mxu3 %v3098_v39  ;;  %v433_v38 = vld [vmem:[#allocation7 + $0xc0] sm:$0xff]  ;;  %v434_v39 = vld [vmem:[#allocation7 + $0xc8] sm:$0xff] }
  0x47   :  { %334 = vmatpush.msrb.mxu0 %v3102_v40  ;;  %354 = vmatpush.msrb.mxu1 %v3104_v41  ;;  %v435_v40 = vld [vmem:[#allocation7 + $0xd0] sm:$0xff]  ;;  %v436_v41 = vld [vmem:[#allocation7 + $0xd8] sm:$0xff] }
  0x48   :  { %374 = vmatpush.msrb.mxu2 %v3108_v42  ;;  %394 = vmatpush.msrb.mxu3 %v3110_v43  ;;  %v429_v42 = vld [vmem:[#allocation7 + $0xa0] sm:$0xff]  ;;  %v430_v43 = vld [vmem:[#allocation7 + $0xa8] sm:$0xff] }
  0x49   :  { %335 = vmatpush.msrb.mxu0 %v3114_v44  ;;  %355 = vmatpush.msrb.mxu1 %v3116_v45  ;;  %v431_v44 = vld [vmem:[#allocation7 + $0xb0] sm:$0xff]  ;;  %v432_v45 = vld [vmem:[#allocation7 + $0xb8] sm:$0xff] }
  0x4a   :  { %375 = vmatpush.msrb.mxu2 %v3120_v46  ;;  %395 = vmatpush.msrb.mxu3 %v3122_v47  ;;  %v425_v46 = vld [vmem:[#allocation7 + $0x80] sm:$0xff]  ;;  %v426_v47 = vld [vmem:[#allocation7 + $0x88] sm:$0xff] }
  0x4b   :  { %221 = vmatmul.f32.vlgmr.msra.gmra.mxu2 %v90_v0  ;;  %241 = vmatmul.f32.vlgmr.msra.gmra.mxu3 %v90_v0 }
  0x4c   :  { %336 = vmatpush.msrb.mxu0 %v3126_v48  ;;  %356 = vmatpush.msrb.mxu1 %v3128_v49  ;;  %v427_v48 = vld [vmem:[#allocation7 + $0x90] sm:$0xff]  ;;  %v428_v49 = vld [vmem:[#allocation7 + $0x98] sm:$0xff] }
  0x4d   :  { %376 = vmatpush.msrb.mxu2 %v3132_v50  ;;  %396 = vmatpush.msrb.mxu3 %v3134_v51  ;;  %v421_v50 = vld [vmem:[#allocation7 + $0x60] sm:$0xff]  ;;  %v422_v51 = vld [vmem:[#allocation7 + $0x68] sm:$0xff] }
  0x4e   :  { %337 = vmatpush.msrb.mxu0 %v3138_v52  ;;  %357 = vmatpush.msrb.mxu1 %v3140_v53  ;;  %v423_v52 = vld [vmem:[#allocation7 + $0x70] sm:$0xff]  ;;  %v424_v53 = vld [vmem:[#allocation7 + $0x78] sm:$0xff] }
  0x4f   :  { %377 = vmatpush.msrb.mxu2 %v3144_v54  ;;  %397 = vmatpush.msrb.mxu3 %v3146_v55  ;;  %v417_v54 = vld [vmem:[#allocation7 + $0x40] sm:$0xff]  ;;  %v418_v55 = vld [vmem:[#allocation7 + $0x48] sm:$0xff] }
  0x50   :  { %338 = vmatpush.msrb.mxu0 %v3150_v56  ;;  %358 = vmatpush.msrb.mxu1 %v3152_v57  ;;  %v419_v56 = vld [vmem:[#allocation7 + $0x50] sm:$0xff]  ;;  %v420_v57 = vld [vmem:[#allocation7 + $0x58] sm:$0xff] }
  0x51   :  { %378 = vmatpush.msrb.mxu2 %v3156_v58  ;;  %398 = vmatpush.msrb.mxu3 %v3158_v59  ;;  %v413_v58 = vld [vmem:[#allocation7 + $0x20] sm:$0xff]  ;;  %v414_v59 = vld [vmem:[#allocation7 + $0x28] sm:$0xff] }
  0x52   :  { %181 = vmatmul.f32.vlgmr.msra.gmra.mxu0 %v90_v0  ;;  %201 = vmatmul.f32.vlgmr.msra.gmra.mxu1 %v90_v0  ;;  %v411_v0 = vld [vmem:[#allocation7 + $0x10] sm:$0xff] }
  0x53   :  { %339 = vmatpush.msrb.mxu0 %v3162_v60  ;;  %359 = vmatpush.msrb.mxu1 %v3164_v61  ;;  %v415_v60 = vld [vmem:[#allocation7 + $0x30] sm:$0xff]  ;;  %v416_v61 = vld [vmem:[#allocation7 + $0x38] sm:$0xff] }
  0x54   :  { %379 = vmatpush.msrb.mxu2 %v3168_v62  ;;  %399 = vmatpush.msrb.mxu3 %v3170_v63  ;;  %v409_v62 = vld [vmem:[#allocation7] sm:$0xff]  ;;  %v410_v63 = vld [vmem:[#allocation7 + $0x8] sm:$0xff] }
  0x55   :  { %380 = vmatmul.f32.vlgmr.msrb.gmra.mxu2 %v249_v1  ;;  %400 = vmatmul.f32.vlgmr.msrb.gmra.mxu3 %v249_v1 }
  0x56   :  { %483 = vmatpush.msra.mxu0 %v469_v2  ;;  %503 = vmatpush.msra.mxu1 %v470_v3  ;;  %v408_v2 = vld [vmem:[%s4417_s2] sm:$0xff] }
  0x57   :  { %523 = vmatpush.msra.mxu2 %v471_v4  ;;  %543 = vmatpush.msra.mxu3 %v472_v5  ;;  %v3251_v3 = vld [vmem:[#allocation9 + $0x1e0] sm:$0xff]  ;;  %v3253_v4 = vld [vmem:[#allocation9 + $0x1e8] sm:$0xff]  ;;  %v3255_v5 = vld [vmem:[#allocation9 + $0x1f0] sm:$0xff] }
  0x58   :  { %484 = vmatpush.msra.mxu0 %v465_v6  ;;  %504 = vmatpush.msra.mxu1 %v466_v7  ;;  %v3257_v6 = vld [vmem:[#allocation9 + $0x1f8] sm:$0xff]  ;;  %v3259_v7 = vld [vmem:[#allocation9 + $0x1c0] sm:$0xff] }
  0x59   :  { %524 = vmatpush.msra.mxu2 %v467_v8  ;;  %544 = vmatpush.msra.mxu3 %v468_v9  ;;  %v3261_v8 = vld [vmem:[#allocation9 + $0x1c8] sm:$0xff]  ;;  %v3265_v9 = vld [vmem:[#allocation9 + $0x1d0] sm:$0xff] }
  0x5a   :  { %485 = vmatpush.msra.mxu0 %v461_v10  ;;  %505 = vmatpush.msra.mxu1 %v462_v11  ;;  %v3267_v10 = vld [vmem:[#allocation9 + $0x1d8] sm:$0xff]  ;;  %v3271_v11 = vld [vmem:[#allocation9 + $0x1a0] sm:$0xff] }
  0x5b   :  { %525 = vmatpush.msra.mxu2 %v463_v12  ;;  %545 = vmatpush.msra.mxu3 %v464_v13  ;;  %v3273_v12 = vld [vmem:[#allocation9 + $0x1a8] sm:$0xff]  ;;  %v3277_v13 = vld [vmem:[#allocation9 + $0x1b0] sm:$0xff] }
  0x5c   :  { %340 = vmatmul.f32.vlgmr.msrb.gmra.mxu0 %v249_v1  ;;  %360 = vmatmul.f32.vlgmr.msrb.gmra.mxu1 %v249_v1  ;;  %v412_v1 = vld [vmem:[#allocation7 + $0x18] sm:$0xff] }
  0x5d   :  { %486 = vmatpush.msra.mxu0 %v457_v14  ;;  %506 = vmatpush.msra.mxu1 %v458_v15  ;;  %v3279_v14 = vld [vmem:[#allocation9 + $0x1b8] sm:$0xff]  ;;  %v3285_v15 = vld [vmem:[#allocation9 + $0x180] sm:$0xff] }
  0x5e   :  { %526 = vmatpush.msra.mxu2 %v459_v16  ;;  %546 = vmatpush.msra.mxu3 %v460_v17  ;;  %v3287_v16 = vld [vmem:[#allocation9 + $0x188] sm:$0xff]  ;;  %v3291_v17 = vld [vmem:[#allocation9 + $0x190] sm:$0xff] }
  0x5f   :  { %487 = vmatpush.msra.mxu0 %v453_v18  ;;  %507 = vmatpush.msra.mxu1 %v454_v19  ;;  %v3293_v18 = vld [vmem:[#allocation9 + $0x198] sm:$0xff]  ;;  %v3295_v19 = vld [vmem:[#allocation9 + $0x160] sm:$0xff] }
  0x60   :  { %527 = vmatpush.msra.mxu2 %v455_v20  ;;  %547 = vmatpush.msra.mxu3 %v456_v21  ;;  %v3297_v20 = vld [vmem:[#allocation9 + $0x168] sm:$0xff]  ;;  %v3301_v21 = vld [vmem:[#allocation9 + $0x170] sm:$0xff] }
  0x61   :  { %488 = vmatpush.msra.mxu0 %v449_v22  ;;  %508 = vmatpush.msra.mxu1 %v450_v23  ;;  %v3303_v22 = vld [vmem:[#allocation9 + $0x178] sm:$0xff]  ;;  %v3307_v23 = vld [vmem:[#allocation9 + $0x140] sm:$0xff] }
  0x62   :  { %528 = vmatpush.msra.mxu2 %v451_v24  ;;  %548 = vmatpush.msra.mxu3 %v452_v25  ;;  %v3309_v24 = vld [vmem:[#allocation9 + $0x148] sm:$0xff]  ;;  %v3313_v25 = vld [vmem:[#allocation9 + $0x150] sm:$0xff] }
  0x63   :  { %489 = vmatpush.msra.mxu0 %v445_v26  ;;  %509 = vmatpush.msra.mxu1 %v446_v27  ;;  %v3315_v26 = vld [vmem:[#allocation9 + $0x158] sm:$0xff]  ;;  %v3319_v27 = vld [vmem:[#allocation9 + $0x120] sm:$0xff] }
  0x64   :  { %529 = vmatpush.msra.mxu2 %v447_v28  ;;  %549 = vmatpush.msra.mxu3 %v448_v29  ;;  %v3321_v28 = vld [vmem:[#allocation9 + $0x128] sm:$0xff]  ;;  %v3325_v29 = vld [vmem:[#allocation9 + $0x130] sm:$0xff] }
  0x65   :  { %490 = vmatpush.msra.mxu0 %v441_v30  ;;  %510 = vmatpush.msra.mxu1 %v442_v31  ;;  %v3327_v30 = vld [vmem:[#allocation9 + $0x138] sm:$0xff]  ;;  %v3331_v31 = vld [vmem:[#allocation9 + $0x100] sm:$0xff] }
  0x66   :  { %530 = vmatpush.msra.mxu2 %v443_v32  ;;  %550 = vmatpush.msra.mxu3 %v444_v33  ;;  %v3333_v32 = vld [vmem:[#allocation9 + $0x108] sm:$0xff]  ;;  %v3337_v33 = vld [vmem:[#allocation9 + $0x110] sm:$0xff] }
  0x67   :  { %491 = vmatpush.msra.mxu0 %v437_v34  ;;  %511 = vmatpush.msra.mxu1 %v438_v35  ;;  %v3339_v34 = vld [vmem:[#allocation9 + $0x118] sm:$0xff]  ;;  %v3343_v35 = vld [vmem:[#allocation9 + $0xe0] sm:$0xff] }
  0x68   :  { %531 = vmatpush.msra.mxu2 %v439_v36  ;;  %551 = vmatpush.msra.mxu3 %v440_v37  ;;  %v3345_v36 = vld [vmem:[#allocation9 + $0xe8] sm:$0xff]  ;;  %v3349_v37 = vld [vmem:[#allocation9 + $0xf0] sm:$0xff] }
  0x69   :  { %492 = vmatpush.msra.mxu0 %v433_v38  ;;  %512 = vmatpush.msra.mxu1 %v434_v39  ;;  %v3351_v38 = vld [vmem:[#allocation9 + $0xf8] sm:$0xff]  ;;  %v3355_v39 = vld [vmem:[#allocation9 + $0xc0] sm:$0xff] }
  0x6a   :  { %532 = vmatpush.msra.mxu2 %v435_v40  ;;  %552 = vmatpush.msra.mxu3 %v436_v41  ;;  %v3357_v40 = vld [vmem:[#allocation9 + $0xc8] sm:$0xff]  ;;  %v3361_v41 = vld [vmem:[#allocation9 + $0xd0] sm:$0xff] }
  0x6b   :  { %493 = vmatpush.msra.mxu0 %v429_v42  ;;  %513 = vmatpush.msra.mxu1 %v430_v43  ;;  %v3363_v42 = vld [vmem:[#allocation9 + $0xd8] sm:$0xff]  ;;  %v3367_v43 = vld [vmem:[#allocation9 + $0xa0] sm:$0xff] }
  0x6c   :  { %533 = vmatpush.msra.mxu2 %v431_v44  ;;  %553 = vmatpush.msra.mxu3 %v432_v45  ;;  %v3369_v44 = vld [vmem:[#allocation9 + $0xa8] sm:$0xff]  ;;  %v3373_v45 = vld [vmem:[#allocation9 + $0xb0] sm:$0xff] }
  0x6d   :  { %494 = vmatpush.msra.mxu0 %v425_v46  ;;  %514 = vmatpush.msra.mxu1 %v426_v47  ;;  %v3375_v46 = vld [vmem:[#allocation9 + $0xb8] sm:$0xff]  ;;  %v3379_v47 = vld [vmem:[#allocation9 + $0x80] sm:$0xff] }
  0x6e   :  { %534 = vmatpush.msra.mxu2 %v427_v48  ;;  %554 = vmatpush.msra.mxu3 %v428_v49  ;;  %v3381_v48 = vld [vmem:[#allocation9 + $0x88] sm:$0xff]  ;;  %v3385_v49 = vld [vmem:[#allocation9 + $0x90] sm:$0xff] }
  0x6f   :  { %495 = vmatpush.msra.mxu0 %v421_v50  ;;  %515 = vmatpush.msra.mxu1 %v422_v51  ;;  %v3387_v50 = vld [vmem:[#allocation9 + $0x98] sm:$0xff]  ;;  %v3391_v51 = vld [vmem:[#allocation9 + $0x60] sm:$0xff] }
  0x70   :  { %535 = vmatpush.msra.mxu2 %v423_v52  ;;  %555 = vmatpush.msra.mxu3 %v424_v53  ;;  %v3393_v52 = vld [vmem:[#allocation9 + $0x68] sm:$0xff]  ;;  %v3397_v53 = vld [vmem:[#allocation9 + $0x70] sm:$0xff] }
  0x71   :  { %496 = vmatpush.msra.mxu0 %v417_v54  ;;  %516 = vmatpush.msra.mxu1 %v418_v55  ;;  %v3399_v54 = vld [vmem:[#allocation9 + $0x78] sm:$0xff]  ;;  %v3403_v55 = vld [vmem:[#allocation9 + $0x40] sm:$0xff] }
  0x72   :  { %536 = vmatpush.msra.mxu2 %v419_v56  ;;  %556 = vmatpush.msra.mxu3 %v420_v57  ;;  %v3405_v56 = vld [vmem:[#allocation9 + $0x48] sm:$0xff]  ;;  %v3409_v57 = vld [vmem:[#allocation9 + $0x50] sm:$0xff] }
  0x73   :  { %497 = vmatpush.msra.mxu0 %v413_v58  ;;  %517 = vmatpush.msra.mxu1 %v414_v59  ;;  %v3411_v58 = vld [vmem:[#allocation9 + $0x58] sm:$0xff]  ;;  %v3415_v59 = vld [vmem:[#allocation9 + $0x20] sm:$0xff] }
  0x74   :  { %537 = vmatpush.msra.mxu2 %v415_v60  ;;  %557 = vmatpush.msra.mxu3 %v416_v61  ;;  %4479 = vst [vmem:[#allocation15_spill] sm:$0xff] %v3411_v58  ;;  %v3417_v60 = vld [vmem:[#allocation9 + $0x28] sm:$0xff]  ;;  %v3421_v61 = vld [vmem:[#allocation9 + $0x30] sm:$0xff] }
  0x75   :  { %498 = vmatpush.msra.mxu0 %v409_v62  ;;  %518 = vmatpush.msra.mxu1 %v410_v63  ;;  %v3423_v62 = vld [vmem:[#allocation9 + $0x38] sm:$0xff]  ;;  %v3427_v63 = vld [vmem:[#allocation9] sm:$0xff] }
  0x76   :  { %538 = vmatpush.msra.mxu2 %v411_v0  ;;  %558 = vmatpush.msra.mxu3 %v412_v1  ;;  %v3429_v0 = vld [vmem:[#allocation9 + $0x8] sm:$0xff]  ;;  %v3433_v1 = vld [vmem:[#allocation9 + $0x10] sm:$0xff] }
  0x77   :  { %539 = vmatmul.f32.vlgmr.msra.gmra.mxu2 %v408_v2  ;;  %559 = vmatmul.f32.vlgmr.msra.gmra.mxu3 %v408_v2 }
  0x78   :  { %677 = vmatpush.msrb.mxu0 %v3251_v3  ;;  %697 = vmatpush.msrb.mxu1 %v3253_v4 }
  0x79   :  { %717 = vmatpush.msrb.mxu2 %v3255_v5  ;;  %737 = vmatpush.msrb.mxu3 %v3257_v6 }
  0x7a   :  { %678 = vmatpush.msrb.mxu0 %v3259_v7  ;;  %698 = vmatpush.msrb.mxu1 %v3261_v8 }
  0x7b   :  { %718 = vmatpush.msrb.mxu2 %v3265_v9  ;;  %738 = vmatpush.msrb.mxu3 %v3267_v10 }
  0x7c   :  { %679 = vmatpush.msrb.mxu0 %v3271_v11  ;;  %699 = vmatpush.msrb.mxu1 %v3273_v12 }
  0x7d   :  { %719 = vmatpush.msrb.mxu2 %v3277_v13  ;;  %739 = vmatpush.msrb.mxu3 %v3279_v14 }
  0x7e   :  { %499 = vmatmul.f32.vlgmr.msra.gmra.mxu0 %v408_v2  ;;  %519 = vmatmul.f32.vlgmr.msra.gmra.mxu1 %v408_v2  ;;  %v3435_v2 = vld [vmem:[#allocation9 + $0x18] sm:$0xff] }
  0x7f   :  { %680 = vmatpush.msrb.mxu0 %v3285_v15  ;;  %700 = vmatpush.msrb.mxu1 %v3287_v16 }
  0x80   :  { %720 = vmatpush.msrb.mxu2 %v3291_v17  ;;  %740 = vmatpush.msrb.mxu3 %v3293_v18 }
  0x81   :  { %681 = vmatpush.msrb.mxu0 %v3295_v19  ;;  %701 = vmatpush.msrb.mxu1 %v3297_v20 }
  0x82   :  { %721 = vmatpush.msrb.mxu2 %v3301_v21  ;;  %741 = vmatpush.msrb.mxu3 %v3303_v22 }
  0x83   :  { %682 = vmatpush.msrb.mxu0 %v3307_v23  ;;  %702 = vmatpush.msrb.mxu1 %v3309_v24 }
  0x84   :  { %722 = vmatpush.msrb.mxu2 %v3313_v25  ;;  %742 = vmatpush.msrb.mxu3 %v3315_v26 }
  0x85   :  { %683 = vmatpush.msrb.mxu0 %v3319_v27  ;;  %703 = vmatpush.msrb.mxu1 %v3321_v28 }
  0x86   :  { %723 = vmatpush.msrb.mxu2 %v3325_v29  ;;  %743 = vmatpush.msrb.mxu3 %v3327_v30 }
  0x87   :  { %684 = vmatpush.msrb.mxu0 %v3331_v31  ;;  %704 = vmatpush.msrb.mxu1 %v3333_v32 }
  0x88   :  { %724 = vmatpush.msrb.mxu2 %v3337_v33  ;;  %744 = vmatpush.msrb.mxu3 %v3339_v34 }
  0x89   :  { %685 = vmatpush.msrb.mxu0 %v3343_v35  ;;  %705 = vmatpush.msrb.mxu1 %v3345_v36 }
  0x8a   :  { %725 = vmatpush.msrb.mxu2 %v3349_v37  ;;  %745 = vmatpush.msrb.mxu3 %v3351_v38 }
  0x8b   :  { %686 = vmatpush.msrb.mxu0 %v3355_v39  ;;  %706 = vmatpush.msrb.mxu1 %v3357_v40 }
  0x8c   :  { %726 = vmatpush.msrb.mxu2 %v3361_v41  ;;  %746 = vmatpush.msrb.mxu3 %v3363_v42 }
  0x8d   :  { %687 = vmatpush.msrb.mxu0 %v3367_v43  ;;  %707 = vmatpush.msrb.mxu1 %v3369_v44 }
  0x8e   :  { %727 = vmatpush.msrb.mxu2 %v3373_v45  ;;  %747 = vmatpush.msrb.mxu3 %v3375_v46 }
  0x8f   :  { %688 = vmatpush.msrb.mxu0 %v3379_v47  ;;  %708 = vmatpush.msrb.mxu1 %v3381_v48 }
  0x90   :  { %728 = vmatpush.msrb.mxu2 %v3385_v49  ;;  %748 = vmatpush.msrb.mxu3 %v3387_v50 }
  0x91   :  { %689 = vmatpush.msrb.mxu0 %v3391_v51  ;;  %709 = vmatpush.msrb.mxu1 %v3393_v52 }
  0x92   :  { %729 = vmatpush.msrb.mxu2 %v3397_v53  ;;  %749 = vmatpush.msrb.mxu3 %v3399_v54 }
  0x93   :  { %690 = vmatpush.msrb.mxu0 %v3403_v55  ;;  %710 = vmatpush.msrb.mxu1 %v3405_v56 }
  0x94   :  { %730 = vmatpush.msrb.mxu2 %v3409_v57  ;;  %750 = vmatpush.msrb.mxu3 %v3411_v58  ;;  %v2927_v58 = vmov 0.0  }
  0x95   :  { %691 = vmatpush.msrb.mxu0 %v3415_v59  ;;  %711 = vmatpush.msrb.mxu1 %v3417_v60 }
  0x96   :  { %731 = vmatpush.msrb.mxu2 %v3421_v61  ;;  %751 = vmatpush.msrb.mxu3 %v3423_v62 }
  0x97   :  { %692 = vmatpush.msrb.mxu0 %v3427_v63  ;;  %712 = vmatpush.msrb.mxu1 %v3429_v0 }
  0x98   :  { %732 = vmatpush.msrb.mxu2 %v3433_v1  ;;  %752 = vmatpush.msrb.mxu3 %v3435_v2 }
  0x99   :  { %693 = vmatmul.f32.vlgmr.msrb.gmra.mxu0 %v2927_v58  ;;  %713 = vmatmul.f32.vlgmr.msrb.gmra.mxu1 %v2927_v58 }
  0x9a   :  { %733 = vmatmul.f32.vlgmr.msrb.gmra.mxu2 %v2927_v58  ;;  %753 = vmatmul.f32.vlgmr.msrb.gmra.mxu3 %v2927_v58  ;;  %v4480_v58 = vld [vmem:[#allocation15_spill] sm:$0xff] }
  0x9b   :  { %937 = vmatpush.msra.mxu0 %v3251_v3  ;;  %957 = vmatpush.msra.mxu1 %v3253_v4 }
  0x9c   :  { %977 = vmatpush.msra.mxu2 %v3255_v5  ;;  %997 = vmatpush.msra.mxu3 %v3257_v6 }
  0x9d   :  { %938 = vmatpush.msra.mxu0 %v3259_v7  ;;  %958 = vmatpush.msra.mxu1 %v3261_v8 }
  0x9e   :  { %978 = vmatpush.msra.mxu2 %v3265_v9  ;;  %998 = vmatpush.msra.mxu3 %v3267_v10 }
  0x9f   :  { %939 = vmatpush.msra.mxu0 %v3271_v11  ;;  %959 = vmatpush.msra.mxu1 %v3273_v12 }
  0xa0   :  { %979 = vmatpush.msra.mxu2 %v3277_v13  ;;  %999 = vmatpush.msra.mxu3 %v3279_v14 }
  0xa1   :  { %940 = vmatpush.msra.mxu0 %v3285_v15  ;;  %960 = vmatpush.msra.mxu1 %v3287_v16 }
  0xa2   :  { %980 = vmatpush.msra.mxu2 %v3291_v17  ;;  %1000 = vmatpush.msra.mxu3 %v3293_v18 }
  0xa3   :  { %941 = vmatpush.msra.mxu0 %v3295_v19  ;;  %961 = vmatpush.msra.mxu1 %v3297_v20 }
  0xa4   :  { %981 = vmatpush.msra.mxu2 %v3301_v21  ;;  %1001 = vmatpush.msra.mxu3 %v3303_v22 }
  0xa5   :  { %942 = vmatpush.msra.mxu0 %v3307_v23  ;;  %962 = vmatpush.msra.mxu1 %v3309_v24 }
  0xa6   :  { %982 = vmatpush.msra.mxu2 %v3313_v25  ;;  %1002 = vmatpush.msra.mxu3 %v3315_v26 }
  0xa7   :  { %943 = vmatpush.msra.mxu0 %v3319_v27  ;;  %963 = vmatpush.msra.mxu1 %v3321_v28 }
  0xa8   :  { %983 = vmatpush.msra.mxu2 %v3325_v29  ;;  %1003 = vmatpush.msra.mxu3 %v3327_v30 }
  0xa9   :  { %944 = vmatpush.msra.mxu0 %v3331_v31  ;;  %964 = vmatpush.msra.mxu1 %v3333_v32 }
  0xaa   :  { %984 = vmatpush.msra.mxu2 %v3337_v33  ;;  %1004 = vmatpush.msra.mxu3 %v3339_v34 }
  0xab   :  { %945 = vmatpush.msra.mxu0 %v3343_v35  ;;  %965 = vmatpush.msra.mxu1 %v3345_v36 }
  0xac   :  { %985 = vmatpush.msra.mxu2 %v3349_v37  ;;  %1005 = vmatpush.msra.mxu3 %v3351_v38 }
  0xad   :  { %946 = vmatpush.msra.mxu0 %v3355_v39  ;;  %966 = vmatpush.msra.mxu1 %v3357_v40 }
  0xae   :  { %986 = vmatpush.msra.mxu2 %v3361_v41  ;;  %1006 = vmatpush.msra.mxu3 %v3363_v42 }
  0xaf   :  { %947 = vmatpush.msra.mxu0 %v3367_v43  ;;  %967 = vmatpush.msra.mxu1 %v3369_v44 }
  0xb0   :  { %987 = vmatpush.msra.mxu2 %v3373_v45  ;;  %1007 = vmatpush.msra.mxu3 %v3375_v46 }
  0xb1   :  { %948 = vmatpush.msra.mxu0 %v3379_v47  ;;  %968 = vmatpush.msra.mxu1 %v3381_v48 }
  0xb2   :  { %988 = vmatpush.msra.mxu2 %v3385_v49  ;;  %1008 = vmatpush.msra.mxu3 %v3387_v50 }
  0xb3   :  { %949 = vmatpush.msra.mxu0 %v3391_v51  ;;  %969 = vmatpush.msra.mxu1 %v3393_v52 }
  0xb4   :  { %989 = vmatpush.msra.mxu2 %v3397_v53  ;;  %1009 = vmatpush.msra.mxu3 %v3399_v54 }
  0xb5   :  { %950 = vmatpush.msra.mxu0 %v3403_v55  ;;  %970 = vmatpush.msra.mxu1 %v3405_v56 }
  0xb6   :  { %990 = vmatpush.msra.mxu2 %v3409_v57  ;;  %1010 = vmatpush.msra.mxu3 %v4480_v58 }
  0xb7   :  { %951 = vmatpush.msra.mxu0 %v3415_v59  ;;  %971 = vmatpush.msra.mxu1 %v3417_v60 }
  0xb8   :  { %991 = vmatpush.msra.mxu2 %v3421_v61  ;;  %1011 = vmatpush.msra.mxu3 %v3423_v62 }
  0xb9   :  { %952 = vmatpush.msra.mxu0 %v3427_v63  ;;  %972 = vmatpush.msra.mxu1 %v3429_v0 }
  0xba   :  { %992 = vmatpush.msra.mxu2 %v3433_v1  ;;  %1012 = vmatpush.msra.mxu3 %v3435_v2 }
  0xbb   :  { %1197 = vmatpush.msrb.mxu0 %v3251_v3  ;;  %1217 = vmatpush.msrb.mxu1 %v3253_v4  ;;  %v155_v3 = vld [vmem:[%s4421_s6] sm:$0xf] }
  0xbc   :  { %1237 = vmatpush.msrb.mxu2 %v3255_v5  ;;  %1257 = vmatpush.msrb.mxu3 %v3257_v6  ;;  %v159_v4 = vperm.slane %v155_v3, 2  ;;  %v157_v5 = vperm.slane %v155_v3, 0  ;;  %v158_v6 = vperm.slane %v155_v3, 1 }
  0xbd   :  { %1198 = vmatpush.msrb.mxu0 %v3259_v7  ;;  %1218 = vmatpush.msrb.mxu1 %v3261_v8  ;;  %v160_v7 = vperm.slane %v155_v3, 3 }
  0xbe   :  { %1238 = vmatpush.msrb.mxu2 %v3265_v9  ;;  %1258 = vmatpush.msrb.mxu3 %v3267_v10 }
  0xbf   :  { %1199 = vmatpush.msrb.mxu0 %v3271_v11  ;;  %1219 = vmatpush.msrb.mxu1 %v3273_v12 }
  0xc0   :  { %1239 = vmatpush.msrb.mxu2 %v3277_v13  ;;  %1259 = vmatpush.msrb.mxu3 %v3279_v14 }
  0xc1   :  { %1200 = vmatpush.msrb.mxu0 %v3285_v15  ;;  %1220 = vmatpush.msrb.mxu1 %v3287_v16  ;;  %v314_v16 = vld [vmem:[%s4421_s6] sm:$0xf]  ;;  %s2928_s6 = smov 64  }
  0xc2   :  { %1240 = vmatpush.msrb.mxu2 %v3291_v17  ;;  %1260 = vmatpush.msrb.mxu3 %v3293_v18  ;;  %v318_v17 = vperm.slane %v314_v16, 2  ;;  %v316_v18 = vperm.slane %v314_v16, 0 }
  0xc3   :  { %1201 = vmatpush.msrb.mxu0 %v3295_v19  ;;  %1221 = vmatpush.msrb.mxu1 %v3297_v20  ;;  %v317_v19 = vperm.slane %v314_v16, 1  ;;  %v319_v20 = vperm.slane %v314_v16, 3 }
  0xc4   :  { %1241 = vmatpush.msrb.mxu2 %v3301_v21  ;;  %1261 = vmatpush.msrb.mxu3 %v3303_v22 }
  0xc5   :  { %1202 = vmatpush.msrb.mxu0 %v3307_v23  ;;  %1222 = vmatpush.msrb.mxu1 %v3309_v24 }
  0xc6   :  { %1242 = vmatpush.msrb.mxu2 %v3313_v25  ;;  %1262 = vmatpush.msrb.mxu3 %v3315_v26 }
  0xc7   :  { %1203 = vmatpush.msrb.mxu0 %v3319_v27  ;;  %1223 = vmatpush.msrb.mxu1 %v3321_v28 }
  0xc8   :  { %1243 = vmatpush.msrb.mxu2 %v3325_v29  ;;  %1263 = vmatpush.msrb.mxu3 %v3327_v30  ;;  %v473_v29 = vld [vmem:[#allocation10] sm:$0xf] }
  0xc9   :  { %1204 = vmatpush.msrb.mxu0 %v3331_v31  ;;  %1224 = vmatpush.msrb.mxu1 %v3333_v32  ;;  %v477_v30 = vperm.slane %v473_v29, 2  ;;  %v475_v31 = vperm.slane %v473_v29, 0  ;;  %v476_v32 = vperm.slane %v473_v29, 1 }
  0xca   :  { %1244 = vmatpush.msrb.mxu2 %v3337_v33  ;;  %1264 = vmatpush.msrb.mxu3 %v3339_v34  ;;  %v478_v33 = vperm.slane %v473_v29, 3 }
  0xcb   :  { %1205 = vmatpush.msrb.mxu0 %v3343_v35  ;;  %1225 = vmatpush.msrb.mxu1 %v3345_v36 }
  0xcc   :  { %1245 = vmatpush.msrb.mxu2 %v3349_v37  ;;  %1265 = vmatpush.msrb.mxu3 %v3351_v38 }
  0xcd   :  { %1206 = vmatpush.msrb.mxu0 %v3355_v39  ;;  %1226 = vmatpush.msrb.mxu1 %v3357_v40 }
  0xce   :  { %v222_v8 = vpop.f32.mrf.mxu2  ;;  %v242_v9 = vpop.f32.mrf.mxu3  ;;  %1246 = vmatpush.msrb.mxu2 %v3361_v41  ;;  %1266 = vmatpush.msrb.mxu3 %v3363_v42  ;;  %v567_v42 = vlaneseq }
  0xcf   :  { %v182_v10 = vpop.f32.mrf.mxu0  ;;  %v202_v11 = vpop.f32.mrf.mxu1  ;;  %v223_v12 = vadd.f32 %v222_v8, %v159_v4  ;;  %1207 = vmatpush.msrb.mxu0 %v3367_v43  ;;  %1227 = vmatpush.msrb.mxu1 %v3369_v44  ;;  %v243_v15 = vadd.f32 %v242_v9, %v160_v7 }
  0xd0   :  { %v183_v13 = vadd.f32 %v182_v10, %v157_v5  ;;  %v203_v14 = vadd.f32 %v202_v11, %v158_v6  ;;  %1247 = vmatpush.msrb.mxu2 %v3373_v45  ;;  %1267 = vmatpush.msrb.mxu3 %v3375_v46  ;;  %v3578_v43 = vshrl.u32 %v567_v42, 7 }
  0xd1   :  { %247 = vst [vmem:[#allocation2 + $0x10] sm:$0xff] %v223_v12  ;;  %1208 = vmatpush.msrb.mxu0 %v3379_v47  ;;  %1228 = vmatpush.msrb.mxu1 %v3381_v48 }
  0xd2   :  { %245 = vst [vmem:[#allocation2] sm:$0xff] %v183_v13  ;;  %1248 = vmatpush.msrb.mxu2 %v3385_v49  ;;  %1268 = vmatpush.msrb.mxu3 %v3387_v50  ;;  %vm569_vm0 = vcmp.eq.s32.totalorder %v3578_v43, 0 }
  0xd3   :  { %246 = vst [vmem:[#allocation2 + $0x8] sm:$0xff] %v203_v14  ;;  %1209 = vmatpush.msrb.mxu0 %v3391_v51  ;;  %1229 = vmatpush.msrb.mxu1 %v3393_v52 }
  0xd4   :  { %248 = vst [vmem:[#allocation2 + $0x18] sm:$0xff] %v243_v15  ;;  %1249 = vmatpush.msrb.mxu2 %v3397_v53  ;;  %1269 = vmatpush.msrb.mxu3 %v3399_v54 }
  0xd5   :  { %1210 = vmatpush.msrb.mxu0 %v3403_v55  ;;  %1230 = vmatpush.msrb.mxu1 %v3405_v56  ;;  %4481 = vst [vmem:[#allocation15_spill] sm:$0xff] %v3578_v43 }
  0xd6   :  { %1250 = vmatpush.msrb.mxu2 %v3409_v57  ;;  %1270 = vmatpush.msrb.mxu3 %v4480_v58 }
  0xd7   :  { %1211 = vmatpush.msrb.mxu0 %v3415_v59  ;;  %1231 = vmatpush.msrb.mxu1 %v3417_v60 }
  0xd8   :  { %v381_v21 = vpop.f32.mrf.mxu2  ;;  %v401_v22 = vpop.f32.mrf.mxu3  ;;  %1251 = vmatpush.msrb.mxu2 %v3421_v61  ;;  %1271 = vmatpush.msrb.mxu3 %v3423_v62 }
  0xd9   :  { %v341_v23 = vpop.f32.mrf.mxu0  ;;  %v361_v24 = vpop.f32.mrf.mxu1  ;;  %v382_v25 = vadd.f32 %v381_v21, %v318_v17  ;;  %1212 = vmatpush.msrb.mxu0 %v3427_v63  ;;  %1232 = vmatpush.msrb.mxu1 %v3429_v0  ;;  %v402_v28 = vadd.f32 %v401_v22, %v319_v20 }
  0xda   :  { %v342_v26 = vadd.f32 %v341_v23, %v316_v18  ;;  %v362_v27 = vadd.f32 %v361_v24, %v317_v19  ;;  %1252 = vmatpush.msrb.mxu2 %v3433_v1  ;;  %1272 = vmatpush.msrb.mxu3 %v3435_v2 }
  0xdb   :  { %406 = vst [vmem:[#allocation3 + $0x10] sm:$0xff] %v382_v25  ;;  %v573_v46 = vld [vmem:[#allocation2] ss:$8 sm:$0xf] }
  0xdc   :  { %404 = vst [vmem:[#allocation3] sm:$0xff] %v342_v26  ;;  %v579_v51 = vperm.slane %v573_v46, 0  ;;  %v580_v52 = vperm.slane %v573_v46, 1  ;;  %v582_v2 = vperm.slane %v573_v46, 3  ;;  %v581_v13 = vperm.slane %v573_v46, 2 }
  0xdd   :  { %405 = vst [vmem:[#allocation3 + $0x8] sm:$0xff] %v362_v27 }
  0xde   :  { %407 = vst [vmem:[#allocation3 + $0x18] sm:$0xff] %v402_v28 }
  0xe5   :  { %v574_v44 = vld [vmem:[#allocation3] ss:$8 sm:$0xf] }
  0xe6   :  { %v588_v47 = vperm.slane %v574_v44, 0  ;;  %v589_v48 = vperm.slane %v574_v44, 1  ;;  %v591_v62 = vperm.slane %v574_v44, 3  ;;  %v590_v11 = vperm.slane %v574_v44, 2 }
  0xe8   :  { %v596_v53 = vsel %vm569_vm0, %v579_v51, %v588_v47  ;;  %v597_v54 = vsel %vm569_vm0, %v580_v52, %v589_v48  ;;  %v599_v58 = vsel %vm569_vm0, %v582_v2, %v591_v62  ;;  %v598_v14 = vsel %vm569_vm0, %v581_v13, %v590_v11  ;;  %v835_v62 = vld [vmem:[#allocation3 + $0x1] ss:$8 sm:$0xf] }
  0xfa   :  { %v540_v34 = vpop.f32.mrf.mxu2  ;;  %v560_v35 = vpop.f32.mrf.mxu3 }
  0xfb   :  { %v500_v36 = vpop.f32.mrf.mxu0  ;;  %v520_v37 = vpop.f32.mrf.mxu1  ;;  %v541_v38 = vadd.f32 %v540_v34, %v477_v30  ;;  %v561_v41 = vadd.f32 %v560_v35, %v478_v33 }
  0xfc   :  { %v501_v39 = vadd.f32 %v500_v36, %v475_v31  ;;  %v521_v40 = vadd.f32 %v520_v37, %v476_v32 }
  0xfd   :  { %565 = vst [vmem:[#allocation4 + $0x10] sm:$0xff] %v541_v38 }
  0xfe   :  { %563 = vst [vmem:[#allocation4] sm:$0xff] %v501_v39 }
  0xff   :  { %564 = vst [vmem:[#allocation4 + $0x8] sm:$0xff] %v521_v40 }
 0x100   :  { %566 = vst [vmem:[#allocation4 + $0x18] sm:$0xff] %v561_v41 }
 0x107   :  { %v575_v45 = vld [vmem:[#allocation4] ss:$8 sm:$0xf] }
 0x108   :  { %v601_v49 = vperm.slane %v575_v45, 0  ;;  %v602_v50 = vperm.slane %v575_v45, 1  ;;  %v604_v63 = vperm.slane %v575_v45, 3  ;;  %v603_v12 = vperm.slane %v575_v45, 2 }
 0x10a   :  { %v609_v55 = vadd.f32 %v601_v49, %v596_v53  ;;  %v610_v56 = vadd.f32 %v602_v50, %v597_v54  ;;  %v612_v3 = vadd.f32 %v604_v63, %v599_v58  ;;  %v611_v17 = vadd.f32 %v603_v12, %v598_v14 }
 0x10b   :  { %v849_v58 = vperm.slane %v835_v62, 1  ;;  %v851_v14 = vperm.slane %v835_v62, 3 }
 0x116   :  { %v694_v57 = vpop.f32.mrf.mxu0  ;;  %v714_v59 = vpop.f32.mrf.mxu1 }
 0x117   :  { %v757_v60 = vadd.f32 %v694_v57, %v609_v55  ;;  %v758_v61 = vadd.f32 %v714_v59, %v610_v56  ;;  %v3594_v59 = vand.u32 127, %v567_v42  ;;  %v848_v42 = vperm.slane %v835_v62, 0 }
 0x119   :  { %v2659_v0 = vmul.f32 -1.442695, %v757_v60  ;;  %v2660_v1 = vmul.f32 -1.442695, %v758_v61  ;;  %4482 = vst [vmem:[#allocation16_spill] sm:$0xff] %v3594_v59  ;;  %vm572_vm13 = vcmp.lt.s32.totalorder %v3594_v59, 64 }
 0x11a   :  { %v3805_v59 = vld [vmem:[#allocation9 + $0x50] sm:$0xff] }
 0x11b   :  { %2691 = vpow2.f32 %v2659_v0  ;;  %v837_v0 = vld [vmem:[#allocation4 + $0x1] ss:$8 sm:$0xf]  ;;  %4501 = vst [vmem:[#allocation35_spill] sm:$0xff] %v3805_v59 }
 0x11c   :  { %2693 = vpow2.f32 %v2660_v1  ;;  %v833_v1 = vld [vmem:[#allocation2 + $0x1] ss:$8 sm:$0xf]  ;;  %v861_v2 = vperm.slane %v837_v0, 0 }
 0x11d   :  { %v754_v4 = vpop.f32.mrf.mxu3  ;;  %v734_v15 = vpop.f32.mrf.mxu2 }
 0x11e   :  { %v760_v5 = vadd.f32 %v754_v4, %v612_v3  ;;  %v759_v20 = vadd.f32 %v734_v15, %v611_v17  ;;  %v839_v3 = vperm.slane %v833_v1, 0  ;;  %v862_v4 = vperm.slane %v837_v0, 1 }
 0x120   :  { %v2661_v6 = vmul.f32 -1.442695, %v760_v5  ;;  %v840_v5 = vperm.slane %v833_v1, 1 }
 0x121   :  { %v2692_v7 = vpop.eup %2691 }
 0x122   :  { %v2694_v8 = vpop.eup %2693  ;;  %v764_v9 = vadd.f32 1.0, %v2692_v7  ;;  %2695 = vpow2.f32 %v2661_v6  ;;  %v856_v6 = vsel %vm569_vm0, %v839_v3, %v848_v42 }
 0x123   :  { %v783_v10 = vadd.f32 1.0, %v2694_v8  ;;  %v869_v7 = vadd.f32 %v861_v2, %v856_v6  ;;  %v857_v8 = vsel %vm569_vm0, %v840_v5, %v849_v58 }
 0x124   :  { %2697 = vrcp.f32 %v764_v9  ;;  %v776_v26 = vand.u32 2147483648, %v764_v9  ;;  %v774_v29 = vand.u32 2147483647, %v764_v9  ;;  %vm770_vm3 = vweird.f32 %v764_v9 }
 0x125   :  { %2699 = vrcp.f32 %v783_v10  ;;  %v795_v27 = vand.u32 2147483648, %v783_v10  ;;  %v793_v31 = vand.u32 2147483647, %v783_v10  ;;  %vm789_vm4 = vweird.f32 %v783_v10 }
 0x126   :  { %v777_v34 = vor.u32 1.1754944e-38, %v776_v26  ;;  %vm775_vm6 = vcmp.eq.f32.partialorder %v774_v29, 8.507059e+37  ;;  %v863_v29 = vperm.slane %v837_v0, 2 }
 0x127   :  { %v796_v37 = vor.u32 1.1754944e-38, %v795_v27  ;;  %vm794_vm8 = vcmp.eq.f32.partialorder %v793_v31, 8.507059e+37 }
 0x128   :  { %v2696_v16 = vpop.eup %2695 }
 0x129   :  { %v803_v18 = vadd.f32 1.0, %v2696_v16  ;;  %v864_v16 = vperm.slane %v837_v0, 3 }
 0x12a   :  { %v2698_v19 = vpop.eup %2697 }
 0x12b   :  { %v2700_v21 = vpop.eup %2699  ;;  %v766_v22 = vmul.f32 %v2698_v19, %v764_v9  ;;  %2701 = vrcp.f32 %v803_v18  ;;  %vm771_vm1 = vweird.f32 %v2698_v19  ;;  %v815_v51 = vand.u32 2147483648, %v803_v18 }
 0x12c   :  { %v785_v23 = vmul.f32 %v2700_v21, %v783_v10  ;;  %2703 = vtanh.f32 %v759_v20  ;;  %vm790_vm2 = vweird.f32 %v2700_v21  ;;  %vm772_vm5 = vmor %vm770_vm3, %vm771_vm1  ;;  %vm809_vm10 = vweird.f32 %v803_v18 }
 0x12d   :  { %v767_v24 = vsub.f32 1.0, %v766_v22  ;;  %vm791_vm7 = vmor %vm789_vm4, %vm790_vm2  ;;  %v813_v52 = vand.u32 2147483647, %v803_v18  ;;  %v816_v54 = vor.u32 1.1754944e-38, %v815_v51  ;;  %v870_v10 = vadd.f32 %v862_v4, %v857_v8 }
 0x12e   :  { %v786_v25 = vsub.f32 1.0, %v785_v23 }
 0x12f   :  { %v768_v28 = vmul.f32 %v2698_v19, %v767_v24  ;;  %vm814_vm12 = vcmp.eq.f32.partialorder %v813_v52, 8.507059e+37 }
 0x130   :  { %v787_v30 = vmul.f32 %v2700_v21, %v786_v25 }
 0x131   :  { %v2702_v32 = vpop.eup %2701  ;;  %v769_v33 = vadd.f32 %v2698_v19, %v768_v28  ;;  %v850_v28 = vperm.slane %v835_v62, 2 }
 0x132   :  { %v788_v35 = vadd.f32 %v2700_v21, %v787_v30  ;;  %v805_v36 = vmul.f32 %v2702_v32, %v803_v18  ;;  %v2704_v39 = vpop.eup %2703  ;;  %vm810_vm9 = vweird.f32 %v2702_v32  ;;  %v842_v18 = vperm.slane %v833_v1, 3 }
 0x133   :  { %v773_v38 = vsel %vm772_vm5, %v2698_v19, %v769_v33  ;;  %vm811_vm11 = vmor %vm809_vm10, %vm810_vm9  ;;  %v841_v30 = vperm.slane %v833_v1, 2 }
 0x134   :  { %v778_v40 = vsel %vm775_vm6, %v777_v34, %v773_v38  ;;  %v792_v41 = vsel %vm791_vm7, %v2700_v21, %v788_v35  ;;  %v806_v44 = vsub.f32 1.0, %v805_v36  ;;  %v859_v19 = vsel %vm569_vm0, %v842_v18, %v851_v14  ;;  %v3626_v14 = vld [vmem:[#allocation9 + $0x1f8] sm:$0xff] }
 0x135   :  { %v797_v45 = vsel %vm794_vm8, %v796_v37, %v792_v41  ;;  %v820_v46 = vmul.f32 %v2704_v39, %v778_v40  ;;  %v872_v20 = vadd.f32 %v864_v16, %v859_v19  ;;  %v858_v31 = vsel %vm569_vm0, %v841_v30, %v850_v28  ;;  %v3632_v16 = vld [vmem:[#allocation9 + $0x1c8] sm:$0xff]  ;;  %v3638_v18 = vld [vmem:[#allocation9 + $0x1d8] sm:$0xff]  ;;  %v3642_v19 = vld [vmem:[#allocation9 + $0x1a0] sm:$0xff] }
 0x136   :  { %v819_v47 = vmul.f32 0.0, %v797_v45  ;;  %v807_v48 = vmul.f32 %v2702_v32, %v806_v44  ;;  %v871_v33 = vadd.f32 %v863_v29, %v858_v31  ;;  %v3667_v29 = vld [vmem:[#allocation9 + $0x198] sm:$0xff]  ;;  %v3673_v31 = vld [vmem:[#allocation9 + $0x160] sm:$0xff] }
 0x137   :  { %v3669_v30 = vld [vmem:[#allocation2 + $0x2] ss:$8 sm:$0xf] }
 0x138   :  { %v3589_v49 = vadd.f32 %v820_v46, %v819_v47  ;;  %v808_v50 = vadd.f32 %v2702_v32, %v807_v48 }
 0x13a   :  { %2705 = vtanh.f32 %v3589_v49  ;;  %v812_v53 = vsel %vm811_vm11, %v2702_v32, %v808_v50 }
 0x13b   :  { %v817_v56 = vsel %vm814_vm12, %v816_v54, %v812_v53 }
 0x140   :  { %v2706_v55 = vpop.eup %2705 }
 0x141   :  { %v823_v57 = vmul.f32 %v2706_v55, %v817_v56 }
 0x143   :  { %824 = vrot.lane.b32.xlu0 %v823_v57, %s2928_s6  ;;  %953 = vmatmul.f32.vlgmr.msra.gmra.mxu0 %v823_v57 }
 0x144   :  { %973 = vmatmul.f32.vlgmr.msra.gmra.mxu1 %v823_v57  ;;  %993 = vmatmul.f32.vlgmr.msra.gmra.mxu2 %v823_v57 }
 0x145   :  { %1013 = vmatmul.f32.vlgmr.msra.gmra.mxu3 %v823_v57 }
 0x146   :  { %1517 = vmatpush.msra.mxu3 %v3626_v14 }
 0x148   :  { %1518 = vmatpush.msra.mxu3 %v3638_v18 }
 0x1b5   :  { %v825_v60 = vpop.permute.xlu0 %824 }
 0x1b6   :  { %v827_v61 = vrot.slane %v825_v60, 1  ;;  %831 = vst [vmem:[%s4423_s8 - $0x1] sm:$0x4] %v825_v60 }
 0x1b8   :  { %v829_v63 = vsel %vm572_vm13, %v823_v57, %v827_v61 }
 0x1b9   :  { %830 = vst [vmem:[%s4423_s8] sm:$0x1] %v829_v63 }
 0x1c0   :  { %v954_v9 = vpop.f32.mrf.mxu0 }
 0x1c1   :  { %v1017_v11 = vadd.f32 %v954_v9, %v869_v7  ;;  %v974_v12 = vpop.f32.mrf.mxu1 }
 0x1c2   :  { %v1018_v13 = vadd.f32 %v974_v12, %v870_v10  ;;  %v3620_v12 = vld [vmem:[#allocation9 + $0x1e8] sm:$0xff] }
 0x1c3   :  { %v2662_v15 = vmul.f32 -1.442695, %v1017_v11  ;;  %4484 = vst [vmem:[#allocation18_spill] sm:$0xff] %v3620_v12  ;;  %1477 = vmatpush.msra.mxu1 %v3620_v12 }
 0x1c4   :  { %v2663_v17 = vmul.f32 -1.442695, %v1018_v13  ;;  %v3622_v13 = vld [vmem:[#allocation9 + $0x1f0] sm:$0xff] }
 0x1c5   :  { %2707 = vpow2.f32 %v2662_v15  ;;  %1497 = vmatpush.msra.mxu2 %v3622_v13  ;;  %v3630_v15 = vld [vmem:[#allocation9 + $0x1c0] sm:$0xff]  ;;  %1478 = vmatpush.msra.mxu1 %v3632_v16 }
 0x1c6   :  { %2709 = vpow2.f32 %v2663_v17  ;;  %v3634_v17 = vld [vmem:[#allocation9 + $0x1d0] sm:$0xff] }
 0x1c7   :  { %v994_v32 = vpop.f32.mrf.mxu2  ;;  %1498 = vmatpush.msra.mxu2 %v3634_v17 }
 0x1c8   :  { %v1014_v21 = vpop.f32.mrf.mxu3  ;;  %v1019_v36 = vadd.f32 %v994_v32, %v871_v33  ;;  %v3675_v32 = vld [vmem:[#allocation9 + $0x168] sm:$0xff]  ;;  %v3677_v33 = vld [vmem:[#allocation9 + $0x170] sm:$0xff] }
 0x1c9   :  { %v1020_v22 = vadd.f32 %v1014_v21, %v872_v20  ;;  %v3644_v20 = vld [vmem:[#allocation9 + $0x1a8] sm:$0xff]  ;;  %v3646_v21 = vld [vmem:[#allocation9 + $0x1b0] sm:$0xff] }
 0x1ca   :  { %1479 = vmatpush.msra.mxu1 %v3644_v20  ;;  %1499 = vmatpush.msra.mxu2 %v3646_v21 }
 0x1cb   :  { %v2708_v23 = vpop.eup %2707  ;;  %v2664_v24 = vmul.f32 -1.442695, %v1020_v22  ;;  %v3650_v22 = vld [vmem:[#allocation9 + $0x1b8] sm:$0xff] }
 0x1cc   :  { %v2710_v25 = vpop.eup %2709  ;;  %v1024_v26 = vadd.f32 1.0, %v2708_v23  ;;  %1519 = vmatpush.msra.mxu3 %v3650_v22 }
 0x1cd   :  { %v1043_v27 = vadd.f32 1.0, %v2710_v25  ;;  %2711 = vpow2.f32 %v2664_v24  ;;  %v3652_v24 = vld [vmem:[#allocation3 + $0x2] ss:$8 sm:$0xf] }
 0x1ce   :  { %2713 = vrcp.f32 %v1024_v26  ;;  %v1036_v45 = vand.u32 2147483648, %v1024_v26  ;;  %v1034_v48 = vand.u32 2147483647, %v1024_v26  ;;  %vm1030_vm1 = vweird.f32 %v1024_v26  ;;  %v3656_v25 = vld [vmem:[#allocation9 + $0x180] sm:$0xff]  ;;  %1520 = vmatpush.msra.mxu3 %v3667_v29 }
 0x1cf   :  { %2715 = vrcp.f32 %v1043_v27  ;;  %v1055_v46 = vand.u32 2147483648, %v1043_v27  ;;  %v1053_v51 = vand.u32 2147483647, %v1043_v27  ;;  %vm1049_vm2 = vweird.f32 %v1043_v27  ;;  %4485 = vst [vmem:[#allocation19_spill] sm:$0xff] %v3656_v25 }
 0x1d0   :  { %v1037_v54 = vor.u32 1.1754944e-38, %v1036_v45  ;;  %vm1035_vm5 = vcmp.eq.f32.partialorder %v1034_v48, 8.507059e+37  ;;  %v1109_v45 = vperm.slane %v3652_v24, 1  ;;  %v3711_v48 = vld [vmem:[#allocation9 + $0x130] sm:$0xff] }
 0x1d1   :  { %v1056_v56 = vor.u32 1.1754944e-38, %v1055_v46  ;;  %vm1054_vm6 = vcmp.eq.f32.partialorder %v1053_v51, 8.507059e+37  ;;  %v3707_v46 = vld [vmem:[#allocation9 + $0x120] sm:$0xff] }
 0x1d3   :  { %v2712_v34 = vpop.eup %2711 }
 0x1d4   :  { %v2714_v35 = vpop.eup %2713  ;;  %v1063_v37 = vadd.f32 1.0, %v2712_v34 }
 0x1d5   :  { %v2716_v38 = vpop.eup %2715  ;;  %v1026_v39 = vmul.f32 %v2714_v35, %v1024_v26  ;;  %vm1031_vm14 = vweird.f32 %v2714_v35  ;;  %v3658_v26 = vld [vmem:[#allocation9 + $0x188] sm:$0xff] }
 0x1d6   :  { %v1045_v40 = vmul.f32 %v2716_v38, %v1043_v27  ;;  %2717 = vrcp.f32 %v1063_v37  ;;  %vm1050_vm15 = vweird.f32 %v2716_v38  ;;  %vm1032_vm3 = vmor %vm1030_vm1, %vm1031_vm14  ;;  %v1075_v5 = vand.u32 2147483648, %v1063_v37  ;;  %v3660_v27 = vld [vmem:[#allocation9 + $0x190] sm:$0xff]  ;;  %1480 = vmatpush.msra.mxu1 %v3658_v26 }
 0x1d7   :  { %v1027_v41 = vsub.f32 1.0, %v1026_v39  ;;  %2719 = vtanh.f32 %v1019_v36  ;;  %vm1051_vm4 = vmor %vm1049_vm2, %vm1050_vm15  ;;  %vm1069_vm8 = vweird.f32 %v1063_v37  ;;  %v1073_v6 = vand.u32 2147483647, %v1063_v37  ;;  %1500 = vmatpush.msra.mxu2 %v3660_v27  ;;  %v3685_v36 = vld [vmem:[#allocation9 + $0x178] sm:$0xff]  ;;  %v3696_v39 = vld [vmem:[#allocation9 + $0x150] sm:$0xff] }
 0x1d8   :  { %v1046_v44 = vsub.f32 1.0, %v1045_v40  ;;  %v1076_v8 = vor.u32 1.1754944e-38, %v1075_v5  ;;  %1481 = vmatpush.msra.mxu1 %v3675_v32  ;;  %4486 = vst [vmem:[#allocation20_spill] sm:$0xff] %v3685_v36  ;;  %1521 = vmatpush.msra.mxu3 %v3685_v36  ;;  %v1108_v40 = vperm.slane %v3652_v24, 0 }
 0x1d9   :  { %v1028_v47 = vmul.f32 %v2714_v35, %v1027_v41  ;;  %vm1074_vm10 = vcmp.eq.f32.partialorder %v1073_v6, 8.507059e+37  ;;  %1501 = vmatpush.msra.mxu2 %v3677_v33  ;;  %4488 = vst [vmem:[#allocation22_spill] sm:$0xff] %v3696_v39  ;;  %v3701_v41 = vld [vmem:[#allocation9 + $0x158] sm:$0xff]  ;;  %v3750_v6 = vld [vmem:[#allocation9 + $0xc0] sm:$0xff] }
 0x1da   :  { %v1047_v50 = vmul.f32 %v2716_v38, %v1046_v44  ;;  %4489 = vst [vmem:[#allocation23_spill] sm:$0xff] %v3701_v41  ;;  %1522 = vmatpush.msra.mxu3 %v3701_v41 }
 0x1db   :  { %v1029_v52 = vadd.f32 %v2714_v35, %v1028_v47  ;;  %1502 = vmatpush.msra.mxu2 %v3696_v39  ;;  %v3709_v47 = vld [vmem:[#allocation9 + $0x128] sm:$0xff] }
 0x1dc   :  { %v2718_v53 = vpop.eup %2717  ;;  %v1048_v55 = vadd.f32 %v2716_v38, %v1047_v50  ;;  %4490 = vst [vmem:[#allocation24_spill] sm:$0xff] %v3709_v47  ;;  %v1099_v50 = vperm.slane %v3669_v30, 0 }
 0x1dd   :  { %v1033_v57 = vsel %vm1032_vm3, %v2714_v35, %v1029_v52  ;;  %v1065_v60 = vmul.f32 %v2718_v53, %v1063_v37  ;;  %v2720_v61 = vpop.eup %2719  ;;  %vm1070_vm7 = vweird.f32 %v2718_v53  ;;  %v3681_v35 = vld [vmem:[#allocation4 + $0x2] ss:$8 sm:$0xf]  ;;  %1503 = vmatpush.msra.mxu2 %v3711_v48 }
 0x1de   :  { %v1038_v62 = vsel %vm1035_vm5, %v1037_v54, %v1033_v57  ;;  %v1052_v63 = vsel %vm1051_vm4, %v2716_v38, %v1048_v55  ;;  %vm1071_vm9 = vmor %vm1069_vm8, %vm1070_vm7  ;;  %v3692_v37 = vld [vmem:[#allocation9 + $0x140] sm:$0xff]  ;;  %v3694_v38 = vld [vmem:[#allocation9 + $0x148] sm:$0xff]  ;;  %v1121_v44 = vperm.slane %v3681_v35, 0  ;;  %v1122_v51 = vperm.slane %v3681_v35, 1 }
 0x1df   :  { %v1057_v0 = vsel %vm1054_vm6, %v1056_v56, %v1052_v63  ;;  %v1080_v1 = vmul.f32 %v2720_v61, %v1038_v62  ;;  %v1066_v42 = vsub.f32 1.0, %v1065_v60  ;;  %4487 = vst [vmem:[#allocation21_spill] sm:$0xff] %v3694_v38  ;;  %1482 = vmatpush.msra.mxu1 %v3694_v38  ;;  %v3717_v52 = vld [vmem:[#allocation9 + $0x138] sm:$0xff]  ;;  %v3722_v54 = vld [vmem:[#allocation9 + $0x100] sm:$0xff]  ;;  %v3724_v55 = vld [vmem:[#allocation9 + $0x108] sm:$0xff]  ;;  %v1116_v57 = vsel %vm569_vm0, %v1099_v50, %v1108_v40 }
 0x1e0   :  { %v1079_v2 = vmul.f32 %v1057_v0, %v3589_v49  ;;  %v3618_v49 = vld [vmem:[#allocation9 + $0x1e0] sm:$0xff]  ;;  %1523 = vmatpush.msra.mxu3 %v3717_v52  ;;  %v3726_v56 = vld [vmem:[#allocation9 + $0x110] sm:$0xff]  ;;  %v3732_v60 = vld [vmem:[#allocation9 + $0x118] sm:$0xff]  ;;  %v1129_v61 = vadd.f32 %v1121_v44, %v1116_v57  ;;  %v1102_v50 = vperm.slane %v3669_v30, 3 }
 0x1e1   :  { %v1067_v58 = vmul.f32 %v2718_v53, %v1066_v42  ;;  %4483 = vst [vmem:[#allocation17_spill] sm:$0xff] %v3618_v49  ;;  %1457 = vmatpush.msra.mxu0 %v3618_v49  ;;  %1483 = vmatpush.msra.mxu1 %v3709_v47  ;;  %v3738_v63 = vld [vmem:[#allocation9 + $0xe0] sm:$0xff]  ;;  %v3740_v0 = vld [vmem:[#allocation9 + $0xe8] sm:$0xff]  ;;  %v3768_v44 = vld [vmem:[#allocation9 + $0xb0] sm:$0xff] }
 0x1e2   :  { %v3614_v3 = vadd.f32 %v1080_v1, %v1079_v2  ;;  %1504 = vmatpush.msra.mxu2 %v3726_v56  ;;  %1524 = vmatpush.msra.mxu3 %v3732_v60  ;;  %v3742_v1 = vld [vmem:[#allocation9 + $0xf0] sm:$0xff]  ;;  %v3766_v40 = vld [vmem:[#allocation9 + $0xa8] sm:$0xff] }
 0x1e3   :  { %v1068_v4 = vadd.f32 %v2718_v53, %v1067_v58  ;;  %1458 = vmatpush.msra.mxu0 %v3630_v15  ;;  %1484 = vmatpush.msra.mxu1 %v3724_v55  ;;  %v3746_v58 = vld [vmem:[#allocation9 + $0xf8] sm:$0xff]  ;;  %v3779_v57 = vld [vmem:[#allocation9 + $0x88] sm:$0xff] }
 0x1e4   :  { %2721 = vtanh.f32 %v3614_v3  ;;  %1505 = vmatpush.msra.mxu2 %v3742_v1  ;;  %1525 = vmatpush.msra.mxu3 %v3746_v58  ;;  %4492 = vst [vmem:[#allocation26_spill] sm:$0xff] %v3779_v57 }
 0x1e5   :  { %v1072_v7 = vsel %vm1071_vm9, %v2718_v53, %v1068_v4  ;;  %1459 = vmatpush.msra.mxu0 %v3642_v19  ;;  %v1100_v53 = vperm.slane %v3669_v30, 1  ;;  %1485 = vmatpush.msra.mxu1 %v3740_v0 }
 0x1e6   :  { %v1077_v10 = vsel %vm1074_vm10, %v1076_v8, %v1072_v7  ;;  %v3752_v7 = vld [vmem:[#allocation9 + $0xc8] sm:$0xff]  ;;  %v3754_v8 = vld [vmem:[#allocation9 + $0xd0] sm:$0xff] }
 0x1e7   :  { %1460 = vmatpush.msra.mxu0 %v3656_v25  ;;  %v1117_v62 = vsel %vm569_vm0, %v1100_v53, %v1109_v45  ;;  %1486 = vmatpush.msra.mxu1 %v3752_v7  ;;  %v3777_v53 = vld [vmem:[#allocation9 + $0x80] sm:$0xff] }
 0x1e8   :  { %v1130_v2 = vadd.f32 %v1122_v51, %v1117_v62  ;;  %1506 = vmatpush.msra.mxu2 %v3754_v8  ;;  %v3773_v51 = vld [vmem:[#allocation9 + $0xb8] sm:$0xff]  ;;  %4491 = vst [vmem:[#allocation25_spill] sm:$0xff] %v3777_v53 }
 0x1e9   :  { %1461 = vmatpush.msra.mxu0 %v3673_v31  ;;  %1487 = vmatpush.msra.mxu1 %v3766_v40 }
 0x1ea   :  { %v2722_v9 = vpop.eup %2721  ;;  %1507 = vmatpush.msra.mxu2 %v3768_v44 }
 0x1eb   :  { %v1083_v11 = vmul.f32 %v2722_v9, %v1077_v10  ;;  %1462 = vmatpush.msra.mxu0 %v3692_v37  ;;  %v1111_v10 = vperm.slane %v3652_v24, 3  ;;  %1488 = vmatpush.msra.mxu1 %v3779_v57 }
 0x1ed   :  { %1084 = vrot.lane.b32.xlu0 %v1083_v11, %s2928_s6  ;;  %1213 = vmatmul.f32.vlgmr.msrb.gmra.mxu0 %v1083_v11  ;;  %v1119_v62 = vsel %vm569_vm0, %v1102_v50, %v1111_v10  ;;  %v3799_v10 = vld [vmem:[#allocation9 + $0x40] sm:$0xff]  ;;  %v3803_v50 = vld [vmem:[#allocation9 + $0x48] sm:$0xff] }
 0x1ee   :  { %1233 = vmatmul.f32.vlgmr.msrb.gmra.mxu1 %v1083_v11  ;;  %1253 = vmatmul.f32.vlgmr.msrb.gmra.mxu2 %v1083_v11  ;;  %4499 = vst [vmem:[#allocation33_spill] sm:$0xff] %v3799_v10 }
 0x1ef   :  { %1273 = vmatmul.f32.vlgmr.msrb.gmra.mxu3 %v1083_v11  ;;  %1463 = vmatpush.msra.mxu0 %v3707_v46  ;;  %4500 = vst [vmem:[#allocation34_spill] sm:$0xff] %v3803_v50 }
 0x1f1   :  { %1464 = vmatpush.msra.mxu0 %v3722_v54 }
 0x1f3   :  { %1465 = vmatpush.msra.mxu0 %v3738_v63 }
 0x1f5   :  { %1466 = vmatpush.msra.mxu0 %v3750_v6 }
 0x25f   :  { %v1085_v23 = vpop.permute.xlu0 %1084 }
 0x260   :  { %v1087_v28 = vrot.slane %v1085_v23, 1  ;;  %1091 = vst [vmem:[%s4423_s8 + $0x1] sm:$0x4] %v1085_v23 }
 0x262   :  { %v1089_v34 = vsel %vm572_vm13, %v1083_v11, %v1087_v28  ;;  %v3759_v11 = vld [vmem:[#allocation9 + $0xd8] sm:$0xff]  ;;  %v1124_v28 = vperm.slane %v3681_v35, 3 }
 0x263   :  { %1090 = vst [vmem:[%s4423_s8 + $0x2] sm:$0x1] %v1089_v34  ;;  %1526 = vmatpush.msra.mxu3 %v3759_v11  ;;  %v3764_v34 = vld [vmem:[#allocation9 + $0xa0] sm:$0xff] }
 0x264   :  { %1467 = vmatpush.msra.mxu0 %v3764_v34 }
 0x265   :  { %1527 = vmatpush.msra.mxu3 %v3773_v51 }
 0x266   :  { %1468 = vmatpush.msra.mxu0 %v3777_v53 }
 0x26a   :  { %v1214_v42 = vpop.f32.mrf.mxu0 }
 0x26b   :  { %v1277_v4 = vadd.f32 %v1214_v42, %v1129_v61  ;;  %v1234_v5 = vpop.f32.mrf.mxu1  ;;  %v3781_v61 = vld [vmem:[#allocation9 + $0x90] sm:$0xff]  ;;  %v3787_v42 = vld [vmem:[#allocation9 + $0x98] sm:$0xff] }
 0x26c   :  { %v1278_v9 = vadd.f32 %v1234_v5, %v1130_v2  ;;  %4493 = vst [vmem:[#allocation27_spill] sm:$0xff] %v3781_v61  ;;  %v3789_v2 = vld [vmem:[#allocation9 + $0x60] sm:$0xff]  ;;  %v1132_v5 = vadd.f32 %v1124_v28, %v1119_v62  ;;  %1508 = vmatpush.msra.mxu2 %v3781_v61  ;;  %1528 = vmatpush.msra.mxu3 %v3787_v42  ;;  %v3807_v28 = vld [vmem:[#allocation9 + $0x58] sm:$0xff]  ;;  %v3813_v61 = vld [vmem:[#allocation9 + $0x28] sm:$0xff] }
 0x26d   :  { %v2665_v23 = vmul.f32 -1.442695, %v1277_v4  ;;  %4494 = vst [vmem:[#allocation28_spill] sm:$0xff] %v3787_v42  ;;  %v3791_v4 = vld [vmem:[#allocation9 + $0x68] sm:$0xff]  ;;  %1469 = vmatpush.msra.mxu0 %v3789_v2  ;;  %v3811_v42 = vld [vmem:[#allocation9 + $0x20] sm:$0xff] }
 0x26e   :  { %v2666_v45 = vmul.f32 -1.442695, %v1278_v9  ;;  %4495 = vst [vmem:[#allocation29_spill] sm:$0xff] %v3789_v2  ;;  %v3795_v9 = vld [vmem:[#allocation9 + $0x70] sm:$0xff]  ;;  %1489 = vmatpush.msra.mxu1 %v3791_v4  ;;  %v3819_v2 = vld [vmem:[#allocation9 + $0x38] sm:$0xff] }
 0x26f   :  { %2723 = vpow2.f32 %v2665_v23  ;;  %4496 = vst [vmem:[#allocation30_spill] sm:$0xff] %v3791_v4  ;;  %v3797_v23 = vld [vmem:[#allocation9 + $0x78] sm:$0xff]  ;;  %1509 = vmatpush.msra.mxu2 %v3795_v9  ;;  %1470 = vmatpush.msra.mxu0 %v3799_v10  ;;  %v3817_v4 = vld [vmem:[#allocation9 + $0x30] sm:$0xff] }
 0x270   :  { %2725 = vpow2.f32 %v2666_v45  ;;  %4497 = vst [vmem:[#allocation31_spill] sm:$0xff] %v3795_v9  ;;  %1529 = vmatpush.msra.mxu3 %v3797_v23  ;;  %1490 = vmatpush.msra.mxu1 %v3803_v50  ;;  %v3831_v50 = vld [vmem:[#allocation9 + $0x10] sm:$0xff]  ;;  %v3833_v10 = vld [vmem:[#allocation9 + $0x18] sm:$0xff] }
 0x271   :  { %4498 = vst [vmem:[#allocation32_spill] sm:$0xff] %v3797_v23  ;;  %1510 = vmatpush.msra.mxu2 %v3805_v59  ;;  %1471 = vmatpush.msra.mxu0 %v3811_v42  ;;  %v1110_v59 = vperm.slane %v3652_v24, 2 }
 0x272   :  { %v1274_v45 = vpop.f32.mrf.mxu3  ;;  %1530 = vmatpush.msra.mxu3 %v3807_v28  ;;  %1491 = vmatpush.msra.mxu1 %v3813_v61  ;;  %4502 = vst [vmem:[#allocation36_spill] sm:$0xff] %v3833_v10 }
 0x273   :  { %v1280_v62 = vadd.f32 %v1274_v45, %v1132_v5  ;;  %v3823_v5 = vld [vmem:[#allocation9] sm:$0xff]  ;;  %v3825_v45 = vld [vmem:[#allocation9 + $0x8] sm:$0xff]  ;;  %1511 = vmatpush.msra.mxu2 %v3817_v4 }
 0x274   :  { %1531 = vmatpush.msra.mxu3 %v3819_v2  ;;  %1472 = vmatpush.msra.mxu0 %v3823_v5 }
 0x275   :  { %v2724_v57 = vpop.eup %2723  ;;  %v2667_v53 = vmul.f32 -1.442695, %v1280_v62  ;;  %1492 = vmatpush.msra.mxu1 %v3825_v45  ;;  %1512 = vmatpush.msra.mxu2 %v3831_v50 }
 0x276   :  { %v2726_v23 = vpop.eup %2725  ;;  %v3827_v9 = vadd.f32 1.0, %v2724_v57  ;;  %v1123_v57 = vperm.slane %v3681_v35, 2  ;;  %1532 = vmatpush.msra.mxu3 %v3833_v10  ;;  %1717 = vmatpush.msrb.mxu0 %v3618_v49  ;;  %v1254_v35 = vpop.f32.mrf.mxu2 }
 0x277   :  { %v3835_v62 = vadd.f32 1.0, %v2726_v23  ;;  %2727 = vpow2.f32 %v2667_v53  ;;  %v1101_v23 = vperm.slane %v3669_v30, 2  ;;  %1737 = vmatpush.msrb.mxu1 %v3620_v12  ;;  %1757 = vmatpush.msrb.mxu2 %v3622_v13 }
 0x278   :  { %2729 = vrcp.f32 %v3827_v9  ;;  %1777 = vmatpush.msrb.mxu3 %v3626_v14  ;;  %1718 = vmatpush.msrb.mxu0 %v3630_v15  ;;  %vm1290_vm14 = vweird.f32 %v3827_v9 }
 0x279   :  { %2731 = vrcp.f32 %v3835_v62  ;;  %v1118_v24 = vsel %vm569_vm0, %v1101_v23, %v1110_v59  ;;  %1738 = vmatpush.msrb.mxu1 %v3632_v16  ;;  %1758 = vmatpush.msrb.mxu2 %v3634_v17  ;;  %vm1309_vm15 = vweird.f32 %v3835_v62 }
 0x27a   :  { %v1131_v53 = vadd.f32 %v1123_v57, %v1118_v24  ;;  %1778 = vmatpush.msrb.mxu3 %v3638_v18  ;;  %1719 = vmatpush.msrb.mxu0 %v3642_v19 }
 0x27b   :  { %1739 = vmatpush.msrb.mxu1 %v3644_v20  ;;  %1759 = vmatpush.msrb.mxu2 %v3646_v21 }
 0x27c   :  { %v1279_v12 = vadd.f32 %v1254_v35, %v1131_v53  ;;  %1779 = vmatpush.msrb.mxu3 %v3650_v22  ;;  %1720 = vmatpush.msrb.mxu0 %v3656_v25  ;;  %v1296_v53 = vand.u32 2147483648, %v3827_v9  ;;  %v1294_v25 = vand.u32 2147483647, %v3827_v9 }
 0x27d   :  { %v2728_v30 = vpop.eup %2727  ;;  %1740 = vmatpush.msrb.mxu1 %v3658_v26  ;;  %1760 = vmatpush.msrb.mxu2 %v3660_v27 }
 0x27e   :  { %v2730_v49 = vpop.eup %2729  ;;  %v3858_v10 = vadd.f32 1.0, %v2728_v30  ;;  %1780 = vmatpush.msrb.mxu3 %v3667_v29  ;;  %1721 = vmatpush.msrb.mxu0 %v3673_v31  ;;  %v1315_v30 = vand.u32 2147483648, %v3835_v62  ;;  %vm1295_vm3 = vcmp.eq.f32.partialorder %v1294_v25, 8.507059e+37 }
 0x27f   :  { %v2732_v59 = vpop.eup %2731  ;;  %v1286_v57 = vmul.f32 %v2730_v49, %v3827_v9  ;;  %1741 = vmatpush.msrb.mxu1 %v3675_v32  ;;  %vm1291_vm11 = vweird.f32 %v2730_v49  ;;  %1761 = vmatpush.msrb.mxu2 %v3677_v33 }
 0x280   :  { %v1305_v23 = vmul.f32 %v2732_v59, %v3835_v62  ;;  %2733 = vrcp.f32 %v3858_v10  ;;  %1781 = vmatpush.msrb.mxu3 %v3685_v36  ;;  %vm1310_vm12 = vweird.f32 %v2732_v59  ;;  %1722 = vmatpush.msrb.mxu0 %v3692_v37  ;;  %vm1292_vm1 = vmor %vm1290_vm14, %vm1291_vm11  ;;  %vm1329_vm6 = vweird.f32 %v3858_v10 }
 0x281   :  { %v1287_v24 = vsub.f32 1.0, %v1286_v57  ;;  %2735 = vtanh.f32 %v1279_v12  ;;  %1742 = vmatpush.msrb.mxu1 %v3694_v38  ;;  %1762 = vmatpush.msrb.mxu2 %v3696_v39  ;;  %vm1311_vm2 = vmor %vm1309_vm15, %vm1310_vm12 }
 0x282   :  { %v1306_v35 = vsub.f32 1.0, %v1305_v23  ;;  %v1313_v23 = vand.u32 2147483647, %v3835_v62  ;;  %1782 = vmatpush.msrb.mxu3 %v3701_v41  ;;  %1723 = vmatpush.msrb.mxu0 %v3707_v46 }
 0x283   :  { %v1288_v43 = vmul.f32 %v2730_v49, %v1287_v24  ;;  %1743 = vmatpush.msrb.mxu1 %v3709_v47  ;;  %1763 = vmatpush.msrb.mxu2 %v3711_v48 }
 0x284   :  { %v1307_v57 = vmul.f32 %v2732_v59, %v1306_v35  ;;  %v1297_v35 = vor.u32 1.1754944e-38, %v1296_v53  ;;  %1783 = vmatpush.msrb.mxu3 %v3717_v52  ;;  %vm1314_vm4 = vcmp.eq.f32.partialorder %v1313_v23, 8.507059e+37  ;;  %1724 = vmatpush.msrb.mxu0 %v3722_v54  ;;  %v4506_v23 = vld [vmem:[#allocation28_spill] sm:$0xff] }
 0x285   :  { %v1289_v12 = vadd.f32 %v2730_v49, %v1288_v43  ;;  %v1316_v43 = vor.u32 1.1754944e-38, %v1315_v30  ;;  %1744 = vmatpush.msrb.mxu1 %v3724_v55  ;;  %1764 = vmatpush.msrb.mxu2 %v3726_v56  ;;  %v4505_v30 = vld [vmem:[#allocation27_spill] sm:$0xff] }
 0x286   :  { %v2734_v24 = vpop.eup %2733  ;;  %v1308_v36 = vadd.f32 %v2732_v59, %v1307_v57  ;;  %1784 = vmatpush.msrb.mxu3 %v3732_v60  ;;  %1725 = vmatpush.msrb.mxu0 %v3738_v63 }
 0x287   :  { %v1293_v38 = vsel %vm1292_vm1, %v2730_v49, %v1289_v12  ;;  %v1325_v9 = vmul.f32 %v2734_v24, %v3858_v10  ;;  %v2736_v62 = vpop.eup %2735  ;;  %1745 = vmatpush.msrb.mxu1 %v3740_v0  ;;  %1765 = vmatpush.msrb.mxu2 %v3742_v1  ;;  %vm1330_vm5 = vweird.f32 %v2734_v24 }
 0x288   :  { %v1298_v41 = vsel %vm1295_vm3, %v1297_v35, %v1293_v38  ;;  %v1312_v39 = vsel %vm1311_vm2, %v2732_v59, %v1308_v36  ;;  %1785 = vmatpush.msrb.mxu3 %v3746_v58  ;;  %1726 = vmatpush.msrb.mxu0 %v3750_v6  ;;  %vm1331_vm7 = vmor %vm1329_vm6, %vm1330_vm5  ;;  %v4507_v35 = vld [vmem:[#allocation29_spill] sm:$0xff] }
 0x289   :  { %v1317_v53 = vsel %vm1314_vm4, %v1316_v43, %v1312_v39  ;;  %v1340_v57 = vmul.f32 %v2736_v62, %v1298_v41  ;;  %v1326_v47 = vsub.f32 1.0, %v1325_v9  ;;  %1746 = vmatpush.msrb.mxu1 %v3752_v7  ;;  %1766 = vmatpush.msrb.mxu2 %v3754_v8  ;;  %v1333_v39 = vand.u32 2147483647, %v3858_v10  ;;  %v4503_v41 = vld [vmem:[#allocation25_spill] sm:$0xff]  ;;  %v4508_v43 = vld [vmem:[#allocation30_spill] sm:$0xff]  ;;  %v4510_v9 = vld [vmem:[#allocation32_spill] sm:$0xff] }
 0x28a   :  { %v1339_v49 = vmul.f32 %v1317_v53, %v3614_v3  ;;  %1786 = vmatpush.msrb.mxu3 %v3759_v11  ;;  %v1335_v3 = vand.u32 2147483648, %v3858_v10  ;;  %1727 = vmatpush.msrb.mxu0 %v3764_v34  ;;  %v4509_v10 = vld [vmem:[#allocation31_spill] sm:$0xff] }
 0x28b   :  { %v1327_v25 = vmul.f32 %v2734_v24, %v1326_v47  ;;  %1747 = vmatpush.msrb.mxu1 %v3766_v40  ;;  %1767 = vmatpush.msrb.mxu2 %v3768_v44  ;;  %v4504_v47 = vld [vmem:[#allocation26_spill] sm:$0xff]  ;;  %vm1334_vm8 = vcmp.eq.f32.partialorder %v1333_v39, 8.507059e+37 }
 0x28c   :  { %v3901_v36 = vadd.f32 %v1340_v57, %v1339_v49  ;;  %1787 = vmatpush.msrb.mxu3 %v3773_v51  ;;  %1728 = vmatpush.msrb.mxu0 %v4503_v41  ;;  %v1336_v12 = vor.u32 1.1754944e-38, %v1335_v3  ;;  %v4511_v57 = vld [vmem:[#allocation33_spill] sm:$0xff]  ;;  %v4512_v49 = vld [vmem:[#allocation34_spill] sm:$0xff] }
 0x28d   :  { %v1328_v38 = vadd.f32 %v2734_v24, %v1327_v25  ;;  %1748 = vmatpush.msrb.mxu1 %v4504_v47  ;;  %1768 = vmatpush.msrb.mxu2 %v4505_v30  ;;  %v4513_v25 = vld [vmem:[#allocation35_spill] sm:$0xff]  ;;  %v4515_v3 = vld [vmem:[#allocation17_spill] sm:$0xff]  ;;  %v4516_v39 = vld [vmem:[#allocation18_spill] sm:$0xff] }
 0x28e   :  { %2737 = vtanh.f32 %v3901_v36  ;;  %1788 = vmatpush.msrb.mxu3 %v4506_v23  ;;  %1729 = vmatpush.msrb.mxu0 %v4507_v35 }
 0x28f   :  { %v1332_v59 = vsel %vm1331_vm7, %v2734_v24, %v1328_v38  ;;  %1749 = vmatpush.msrb.mxu1 %v4508_v43  ;;  %1769 = vmatpush.msrb.mxu2 %v4509_v10  ;;  %v4514_v38 = vld [vmem:[#allocation36_spill] sm:$0xff] }
 0x290   :  { %1789 = vmatpush.msrb.mxu3 %v4510_v9  ;;  %v1337_v53 = vsel %vm1334_vm8, %v1336_v12, %v1332_v59  ;;  %1730 = vmatpush.msrb.mxu0 %v4511_v57  ;;  %v4517_v59 = vld [vmem:[#allocation19_spill] sm:$0xff] }
 0x291   :  { %1750 = vmatpush.msrb.mxu1 %v4512_v49  ;;  %1770 = vmatpush.msrb.mxu2 %v4513_v25 }
 0x292   :  { %1790 = vmatpush.msrb.mxu3 %v3807_v28  ;;  %1731 = vmatpush.msrb.mxu0 %v3811_v42 }
 0x293   :  { %1751 = vmatpush.msrb.mxu1 %v3813_v61  ;;  %1771 = vmatpush.msrb.mxu2 %v3817_v4 }
 0x294   :  { %v2738_v62 = vpop.eup %2737  ;;  %1791 = vmatpush.msrb.mxu3 %v3819_v2  ;;  %1732 = vmatpush.msrb.mxu0 %v3823_v5 }
 0x295   :  { %v3925_v24 = vmul.f32 %v2738_v62, %v1337_v53  ;;  %1752 = vmatpush.msrb.mxu1 %v3825_v45  ;;  %1772 = vmatpush.msrb.mxu2 %v3831_v50 }
 0x296   :  { %1792 = vmatpush.msrb.mxu3 %v4514_v38 }
 0x297   :  { %1344 = vrot.lane.b32.xlu1 %v3925_v24, %s2928_s6  ;;  %1473 = vmatmul.f32.vlgmr.msra.gmra.mxu0 %v3925_v24 }
 0x298   :  { %1493 = vmatmul.f32.vlgmr.msra.gmra.mxu1 %v3925_v24  ;;  %1513 = vmatmul.f32.vlgmr.msra.gmra.mxu2 %v3925_v24 }
 0x299   :  { %1533 = vmatmul.f32.vlgmr.msra.gmra.mxu3 %v3925_v24  ;;  %1977 = vmatpush.msra.mxu0 %v4515_v3 }
 0x29a   :  { %1997 = vmatpush.msra.mxu1 %v4516_v39  ;;  %2017 = vmatpush.msra.mxu2 %v3622_v13  ;;  %v4518_v13 = vld [vmem:[#allocation20_spill] sm:$0xff] }
 0x29b   :  { %2037 = vmatpush.msra.mxu3 %v3626_v14  ;;  %1978 = vmatpush.msra.mxu0 %v3630_v15  ;;  %v4519_v14 = vld [vmem:[#allocation21_spill] sm:$0xff]  ;;  %v4520_v15 = vld [vmem:[#allocation22_spill] sm:$0xff] }
 0x29c   :  { %1998 = vmatpush.msra.mxu1 %v3632_v16  ;;  %2018 = vmatpush.msra.mxu2 %v3634_v17  ;;  %v4521_v16 = vld [vmem:[#allocation23_spill] sm:$0xff]  ;;  %v4522_v17 = vld [vmem:[#allocation24_spill] sm:$0xff] }
 0x29d   :  { %2038 = vmatpush.msra.mxu3 %v3638_v18  ;;  %1979 = vmatpush.msra.mxu0 %v3642_v19 }
 0x29e   :  { %1999 = vmatpush.msra.mxu1 %v3644_v20  ;;  %2019 = vmatpush.msra.mxu2 %v3646_v21  ;;  %v1355_v20 = vld [vmem:[#allocation3 + $0x3] ss:$8 sm:$0xf] }
 0x29f   :  { %2039 = vmatpush.msra.mxu3 %v3650_v22  ;;  %1980 = vmatpush.msra.mxu0 %v4517_v59  ;;  %v4246_v21 = vld [vmem:[#allocation9 + $0x50] sm:$0xff] }
 0x2a0   :  { %2000 = vmatpush.msra.mxu1 %v3658_v26  ;;  %2020 = vmatpush.msra.mxu2 %v3660_v27  ;;  %v1357_v26 = vld [vmem:[#allocation4 + $0x3] ss:$8 sm:$0xf] }
 0x2a1   :  { %2040 = vmatpush.msra.mxu3 %v3667_v29  ;;  %1981 = vmatpush.msra.mxu0 %v3673_v31  ;;  %v1353_v27 = vld [vmem:[#allocation2 + $0x3] ss:$8 sm:$0xf]  ;;  %v1368_v29 = vperm.slane %v1355_v20, 0  ;;  %v1381_v31 = vperm.slane %v1357_v26, 0 }
 0x2a2   :  { %2001 = vmatpush.msra.mxu1 %v3675_v32  ;;  %2021 = vmatpush.msra.mxu2 %v3677_v33  ;;  %v1369_v32 = vperm.slane %v1355_v20, 1  ;;  %v1359_v33 = vperm.slane %v1353_v27, 0 }
 0x2a3   :  { %2041 = vmatpush.msra.mxu3 %v4518_v13  ;;  %1982 = vmatpush.msra.mxu0 %v3692_v37  ;;  %v1382_v37 = vperm.slane %v1357_v26, 1 }
 0x2a4   :  { %2002 = vmatpush.msra.mxu1 %v4519_v14  ;;  %2022 = vmatpush.msra.mxu2 %v4520_v15 }
 0x2a5   :  { %2042 = vmatpush.msra.mxu3 %v4521_v16  ;;  %1983 = vmatpush.msra.mxu0 %v3707_v46  ;;  %v1360_v46 = vperm.slane %v1353_v27, 1 }
 0x2a6   :  { %2003 = vmatpush.msra.mxu1 %v4522_v17  ;;  %2023 = vmatpush.msra.mxu2 %v3711_v48 }
 0x2a7   :  { %2043 = vmatpush.msra.mxu3 %v3717_v52  ;;  %1984 = vmatpush.msra.mxu0 %v3722_v54  ;;  %v1376_v52 = vsel %vm569_vm0, %v1359_v33, %v1368_v29 }
 0x2a8   :  { %2004 = vmatpush.msra.mxu1 %v3724_v55  ;;  %2024 = vmatpush.msra.mxu2 %v3726_v56  ;;  %v1389_v54 = vadd.f32 %v1381_v31, %v1376_v52  ;;  %v1377_v55 = vsel %vm569_vm0, %v1360_v46, %v1369_v32 }
 0x2a9   :  { %2044 = vmatpush.msra.mxu3 %v3732_v60  ;;  %1985 = vmatpush.msra.mxu0 %v3738_v63  ;;  %v1390_v60 = vadd.f32 %v1382_v37, %v1377_v55 }
 0x2aa   :  { %2005 = vmatpush.msra.mxu1 %v3740_v0  ;;  %2025 = vmatpush.msra.mxu2 %v3742_v1 }
 0x2ab   :  { %2045 = vmatpush.msra.mxu3 %v3746_v58  ;;  %1986 = vmatpush.msra.mxu0 %v3750_v6  ;;  %v1371_v58 = vperm.slane %v1355_v20, 3 }
 0x2ac   :  { %2006 = vmatpush.msra.mxu1 %v3752_v7  ;;  %2026 = vmatpush.msra.mxu2 %v3754_v8  ;;  %v1384_v7 = vperm.slane %v1357_v26, 3 }
 0x2ad   :  { %2046 = vmatpush.msra.mxu3 %v3759_v11  ;;  %1987 = vmatpush.msra.mxu0 %v3764_v34  ;;  %v1362_v11 = vperm.slane %v1353_v27, 3 }
 0x2ae   :  { %2007 = vmatpush.msra.mxu1 %v3766_v40  ;;  %2027 = vmatpush.msra.mxu2 %v3768_v44 }
 0x2af   :  { %2047 = vmatpush.msra.mxu3 %v3773_v51  ;;  %1988 = vmatpush.msra.mxu0 %v4503_v41  ;;  %v1379_v34 = vsel %vm569_vm0, %v1362_v11, %v1371_v58 }
 0x2b0   :  { %2008 = vmatpush.msra.mxu1 %v4504_v47  ;;  %2028 = vmatpush.msra.mxu2 %v4505_v30  ;;  %v1392_v40 = vadd.f32 %v1384_v7, %v1379_v34  ;;  %v1613_v7 = vld [vmem:[#allocation2 + $0x4] ss:$8 sm:$0xf] }
 0x2b1   :  { %2048 = vmatpush.msra.mxu3 %v4506_v23  ;;  %1989 = vmatpush.msra.mxu0 %v4507_v35 }
 0x2b2   :  { %2009 = vmatpush.msra.mxu1 %v4508_v43  ;;  %2029 = vmatpush.msra.mxu2 %v4509_v10 }
 0x2b3   :  { %2049 = vmatpush.msra.mxu3 %v4510_v9  ;;  %1990 = vmatpush.msra.mxu0 %v4511_v57 }
 0x2b4   :  { %2010 = vmatpush.msra.mxu1 %v4512_v49  ;;  %2030 = vmatpush.msra.mxu2 %v4513_v25 }
 0x2b5   :  { %2050 = vmatpush.msra.mxu3 %v3807_v28  ;;  %1991 = vmatpush.msra.mxu0 %v3811_v42  ;;  %v1370_v28 = vperm.slane %v1355_v20, 2 }
 0x2b6   :  { %2011 = vmatpush.msra.mxu1 %v3813_v61  ;;  %2031 = vmatpush.msra.mxu2 %v3817_v4 }
 0x2b7   :  { %2051 = vmatpush.msra.mxu3 %v3819_v2  ;;  %1992 = vmatpush.msra.mxu0 %v3823_v5  ;;  %v1383_v5 = vperm.slane %v1357_v26, 2 }
 0x2b8   :  { %2012 = vmatpush.msra.mxu1 %v3825_v45  ;;  %2032 = vmatpush.msra.mxu2 %v3831_v50  ;;  %v1361_v45 = vperm.slane %v1353_v27, 2 }
 0x2b9   :  { %2052 = vmatpush.msra.mxu3 %v4514_v38 }
 0x2ba   :  { %v1378_v41 = vsel %vm569_vm0, %v1361_v45, %v1370_v28 }
 0x2bb   :  { %v1391_v30 = vadd.f32 %v1383_v5, %v1378_v41 }
 0x309   :  { %v1345_v18 = vpop.permute.xlu1 %1344 }
 0x30a   :  { %v1347_v19 = vrot.slane %v1345_v18, 1  ;;  %1351 = vst [vmem:[%s4423_s8 + $0x3] sm:$0x4] %v1345_v18 }
 0x30c   :  { %v1349_v22 = vsel %vm572_vm13, %v3925_v24, %v1347_v19 }
 0x30d   :  { %1350 = vst [vmem:[%s4423_s8 + $0x4] sm:$0x1] %v1349_v22 }
 0x314   :  { %v1474_v56 = vpop.f32.mrf.mxu0 }
 0x315   :  { %v1537_v63 = vadd.f32 %v1474_v56, %v1389_v54  ;;  %v1494_v0 = vpop.f32.mrf.mxu1 }
 0x316   :  { %v1538_v1 = vadd.f32 %v1494_v0, %v1390_v60 }
 0x317   :  { %v2668_v6 = vmul.f32 -1.442695, %v1537_v63 }
 0x318   :  { %v2669_v8 = vmul.f32 -1.442695, %v1538_v1  ;;  %v1615_v1 = vld [vmem:[#allocation3 + $0x4] ss:$8 sm:$0xf] }
 0x319   :  { %2739 = vpow2.f32 %v2668_v6  ;;  %v1617_v6 = vld [vmem:[#allocation4 + $0x4] ss:$8 sm:$0xf]  ;;  %v1629_v34 = vperm.slane %v1615_v1, 1  ;;  %v1631_v41 = vperm.slane %v1615_v1, 3 }
 0x31a   :  { %2741 = vpow2.f32 %v2669_v8  ;;  %v1628_v8 = vperm.slane %v1615_v1, 0  ;;  %v1641_v11 = vperm.slane %v1617_v6, 0 }
 0x31b   :  { %v1514_v47 = vpop.f32.mrf.mxu2 }
 0x31c   :  { %v1534_v44 = vpop.f32.mrf.mxu3  ;;  %v1539_v35 = vadd.f32 %v1514_v47, %v1391_v30  ;;  %v1644_v30 = vperm.slane %v1617_v6, 3 }
 0x31d   :  { %v1540_v51 = vadd.f32 %v1534_v44, %v1392_v40  ;;  %v1619_v40 = vperm.slane %v1613_v7, 0  ;;  %v1642_v44 = vperm.slane %v1617_v6, 1 }
 0x31f   :  { %v2740_v61 = vpop.eup %2739  ;;  %v2670_v42 = vmul.f32 -1.442695, %v1540_v51  ;;  %v1620_v51 = vperm.slane %v1613_v7, 1 }
 0x320   :  { %v2742_v2 = vpop.eup %2741  ;;  %v1544_v4 = vadd.f32 1.0, %v2740_v61  ;;  %v1636_v61 = vsel %vm569_vm0, %v1619_v40, %v1628_v8 }
 0x321   :  { %v1563_v50 = vadd.f32 1.0, %v2742_v2  ;;  %2743 = vpow2.f32 %v2670_v42  ;;  %v1649_v42 = vadd.f32 %v1641_v11, %v1636_v61  ;;  %v1637_v2 = vsel %vm569_vm0, %v1620_v51, %v1629_v34 }
 0x322   :  { %2745 = vrcp.f32 %v1544_v4  ;;  %v1556_v49 = vand.u32 2147483648, %v1544_v4  ;;  %v1554_v38 = vand.u32 2147483647, %v1544_v4  ;;  %vm1550_vm11 = vweird.f32 %v1544_v4 }
 0x323   :  { %2747 = vrcp.f32 %v1563_v50  ;;  %v1575_v24 = vand.u32 2147483648, %v1563_v50  ;;  %v1573_v39 = vand.u32 2147483647, %v1563_v50  ;;  %vm1569_vm12 = vweird.f32 %v1563_v50 }
 0x324   :  { %v1557_v14 = vor.u32 1.1754944e-38, %v1556_v49  ;;  %vm1555_vm1 = vcmp.eq.f32.partialorder %v1554_v38, 8.507059e+37  ;;  %v1643_v38 = vperm.slane %v1617_v6, 2 }
 0x325   :  { %v1576_v16 = vor.u32 1.1754944e-38, %v1575_v24  ;;  %vm1574_vm2 = vcmp.eq.f32.partialorder %v1573_v39, 8.507059e+37 }
 0x327   :  { %v2744_v23 = vpop.eup %2743 }
 0x328   :  { %v2746_v12 = vpop.eup %2745  ;;  %v1583_v43 = vadd.f32 1.0, %v2744_v23 }
 0x329   :  { %v2748_v10 = vpop.eup %2747  ;;  %v1546_v9 = vmul.f32 %v2746_v12, %v1544_v4  ;;  %vm1551_vm9 = vweird.f32 %v2746_v12 }
 0x32a   :  { %v1565_v62 = vmul.f32 %v2748_v10, %v1563_v50  ;;  %2749 = vrcp.f32 %v1583_v43  ;;  %vm1570_vm10 = vweird.f32 %v2748_v10  ;;  %vm1552_vm14 = vmor %vm1550_vm11, %vm1551_vm9  ;;  %v1595_v46 = vand.u32 2147483648, %v1583_v43 }
 0x32b   :  { %v1547_v53 = vsub.f32 1.0, %v1546_v9  ;;  %2751 = vtanh.f32 %v1539_v35  ;;  %vm1571_vm15 = vmor %vm1569_vm12, %vm1570_vm10  ;;  %vm1589_vm4 = vweird.f32 %v1583_v43  ;;  %v1593_v52 = vand.u32 2147483647, %v1583_v43 }
 0x32c   :  { %v1566_v57 = vsub.f32 1.0, %v1565_v62  ;;  %v1596_v55 = vor.u32 1.1754944e-38, %v1595_v46  ;;  %v1650_v50 = vadd.f32 %v1642_v44, %v1637_v2 }
 0x32d   :  { %v1548_v25 = vmul.f32 %v2746_v12, %v1547_v53  ;;  %vm1594_vm6 = vcmp.eq.f32.partialorder %v1593_v52, 8.507059e+37 }
 0x32e   :  { %v1567_v3 = vmul.f32 %v2748_v10, %v1566_v57 }
 0x32f   :  { %v1549_v59 = vadd.f32 %v2746_v12, %v1548_v25  ;;  %v1630_v25 = vperm.slane %v1615_v1, 2 }
 0x330   :  { %v2750_v13 = vpop.eup %2749  ;;  %v1568_v15 = vadd.f32 %v2748_v10, %v1567_v3  ;;  %v1621_v3 = vperm.slane %v1613_v7, 2 }
 0x331   :  { %v1553_v17 = vsel %vm1552_vm14, %v2746_v12, %v1549_v59  ;;  %v1585_v18 = vmul.f32 %v2750_v13, %v1583_v43  ;;  %v2752_v19 = vpop.eup %2751  ;;  %vm1590_vm3 = vweird.f32 %v2750_v13  ;;  %v1622_v12 = vperm.slane %v1613_v7, 3 }
 0x332   :  { %v1558_v20 = vsel %vm1555_vm1, %v1557_v14, %v1553_v17  ;;  %v1572_v22 = vsel %vm1571_vm15, %v2748_v10, %v1568_v15  ;;  %vm1591_vm5 = vmor %vm1589_vm4, %vm1590_vm3  ;;  %v1638_v39 = vsel %vm569_vm0, %v1621_v3, %v1630_v25  ;;  %v4093_v25 = vld [vmem:[#allocation9 + $0x1b0] sm:$0xff] }
 0x333   :  { %v1577_v26 = vsel %vm1574_vm2, %v1576_v16, %v1572_v22  ;;  %v1600_v27 = vmul.f32 %v2752_v19, %v1558_v20  ;;  %v1586_v29 = vsub.f32 1.0, %v1585_v18  ;;  %v1639_v35 = vsel %vm569_vm0, %v1622_v12, %v1631_v41  ;;  %v4058_v41 = vld [vmem:[#allocation3 + $0x5] ss:$8 sm:$0xf] }
 0x334   :  { %v1599_v31 = vmul.f32 %v1577_v26, %v3901_v36  ;;  %v1652_v43 = vadd.f32 %v1644_v30, %v1639_v35  ;;  %v4062_v30 = vld [vmem:[#allocation9 + $0x1e8] sm:$0xff]  ;;  %v4070_v35 = vld [vmem:[#allocation9 + $0x1f8] sm:$0xff]  ;;  %v1889_v3 = vperm.slane %v4058_v41, 1 }
 0x335   :  { %v1587_v32 = vmul.f32 %v2750_v13, %v1586_v29  ;;  %v4066_v12 = vld [vmem:[#allocation4 + $0x5] ss:$8 sm:$0xf] }
 0x336   :  { %v4025_v33 = vadd.f32 %v1600_v27, %v1599_v31 }
 0x337   :  { %v1588_v37 = vadd.f32 %v2750_v13, %v1587_v32 }
 0x338   :  { %2753 = vtanh.f32 %v4025_v33 }
 0x339   :  { %v1592_v54 = vsel %vm1591_vm5, %v2750_v13, %v1588_v37  ;;  %v1651_v13 = vadd.f32 %v1643_v38, %v1638_v39  ;;  %v1901_v38 = vperm.slane %v4066_v12, 0  ;;  %v4099_v39 = vld [vmem:[#allocation9 + $0x1b8] sm:$0xff] }
 0x33a   :  { %v1597_v60 = vsel %vm1594_vm6, %v1596_v55, %v1592_v54 }
 0x33e   :  { %v2754_v56 = vpop.eup %2753 }
 0x33f   :  { %v1603_v63 = vmul.f32 %v2754_v56, %v1597_v60 }
 0x341   :  { %1604 = vrot.lane.b32.xlu1 %v1603_v63, %s2928_s6  ;;  %1733 = vmatmul.f32.vlgmr.msrb.gmra.mxu0 %v1603_v63 }
 0x342   :  { %1753 = vmatmul.f32.vlgmr.msrb.gmra.mxu1 %v1603_v63  ;;  %1773 = vmatmul.f32.vlgmr.msrb.gmra.mxu2 %v1603_v63 }
 0x343   :  { %1793 = vmatmul.f32.vlgmr.msrb.gmra.mxu3 %v1603_v63  ;;  %2257 = vmatpush.msrb.mxu1 %v4062_v30 }
 0x344   :  { %2297 = vmatpush.msrb.mxu3 %v4070_v35 }
 0x3b3   :  { %v1605_v36 = vpop.permute.xlu1 %1604 }
 0x3b4   :  { %v1607_v0 = vrot.slane %v1605_v36, 1  ;;  %1611 = vst [vmem:[%s4423_s8 + $0x5] sm:$0x4] %v1605_v36 }
 0x3b6   :  { %v1609_v58 = vsel %vm572_vm13, %v1603_v63, %v1607_v0 }
 0x3b7   :  { %1610 = vst [vmem:[%s4423_s8 + $0x6] sm:$0x1] %v1609_v58 }
 0x3be   :  { %v1734_v4 = vpop.f32.mrf.mxu0 }
 0x3bf   :  { %v1797_v28 = vadd.f32 %v1734_v4, %v1649_v42  ;;  %v1754_v5 = vpop.f32.mrf.mxu1 }
 0x3c0   :  { %v1798_v45 = vadd.f32 %v1754_v5, %v1650_v50 }
 0x3c1   :  { %v2671_v47 = vmul.f32 -1.442695, %v1797_v28 }
 0x3c2   :  { %v2672_v23 = vmul.f32 -1.442695, %v1798_v45 }
 0x3c3   :  { %2755 = vpow2.f32 %v2671_v47  ;;  %v4060_v47 = vld [vmem:[#allocation9 + $0x1e0] sm:$0xff] }
 0x3c4   :  { %2757 = vpow2.f32 %v2672_v23  ;;  %v4064_v23 = vld [vmem:[#allocation9 + $0x1f0] sm:$0xff]  ;;  %2237 = vmatpush.msrb.mxu0 %v4060_v47 }
 0x3c5   :  { %v1774_v59 = vpop.f32.mrf.mxu2  ;;  %2277 = vmatpush.msrb.mxu2 %v4064_v23 }
 0x3c6   :  { %v1794_v10 = vpop.f32.mrf.mxu3  ;;  %v1799_v16 = vadd.f32 %v1774_v59, %v1651_v13  ;;  %v1902_v13 = vperm.slane %v4066_v12, 1 }
 0x3c7   :  { %v1800_v9 = vadd.f32 %v1794_v10, %v1652_v43  ;;  %v4074_v43 = vld [vmem:[#allocation9 + $0x1c0] sm:$0xff]  ;;  %v4076_v10 = vld [vmem:[#allocation9 + $0x1c8] sm:$0xff] }
 0x3c8   :  { %2238 = vmatpush.msrb.mxu0 %v4074_v43  ;;  %2258 = vmatpush.msrb.mxu1 %v4076_v10 }
 0x3c9   :  { %v2756_v62 = vpop.eup %2755  ;;  %v2673_v53 = vmul.f32 -1.442695, %v1800_v9  ;;  %v4078_v9 = vld [vmem:[#allocation9 + $0x1d0] sm:$0xff] }
 0x3ca   :  { %v2758_v57 = vpop.eup %2757  ;;  %v1804_v49 = vadd.f32 1.0, %v2756_v62  ;;  %v4080_v62 = vld [vmem:[#allocation2 + $0x5] ss:$8 sm:$0xf]  ;;  %2278 = vmatpush.msrb.mxu2 %v4078_v9 }
 0x3cb   :  { %v1823_v24 = vadd.f32 1.0, %v2758_v57  ;;  %2759 = vpow2.f32 %v2673_v53  ;;  %v4084_v53 = vld [vmem:[#allocation9 + $0x1d8] sm:$0xff]  ;;  %v1888_v57 = vperm.slane %v4058_v41, 0  ;;  %v1879_v59 = vperm.slane %v4080_v62, 0 }
 0x3cc   :  { %2761 = vrcp.f32 %v1804_v49  ;;  %v1816_v27 = vand.u32 2147483648, %v1804_v49  ;;  %v1814_v32 = vand.u32 2147483647, %v1804_v49  ;;  %vm1810_vm9 = vweird.f32 %v1804_v49  ;;  %2298 = vmatpush.msrb.mxu3 %v4084_v53  ;;  %2279 = vmatpush.msrb.mxu2 %v4093_v25 }
 0x3cd   :  { %2763 = vrcp.f32 %v1823_v24  ;;  %v1835_v29 = vand.u32 2147483648, %v1823_v24  ;;  %v1833_v46 = vand.u32 2147483647, %v1823_v24  ;;  %vm1829_vm10 = vweird.f32 %v1823_v24 }
 0x3ce   :  { %v1817_v55 = vor.u32 1.1754944e-38, %v1816_v27  ;;  %vm1815_vm14 = vcmp.eq.f32.partialorder %v1814_v32, 8.507059e+37  ;;  %2299 = vmatpush.msrb.mxu3 %v4099_v39 }
 0x3cf   :  { %v1836_v60 = vor.u32 1.1754944e-38, %v1835_v29  ;;  %vm1834_vm15 = vcmp.eq.f32.partialorder %v1833_v46, 8.507059e+37  ;;  %v4134_v46 = vld [vmem:[#allocation9 + $0x140] sm:$0xff] }
 0x3d1   :  { %v2760_v14 = vpop.eup %2759 }
 0x3d2   :  { %v2762_v15 = vpop.eup %2761  ;;  %v1843_v17 = vadd.f32 1.0, %v2760_v14  ;;  %v4105_v14 = vld [vmem:[#allocation9 + $0x180] sm:$0xff] }
 0x3d3   :  { %v2764_v18 = vpop.eup %2763  ;;  %v1806_v19 = vmul.f32 %v2762_v15, %v1804_v49  ;;  %vm1811_vm7 = vweird.f32 %v2762_v15  ;;  %v4089_v49 = vld [vmem:[#allocation9 + $0x1a0] sm:$0xff] }
 0x3d4   :  { %v1825_v20 = vmul.f32 %v2764_v18, %v1823_v24  ;;  %2765 = vrcp.f32 %v1843_v17  ;;  %vm1830_vm8 = vweird.f32 %v2764_v18  ;;  %vm1812_vm11 = vmor %vm1810_vm9, %vm1811_vm7  ;;  %v1855_v51 = vand.u32 2147483648, %v1843_v17  ;;  %v4091_v24 = vld [vmem:[#allocation9 + $0x1a8] sm:$0xff]  ;;  %2239 = vmatpush.msrb.mxu0 %v4089_v49 }
 0x3d5   :  { %v1807_v22 = vsub.f32 1.0, %v1806_v19  ;;  %2767 = vtanh.f32 %v1799_v16  ;;  %vm1831_vm12 = vmor %vm1829_vm10, %vm1830_vm8  ;;  %vm1849_vm2 = vweird.f32 %v1843_v17  ;;  %v1853_v61 = vand.u32 2147483647, %v1843_v17  ;;  %2259 = vmatpush.msrb.mxu1 %v4091_v24  ;;  %v4109_v16 = vld [vmem:[#allocation9 + $0x190] sm:$0xff] }
 0x3d6   :  { %v1826_v26 = vsub.f32 1.0, %v1825_v20  ;;  %v1856_v2 = vor.u32 1.1754944e-38, %v1855_v51  ;;  %2240 = vmatpush.msrb.mxu0 %v4105_v14  ;;  %v1896_v19 = vsel %vm569_vm0, %v1879_v59, %v1888_v57  ;;  %2280 = vmatpush.msrb.mxu2 %v4109_v16  ;;  %v4120_v20 = vld [vmem:[#allocation9 + $0x160] sm:$0xff]  ;;  %v4163_v51 = vld [vmem:[#allocation9 + $0x108] sm:$0xff] }
 0x3d7   :  { %v1808_v31 = vmul.f32 %v2762_v15, %v1807_v22  ;;  %vm1854_vm4 = vcmp.eq.f32.partialorder %v1853_v61, 8.507059e+37  ;;  %v4122_v22 = vld [vmem:[#allocation9 + $0x168] sm:$0xff]  ;;  %v1909_v27 = vadd.f32 %v1901_v38, %v1896_v19  ;;  %v4165_v61 = vld [vmem:[#allocation9 + $0x110] sm:$0xff] }
 0x3d8   :  { %v1827_v37 = vmul.f32 %v2764_v18, %v1826_v26  ;;  %v4124_v26 = vld [vmem:[#allocation9 + $0x170] sm:$0xff]  ;;  %2241 = vmatpush.msrb.mxu0 %v4120_v20  ;;  %v4187_v57 = vld [vmem:[#allocation9 + $0xc8] sm:$0xff] }
 0x3d9   :  { %v1809_v52 = vadd.f32 %v2762_v15, %v1808_v31  ;;  %v4130_v31 = vld [vmem:[#allocation9 + $0x178] sm:$0xff]  ;;  %2281 = vmatpush.msrb.mxu2 %v4124_v26  ;;  %v4189_v38 = vld [vmem:[#allocation9 + $0xd0] sm:$0xff] }
 0x3da   :  { %v2766_v54 = vpop.eup %2765  ;;  %v1828_v56 = vadd.f32 %v2764_v18, %v1827_v37  ;;  %2242 = vmatpush.msrb.mxu0 %v4134_v46 }
 0x3db   :  { %v1813_v63 = vsel %vm1812_vm11, %v2762_v15, %v1809_v52  ;;  %v1845_v36 = vmul.f32 %v2766_v54, %v1843_v17  ;;  %v2768_v0 = vpop.eup %2767  ;;  %vm1850_vm1 = vweird.f32 %v2766_v54  ;;  %v4107_v15 = vld [vmem:[#allocation9 + $0x188] sm:$0xff]  ;;  %v1880_v17 = vperm.slane %v4080_v62, 1 }
 0x3dc   :  { %v1818_v1 = vsel %vm1815_vm14, %v1817_v55, %v1813_v63  ;;  %v1832_v58 = vsel %vm1831_vm12, %v2764_v18, %v1828_v56  ;;  %vm1851_vm3 = vmor %vm1849_vm2, %vm1850_vm1  ;;  %2260 = vmatpush.msrb.mxu1 %v4107_v15  ;;  %v4114_v18 = vld [vmem:[#allocation9 + $0x198] sm:$0xff]  ;;  %v4136_v52 = vld [vmem:[#allocation9 + $0x148] sm:$0xff] }
 0x3dd   :  { %v1837_v6 = vsel %vm1834_vm15, %v1836_v60, %v1832_v58  ;;  %v1860_v7 = vmul.f32 %v2768_v0, %v1818_v1  ;;  %v1846_v8 = vsub.f32 1.0, %v1845_v36  ;;  %2300 = vmatpush.msrb.mxu3 %v4114_v18  ;;  %v1897_v29 = vsel %vm569_vm0, %v1880_v17, %v1889_v3  ;;  %v4142_v60 = vld [vmem:[#allocation9 + $0x158] sm:$0xff]  ;;  %v4147_v0 = vld [vmem:[#allocation9 + $0x120] sm:$0xff]  ;;  %v4149_v1 = vld [vmem:[#allocation9 + $0x128] sm:$0xff] }
 0x3de   :  { %v1859_v11 = vmul.f32 %v1837_v6, %v4025_v33  ;;  %2261 = vmatpush.msrb.mxu1 %v4122_v22  ;;  %v1910_v37 = vadd.f32 %v1902_v13, %v1897_v29  ;;  %v1891_v36 = vperm.slane %v4058_v41, 3  ;;  %v4151_v58 = vld [vmem:[#allocation9 + $0x130] sm:$0xff]  ;;  %2243 = vmatpush.msrb.mxu0 %v4147_v0  ;;  %v4191_v3 = vld [vmem:[#allocation9 + $0xd8] sm:$0xff]  ;;  %v4195_v13 = vld [vmem:[#allocation9 + $0xa0] sm:$0xff] }
 0x3df   :  { %v1847_v34 = vmul.f32 %v2766_v54, %v1846_v8  ;;  %2301 = vmatpush.msrb.mxu3 %v4130_v31  ;;  %v4156_v8 = vld [vmem:[#allocation9 + $0x138] sm:$0xff]  ;;  %v4197_v17 = vld [vmem:[#allocation9 + $0xa8] sm:$0xff] }
 0x3e0   :  { %v4046_v40 = vadd.f32 %v1860_v7, %v1859_v11  ;;  %2262 = vmatpush.msrb.mxu1 %v4136_v52  ;;  %v1904_v7 = vperm.slane %v4066_v12, 3  ;;  %v4203_v29 = vld [vmem:[#allocation9 + $0xb8] sm:$0xff] }
 0x3e1   :  { %v1848_v44 = vadd.f32 %v2766_v54, %v1847_v34  ;;  %2302 = vmatpush.msrb.mxu3 %v4142_v60  ;;  %v1882_v34 = vperm.slane %v4080_v62, 3 }
 0x3e2   :  { %2769 = vtanh.f32 %v4046_v40  ;;  %2263 = vmatpush.msrb.mxu1 %v4149_v1 }
 0x3e3   :  { %v1852_v42 = vsel %vm1851_vm3, %v2766_v54, %v1848_v44  ;;  %v4138_v54 = vld [vmem:[#allocation9 + $0x150] sm:$0xff]  ;;  %2303 = vmatpush.msrb.mxu3 %v4156_v8  ;;  %v4161_v44 = vld [vmem:[#allocation9 + $0x100] sm:$0xff] }
 0x3e4   :  { %v1857_v50 = vsel %vm1854_vm4, %v1856_v2, %v1852_v42  ;;  %2282 = vmatpush.msrb.mxu2 %v4138_v54  ;;  %2244 = vmatpush.msrb.mxu0 %v4161_v44  ;;  %v4169_v42 = vld [vmem:[#allocation9 + $0x118] sm:$0xff]  ;;  %v4171_v2 = vld [vmem:[#allocation9 + $0xe0] sm:$0xff] }
 0x3e5   :  { %2264 = vmatpush.msrb.mxu1 %v4163_v51  ;;  %2304 = vmatpush.msrb.mxu3 %v4169_v42 }
 0x3e6   :  { %2283 = vmatpush.msrb.mxu2 %v4151_v58  ;;  %2245 = vmatpush.msrb.mxu0 %v4171_v2 }
 0x3e8   :  { %v2770_v4 = vpop.eup %2769  ;;  %2284 = vmatpush.msrb.mxu2 %v4165_v61 }
 0x3e9   :  { %v1863_v28 = vmul.f32 %v2770_v4, %v1857_v50  ;;  %v4173_v4 = vld [vmem:[#allocation9 + $0xe8] sm:$0xff]  ;;  %v1899_v50 = vsel %vm569_vm0, %v1882_v34, %v1891_v36  ;;  %v4215_v36 = vld [vmem:[#allocation9 + $0x98] sm:$0xff] }
 0x3ea   :  { %2265 = vmatpush.msrb.mxu1 %v4173_v4  ;;  %4528 = vst [vmem:[#allocation28_spill] sm:$0xff] %v4215_v36  ;;  %v4223_v34 = vld [vmem:[#allocation9 + $0x68] sm:$0xff] }
 0x3eb   :  { %1864 = vrot.lane.b32.xlu2 %v1863_v28, %s2928_s6  ;;  %1993 = vmatmul.f32.vlgmr.msra.gmra.mxu0 %v1863_v28  ;;  %4530 = vst [vmem:[#allocation30_spill] sm:$0xff] %v4223_v34 }
 0x3ec   :  { %2013 = vmatmul.f32.vlgmr.msra.gmra.mxu1 %v1863_v28  ;;  %2033 = vmatmul.f32.vlgmr.msra.gmra.mxu2 %v1863_v28 }
 0x3ed   :  { %2053 = vmatmul.f32.vlgmr.msra.gmra.mxu3 %v1863_v28  ;;  %2266 = vmatpush.msrb.mxu1 %v4187_v57 }
 0x3ef   :  { %2267 = vmatpush.msrb.mxu1 %v4197_v17 }
 0x445   :  { %v1865_v33 = vpop.permute.xlu2 %1864 }
 0x446   :  { %v1867_v5 = vrot.slane %v1865_v33, 1  ;;  %1871 = vst [vmem:[%s4423_s8 + $0x7] sm:$0x4] %v1865_v33  ;;  %v4181_v33 = vld [vmem:[#allocation9 + $0xf8] sm:$0xff] }
 0x447   :  { %2305 = vmatpush.msrb.mxu3 %v4181_v33 }
 0x448   :  { %v1869_v45 = vsel %vm572_vm13, %v1863_v28, %v1867_v5  ;;  %v4179_v28 = vld [vmem:[#allocation9 + $0xf0] sm:$0xff]  ;;  %v4183_v5 = vld [vmem:[#allocation9 + $0xc0] sm:$0xff] }
 0x449   :  { %1870 = vst [vmem:[%s4423_s8 + $0x8] sm:$0x1] %v1869_v45  ;;  %v1912_v45 = vadd.f32 %v1904_v7, %v1899_v50  ;;  %2285 = vmatpush.msrb.mxu2 %v4179_v28  ;;  %2246 = vmatpush.msrb.mxu0 %v4183_v5 }
 0x44a   :  { %2306 = vmatpush.msrb.mxu3 %v4191_v3 }
 0x44b   :  { %2286 = vmatpush.msrb.mxu2 %v4189_v38  ;;  %2247 = vmatpush.msrb.mxu0 %v4195_v13 }
 0x44c   :  { %2307 = vmatpush.msrb.mxu3 %v4203_v29 }
 0x44e   :  { %2308 = vmatpush.msrb.mxu3 %v4215_v36  ;;  %v4254_v36 = vld [vmem:[#allocation9 + $0x28] sm:$0xff] }
 0x44f   :  { %4536 = vst [vmem:[#allocation36_spill] sm:$0xff] %v4254_v36 }
 0x468   :  { %v1994_v32 = vpop.f32.mrf.mxu0 }
 0x469   :  { %v2057_v55 = vadd.f32 %v1994_v32, %v1909_v27  ;;  %v2014_v56 = vpop.f32.mrf.mxu1  ;;  %v4201_v27 = vld [vmem:[#allocation9 + $0xb0] sm:$0xff]  ;;  %v4207_v32 = vld [vmem:[#allocation9 + $0x80] sm:$0xff] }
 0x46a   :  { %v2058_v63 = vadd.f32 %v2014_v56, %v1910_v37  ;;  %4525 = vst [vmem:[#allocation25_spill] sm:$0xff] %v4207_v32  ;;  %v4209_v37 = vld [vmem:[#allocation9 + $0x88] sm:$0xff]  ;;  %2287 = vmatpush.msrb.mxu2 %v4201_v27  ;;  %2248 = vmatpush.msrb.mxu0 %v4207_v32 }
 0x46b   :  { %v2674_v6 = vmul.f32 -1.442695, %v2057_v55  ;;  %4526 = vst [vmem:[#allocation26_spill] sm:$0xff] %v4209_v37  ;;  %2268 = vmatpush.msrb.mxu1 %v4209_v37  ;;  %v4248_v37 = vld [vmem:[#allocation9 + $0x58] sm:$0xff] }
 0x46c   :  { %v2675_v11 = vmul.f32 -1.442695, %v2058_v63  ;;  %v4213_v63 = vld [vmem:[#allocation9 + $0x90] sm:$0xff]  ;;  %4535 = vst [vmem:[#allocation35_spill] sm:$0xff] %v4248_v37 }
 0x46d   :  { %2771 = vpow2.f32 %v2674_v6  ;;  %4527 = vst [vmem:[#allocation27_spill] sm:$0xff] %v4213_v63  ;;  %2288 = vmatpush.msrb.mxu2 %v4213_v63  ;;  %2269 = vmatpush.msrb.mxu1 %v4223_v34  ;;  %v4260_v34 = vld [vmem:[#allocation9 + $0x30] sm:$0xff] }
 0x46e   :  { %2773 = vpow2.f32 %v2675_v11  ;;  %v4221_v11 = vld [vmem:[#allocation9 + $0x60] sm:$0xff] }
 0x46f   :  { %4529 = vst [vmem:[#allocation29_spill] sm:$0xff] %v4221_v11  ;;  %2249 = vmatpush.msrb.mxu0 %v4221_v11  ;;  %v4262_v11 = vld [vmem:[#allocation9 + $0x38] sm:$0xff] }
 0x470   :  { %v2054_v59 = vpop.f32.mrf.mxu3 }
 0x471   :  { %v2060_v19 = vadd.f32 %v2054_v59, %v1912_v45  ;;  %v1890_v45 = vperm.slane %v4058_v41, 2  ;;  %v4230_v59 = vld [vmem:[#allocation9 + $0x70] sm:$0xff]  ;;  %v4240_v41 = vld [vmem:[#allocation9 + $0x48] sm:$0xff] }
 0x472   :  { %4531 = vst [vmem:[#allocation31_spill] sm:$0xff] %v4230_v59  ;;  %2289 = vmatpush.msrb.mxu2 %v4230_v59  ;;  %2270 = vmatpush.msrb.mxu1 %v4240_v41  ;;  %v4268_v59 = vld [vmem:[#allocation9 + $0x8] sm:$0xff] }
 0x473   :  { %v2772_v55 = vpop.eup %2771  ;;  %v2676_v56 = vmul.f32 -1.442695, %v2060_v19  ;;  %v4232_v19 = vld [vmem:[#allocation9 + $0x78] sm:$0xff]  ;;  %4534 = vst [vmem:[#allocation34_spill] sm:$0xff] %v4240_v41 }
 0x474   :  { %v2774_v6 = vpop.eup %2773  ;;  %v4217_v7 = vadd.f32 1.0, %v2772_v55  ;;  %4532 = vst [vmem:[#allocation32_spill] sm:$0xff] %v4232_v19  ;;  %v1903_v55 = vperm.slane %v4066_v12, 2  ;;  %2309 = vmatpush.msrb.mxu3 %v4232_v19  ;;  %v4252_v12 = vld [vmem:[#allocation9 + $0x20] sm:$0xff]  ;;  %2290 = vmatpush.msrb.mxu2 %v4246_v21 }
 0x475   :  { %v4225_v50 = vadd.f32 1.0, %v2774_v6  ;;  %2775 = vpow2.f32 %v2676_v56  ;;  %v4238_v6 = vld [vmem:[#allocation9 + $0x40] sm:$0xff]  ;;  %v1881_v56 = vperm.slane %v4080_v62, 2  ;;  %v2034_v62 = vpop.f32.mrf.mxu2  ;;  %4538 = vst [vmem:[#allocation18_spill] sm:$0xff] %v4268_v59  ;;  %2271 = vmatpush.msrb.mxu1 %v4254_v36 }
 0x476   :  { %2777 = vrcp.f32 %v4217_v7  ;;  %4533 = vst [vmem:[#allocation33_spill] sm:$0xff] %v4238_v6  ;;  %2250 = vmatpush.msrb.mxu0 %v4238_v6  ;;  %2310 = vmatpush.msrb.mxu3 %v4248_v37  ;;  %v4266_v19 = vld [vmem:[#allocation9] sm:$0xff]  ;;  %vm2070_vm7 = vweird.f32 %v4217_v7 }
 0x477   :  { %2779 = vrcp.f32 %v4225_v50  ;;  %v1898_v63 = vsel %vm569_vm0, %v1881_v56, %v1890_v45  ;;  %4537 = vst [vmem:[#allocation17_spill] sm:$0xff] %v4266_v19  ;;  %v4272_v45 = vld [vmem:[#allocation9 + $0x10] sm:$0xff]  ;;  %v4274_v56 = vld [vmem:[#allocation9 + $0x18] sm:$0xff]  ;;  %2291 = vmatpush.msrb.mxu2 %v4260_v34  ;;  %2272 = vmatpush.msrb.mxu1 %v4268_v59  ;;  %v2095_v59 = vand.u32 2147483648, %v4225_v50  ;;  %vm2089_vm8 = vweird.f32 %v4225_v50 }
 0x478   :  { %v1911_v32 = vadd.f32 %v1903_v55, %v1898_v63  ;;  %2251 = vmatpush.msrb.mxu0 %v4252_v12  ;;  %4539 = vst [vmem:[#allocation19_spill] sm:$0xff] %v4272_v45  ;;  %2311 = vmatpush.msrb.mxu3 %v4262_v11 }
 0x479   :  { %2292 = vmatpush.msrb.mxu2 %v4272_v45  ;;  %2517 = vmatpush.msra.mxu1 %v4062_v30  ;;  %v2074_v45 = vand.u32 2147483647, %v4217_v7  ;;  %v2093_v30 = vand.u32 2147483647, %v4225_v50 }
 0x47a   :  { %v2059_v6 = vadd.f32 %v2034_v62, %v1911_v32  ;;  %2252 = vmatpush.msrb.mxu0 %v4266_v19  ;;  %2312 = vmatpush.msrb.mxu3 %v4274_v56  ;;  %v2076_v62 = vand.u32 2147483648, %v4217_v7 }
 0x47b   :  { %v2776_v48 = vpop.eup %2775  ;;  %2537 = vmatpush.msra.mxu2 %v4064_v23  ;;  %2518 = vmatpush.msra.mxu1 %v4076_v10  ;;  %vm2075_vm11 = vcmp.eq.f32.partialorder %v2074_v45, 8.507059e+37  ;;  %vm2094_vm12 = vcmp.eq.f32.partialorder %v2093_v30, 8.507059e+37 }
 0x47c   :  { %v2778_v41 = vpop.eup %2777  ;;  %v4276_v63 = vadd.f32 1.0, %v2776_v48  ;;  %2497 = vmatpush.msra.mxu0 %v4060_v47  ;;  %2557 = vmatpush.msra.mxu3 %v4070_v35 }
 0x47d   :  { %v2780_v55 = vpop.eup %2779  ;;  %v2066_v37 = vmul.f32 %v2778_v41, %v4217_v7  ;;  %vm2071_vm5 = vweird.f32 %v2778_v41  ;;  %2538 = vmatpush.msra.mxu2 %v4078_v9  ;;  %2519 = vmatpush.msra.mxu1 %v4091_v24  ;;  %v2096_v9 = vor.u32 1.1754944e-38, %v2095_v59 }
 0x47e   :  { %v2085_v36 = vmul.f32 %v2780_v55, %v4225_v50  ;;  %2781 = vrcp.f32 %v4276_v63  ;;  %2498 = vmatpush.msra.mxu0 %v4074_v43  ;;  %vm2090_vm6 = vweird.f32 %v2780_v55  ;;  %2558 = vmatpush.msra.mxu3 %v4084_v53  ;;  %vm2072_vm9 = vmor %vm2070_vm7, %vm2071_vm5  ;;  %v2077_v43 = vor.u32 1.1754944e-38, %v2076_v62 }
 0x47f   :  { %v2067_v48 = vsub.f32 1.0, %v2066_v37  ;;  %2783 = vtanh.f32 %v2059_v6  ;;  %2539 = vmatpush.msra.mxu2 %v4093_v25  ;;  %vm2091_vm10 = vmor %vm2089_vm8, %vm2090_vm6  ;;  %2520 = vmatpush.msra.mxu1 %v4107_v15  ;;  %vm2109_vm15 = vweird.f32 %v4276_v63 }
 0x480   :  { %v2086_v32 = vsub.f32 1.0, %v2085_v36  ;;  %2499 = vmatpush.msra.mxu0 %v4089_v49  ;;  %2559 = vmatpush.msra.mxu3 %v4099_v39 }
 0x481   :  { %v2068_v19 = vmul.f32 %v2778_v41, %v2067_v48  ;;  %2540 = vmatpush.msra.mxu2 %v4109_v16  ;;  %2521 = vmatpush.msra.mxu1 %v4122_v22 }
 0x482   :  { %v2087_v47 = vmul.f32 %v2780_v55, %v2086_v32  ;;  %2500 = vmatpush.msra.mxu0 %v4105_v14  ;;  %2560 = vmatpush.msra.mxu3 %v4114_v18  ;;  %v2113_v18 = vand.u32 2147483647, %v4276_v63 }
 0x483   :  { %v2069_v23 = vadd.f32 %v2778_v41, %v2068_v19  ;;  %2541 = vmatpush.msra.mxu2 %v4124_v26  ;;  %2522 = vmatpush.msra.mxu1 %v4136_v52  ;;  %v4540_v52 = vld [vmem:[#allocation25_spill] sm:$0xff] }
 0x484   :  { %v2782_v35 = vpop.eup %2781  ;;  %v2088_v10 = vadd.f32 %v2780_v55, %v2087_v47  ;;  %2501 = vmatpush.msra.mxu0 %v4120_v20  ;;  %2561 = vmatpush.msra.mxu3 %v4130_v31  ;;  %vm2114_vm2 = vcmp.eq.f32.partialorder %v2113_v18, 8.507059e+37 }
 0x485   :  { %v2073_v53 = vsel %vm2072_vm9, %v2778_v41, %v2069_v23  ;;  %v2105_v49 = vmul.f32 %v2782_v35, %v4276_v63  ;;  %v2784_v24 = vpop.eup %2783  ;;  %2542 = vmatpush.msra.mxu2 %v4138_v54  ;;  %vm2110_vm14 = vweird.f32 %v2782_v35  ;;  %2523 = vmatpush.msra.mxu1 %v4149_v1  ;;  %v4541_v54 = vld [vmem:[#allocation26_spill] sm:$0xff]  ;;  %v4544_v1 = vld [vmem:[#allocation29_spill] sm:$0xff] }
 0x486   :  { %v2078_v37 = vsel %vm2075_vm11, %v2077_v43, %v2073_v53  ;;  %v2092_v36 = vsel %vm2091_vm10, %v2780_v55, %v2088_v10  ;;  %2502 = vmatpush.msra.mxu0 %v4134_v46  ;;  %2562 = vmatpush.msra.mxu3 %v4142_v60  ;;  %vm2111_vm1 = vmor %vm2109_vm15, %vm2110_vm14  ;;  %v4542_v60 = vld [vmem:[#allocation27_spill] sm:$0xff] }
 0x487   :  { %v2097_v25 = vsel %vm2094_vm12, %v2096_v9, %v2092_v36  ;;  %v2120_v39 = vmul.f32 %v2784_v24, %v2078_v37  ;;  %v2106_v7 = vsub.f32 1.0, %v2105_v49  ;;  %2543 = vmatpush.msra.mxu2 %v4151_v58  ;;  %2524 = vmatpush.msra.mxu1 %v4163_v51  ;;  %v4545_v58 = vld [vmem:[#allocation30_spill] sm:$0xff]  ;;  %v4548_v51 = vld [vmem:[#allocation33_spill] sm:$0xff] }
 0x488   :  { %v2119_v50 = vmul.f32 %v2097_v25, %v4046_v40  ;;  %2503 = vmatpush.msra.mxu0 %v4147_v0  ;;  %v2115_v40 = vand.u32 2147483648, %v4276_v63  ;;  %2563 = vmatpush.msra.mxu3 %v4156_v8  ;;  %v4543_v0 = vld [vmem:[#allocation28_spill] sm:$0xff]  ;;  %v4546_v8 = vld [vmem:[#allocation31_spill] sm:$0xff] }
 0x489   :  { %v2107_v14 = vmul.f32 %v2782_v35, %v2106_v7  ;;  %2544 = vmatpush.msra.mxu2 %v4165_v61  ;;  %2525 = vmatpush.msra.mxu1 %v4173_v4  ;;  %v4549_v61 = vld [vmem:[#allocation34_spill] sm:$0xff]  ;;  %v4552_v4 = vld [vmem:[#allocation17_spill] sm:$0xff] }
 0x48a   :  { %v4319_v15 = vadd.f32 %v2120_v39, %v2119_v50  ;;  %2504 = vmatpush.msra.mxu0 %v4161_v44  ;;  %2564 = vmatpush.msra.mxu3 %v4169_v42  ;;  %v2116_v22 = vor.u32 1.1754944e-38, %v2115_v40  ;;  %v4547_v44 = vld [vmem:[#allocation32_spill] sm:$0xff]  ;;  %v4550_v42 = vld [vmem:[#allocation35_spill] sm:$0xff] }
 0x48b   :  { %v2108_v16 = vadd.f32 %v2782_v35, %v2107_v14  ;;  %2545 = vmatpush.msra.mxu2 %v4179_v28  ;;  %2526 = vmatpush.msra.mxu1 %v4187_v57  ;;  %v4553_v28 = vld [vmem:[#allocation18_spill] sm:$0xff] }
 0x48c   :  { %2785 = vtanh.f32 %v4319_v15  ;;  %2505 = vmatpush.msra.mxu0 %v4171_v2  ;;  %2565 = vmatpush.msra.mxu3 %v4181_v33  ;;  %v4551_v2 = vld [vmem:[#allocation36_spill] sm:$0xff]  ;;  %v4554_v33 = vld [vmem:[#allocation19_spill] sm:$0xff] }
 0x48d   :  { %v2112_v20 = vsel %vm2111_vm1, %v2782_v35, %v2108_v16  ;;  %2546 = vmatpush.msra.mxu2 %v4189_v38  ;;  %2527 = vmatpush.msra.mxu1 %v4197_v17  ;;  %v2133_v17 = vld [vmem:[#allocation2 + $0x6] ss:$8 sm:$0xf] }
 0x48e   :  { %2506 = vmatpush.msra.mxu0 %v4183_v5  ;;  %v2117_v31 = vsel %vm2114_vm2, %v2116_v22, %v2112_v20  ;;  %2566 = vmatpush.msra.mxu3 %v4191_v3  ;;  %v2135_v3 = vld [vmem:[#allocation3 + $0x6] ss:$8 sm:$0xf]  ;;  %v2140_v19 = vperm.slane %v2133_v17, 1  ;;  %v2142_v35 = vperm.slane %v2133_v17, 3  ;;  %v2141_v50 = vperm.slane %v2133_v17, 2 }
 0x48f   :  { %2547 = vmatpush.msra.mxu2 %v4201_v27  ;;  %2528 = vmatpush.msra.mxu1 %v4541_v54  ;;  %v2148_v27 = vperm.slane %v2135_v3, 0  ;;  %v2151_v62 = vperm.slane %v2135_v3, 3  ;;  %v2150_v39 = vperm.slane %v2135_v3, 2 }
 0x490   :  { %2507 = vmatpush.msra.mxu0 %v4195_v13  ;;  %2567 = vmatpush.msra.mxu3 %v4203_v29  ;;  %v2137_v13 = vld [vmem:[#allocation4 + $0x6] ss:$8 sm:$0xf] }
 0x491   :  { %2548 = vmatpush.msra.mxu2 %v4542_v60  ;;  %2529 = vmatpush.msra.mxu1 %v4545_v58  ;;  %v2161_v29 = vperm.slane %v2137_v13, 0  ;;  %v2162_v59 = vperm.slane %v2137_v13, 1  ;;  %v2164_v30 = vperm.slane %v2137_v13, 3  ;;  %v2159_v43 = vsel %vm569_vm0, %v2142_v35, %v2151_v62 }
 0x492   :  { %v2786_v26 = vpop.eup %2785  ;;  %2508 = vmatpush.msra.mxu0 %v4540_v52  ;;  %2568 = vmatpush.msra.mxu3 %v4543_v0  ;;  %v2163_v7 = vperm.slane %v2137_v13, 2  ;;  %v2158_v14 = vsel %vm569_vm0, %v2141_v50, %v2150_v39 }
 0x493   :  { %v2123_v46 = vmul.f32 %v2786_v26, %v2117_v31  ;;  %2549 = vmatpush.msra.mxu2 %v4546_v8  ;;  %2530 = vmatpush.msra.mxu1 %v4549_v61  ;;  %v2172_v10 = vadd.f32 %v2164_v30, %v2159_v43  ;;  %v2393_v30 = vld [vmem:[#allocation2 + $0x7] ss:$8 sm:$0xf] }
 0x494   :  { %2509 = vmatpush.msra.mxu0 %v4544_v1  ;;  %2569 = vmatpush.msra.mxu3 %v4547_v44  ;;  %v2171_v40 = vadd.f32 %v2163_v7, %v2158_v14 }
 0x495   :  { %2124 = vrot.lane.b32.xlu2 %v2123_v46, %s2928_s6  ;;  %2253 = vmatmul.f32.vlgmr.msrb.gmra.mxu0 %v2123_v46 }
 0x496   :  { %2273 = vmatmul.f32.vlgmr.msrb.gmra.mxu1 %v2123_v46  ;;  %2293 = vmatmul.f32.vlgmr.msrb.gmra.mxu2 %v2123_v46 }
 0x497   :  { %2313 = vmatmul.f32.vlgmr.msrb.gmra.mxu3 %v2123_v46  ;;  %2510 = vmatpush.msra.mxu0 %v4548_v51 }
 0x498   :  { %2550 = vmatpush.msra.mxu2 %v4246_v21  ;;  %2570 = vmatpush.msra.mxu3 %v4550_v42 }
 0x499   :  { %2511 = vmatpush.msra.mxu0 %v4252_v12  ;;  %2531 = vmatpush.msra.mxu1 %v4551_v2 }
 0x49a   :  { %2551 = vmatpush.msra.mxu2 %v4260_v34  ;;  %2571 = vmatpush.msra.mxu3 %v4262_v11  ;;  %v2149_v11 = vperm.slane %v2135_v3, 1  ;;  %v2139_v34 = vperm.slane %v2133_v17, 0 }
 0x49b   :  { %2512 = vmatpush.msra.mxu0 %v4552_v4  ;;  %2532 = vmatpush.msra.mxu1 %v4553_v28 }
 0x49c   :  { %2552 = vmatpush.msra.mxu2 %v4554_v33  ;;  %2572 = vmatpush.msra.mxu3 %v4274_v56  ;;  %v2156_v41 = vsel %vm569_vm0, %v2139_v34, %v2148_v27  ;;  %v2157_v45 = vsel %vm569_vm0, %v2140_v19, %v2149_v11 }
 0x49d   :  { %v2169_v12 = vadd.f32 %v2161_v29, %v2156_v41  ;;  %v2170_v63 = vadd.f32 %v2162_v59, %v2157_v45 }
 0x4ef   :  { %v2125_v5 = vpop.permute.xlu2 %2124 }
 0x4f0   :  { %v2127_v21 = vrot.slane %v2125_v5, 1  ;;  %2131 = vst [vmem:[%s4423_s8 + $0x9] sm:$0x4] %v2125_v5 }
 0x4f2   :  { %v2129_v38 = vsel %vm572_vm13, %v2123_v46, %v2127_v21 }
 0x4f3   :  { %2130 = vst [vmem:[%s4423_s8 + $0xa] sm:$0x1] %v2129_v38 }
 0x512   :  { %v2254_v56 = vpop.f32.mrf.mxu0 }
 0x513   :  { %v2317_v55 = vadd.f32 %v2254_v56, %v2169_v12  ;;  %v2274_v48 = vpop.f32.mrf.mxu1 }
 0x514   :  { %v2318_v32 = vadd.f32 %v2274_v48, %v2170_v63 }
 0x515   :  { %v2677_v47 = vmul.f32 -1.442695, %v2317_v55 }
 0x516   :  { %v2678_v23 = vmul.f32 -1.442695, %v2318_v32  ;;  %v2395_v32 = vld [vmem:[#allocation3 + $0x7] ss:$8 sm:$0xf] }
 0x517   :  { %2787 = vpow2.f32 %v2677_v47  ;;  %v2397_v47 = vld [vmem:[#allocation4 + $0x7] ss:$8 sm:$0xf]  ;;  %v2409_v43 = vperm.slane %v2395_v32, 1  ;;  %v2411_v14 = vperm.slane %v2395_v32, 3 }
 0x518   :  { %2789 = vpow2.f32 %v2678_v23  ;;  %v2408_v23 = vperm.slane %v2395_v32, 0  ;;  %v2421_v35 = vperm.slane %v2397_v47, 0 }
 0x519   :  { %v2294_v16 = vpop.f32.mrf.mxu2 }
 0x51a   :  { %v2314_v9 = vpop.f32.mrf.mxu3  ;;  %v2319_v22 = vadd.f32 %v2294_v16, %v2171_v40  ;;  %v2424_v40 = vperm.slane %v2397_v47, 3 }
 0x51b   :  { %v2320_v53 = vadd.f32 %v2314_v9, %v2172_v10  ;;  %v2399_v10 = vperm.slane %v2393_v30, 0  ;;  %v2422_v9 = vperm.slane %v2397_v47, 1 }
 0x51d   :  { %v2788_v49 = vpop.eup %2787  ;;  %v2679_v24 = vmul.f32 -1.442695, %v2320_v53  ;;  %v2400_v53 = vperm.slane %v2393_v30, 1 }
 0x51e   :  { %v2790_v37 = vpop.eup %2789  ;;  %v2324_v36 = vadd.f32 1.0, %v2788_v49  ;;  %v2416_v49 = vsel %vm569_vm0, %v2399_v10, %v2408_v23 }
 0x51f   :  { %v2343_v25 = vadd.f32 1.0, %v2790_v37  ;;  %2791 = vpow2.f32 %v2679_v24  ;;  %v2429_v24 = vadd.f32 %v2421_v35, %v2416_v49  ;;  %v2417_v37 = vsel %vm569_vm0, %v2400_v53, %v2409_v43 }
 0x520   :  { %2793 = vrcp.f32 %v2324_v36  ;;  %v2336_v0 = vand.u32 2147483648, %v2324_v36  ;;  %v2334_v8 = vand.u32 2147483647, %v2324_v36  ;;  %vm2330_vm5 = vweird.f32 %v2324_v36 }
 0x521   :  { %2795 = vrcp.f32 %v2343_v25  ;;  %v2355_v1 = vand.u32 2147483648, %v2343_v25  ;;  %v2353_v51 = vand.u32 2147483647, %v2343_v25  ;;  %vm2349_vm6 = vweird.f32 %v2343_v25 }
 0x522   :  { %v2337_v2 = vor.u32 1.1754944e-38, %v2336_v0  ;;  %vm2335_vm9 = vcmp.eq.f32.partialorder %v2334_v8, 8.507059e+37  ;;  %v2423_v8 = vperm.slane %v2397_v47, 2 }
 0x523   :  { %v2356_v28 = vor.u32 1.1754944e-38, %v2355_v1  ;;  %vm2354_vm10 = vcmp.eq.f32.partialorder %v2353_v51, 8.507059e+37 }
 0x525   :  { %v2792_v18 = vpop.eup %2791 }
 0x526   :  { %v2794_v20 = vpop.eup %2793  ;;  %v2363_v26 = vadd.f32 1.0, %v2792_v18 }
 0x527   :  { %v2796_v31 = vpop.eup %2795  ;;  %v2326_v46 = vmul.f32 %v2794_v20, %v2324_v36  ;;  %vm2331_vm3 = vweird.f32 %v2794_v20 }
 0x528   :  { %v2345_v52 = vmul.f32 %v2796_v31, %v2343_v25  ;;  %2797 = vrcp.f32 %v2363_v26  ;;  %vm2350_vm4 = vweird.f32 %v2796_v31  ;;  %vm2332_vm7 = vmor %vm2330_vm5, %vm2331_vm3  ;;  %v2375_v19 = vand.u32 2147483648, %v2363_v26 }
 0x529   :  { %v2327_v54 = vsub.f32 1.0, %v2326_v46  ;;  %2799 = vtanh.f32 %v2319_v22  ;;  %vm2351_vm8 = vmor %vm2349_vm6, %vm2350_vm4  ;;  %vm2369_vm12 = vweird.f32 %v2363_v26  ;;  %v2373_v41 = vand.u32 2147483647, %v2363_v26 }
 0x52a   :  { %v2346_v60 = vsub.f32 1.0, %v2345_v52  ;;  %v2376_v45 = vor.u32 1.1754944e-38, %v2375_v19  ;;  %v2430_v25 = vadd.f32 %v2422_v9, %v2417_v37 }
 0x52b   :  { %v2328_v58 = vmul.f32 %v2794_v20, %v2327_v54  ;;  %vm2374_vm15 = vcmp.eq.f32.partialorder %v2373_v41, 8.507059e+37 }
 0x52c   :  { %v2347_v44 = vmul.f32 %v2796_v31, %v2346_v60 }
 0x52d   :  { %v2329_v61 = vadd.f32 %v2794_v20, %v2328_v58  ;;  %v2410_v58 = vperm.slane %v2395_v32, 2 }
 0x52e   :  { %v2798_v42 = vpop.eup %2797  ;;  %v2348_v4 = vadd.f32 %v2796_v31, %v2347_v44  ;;  %v2401_v44 = vperm.slane %v2393_v30, 2 }
 0x52f   :  { %v2333_v33 = vsel %vm2332_vm7, %v2794_v20, %v2329_v61  ;;  %v2365_v5 = vmul.f32 %v2798_v42, %v2363_v26  ;;  %v2800_v21 = vpop.eup %2799  ;;  %vm2370_vm11 = vweird.f32 %v2798_v42  ;;  %v2402_v20 = vperm.slane %v2393_v30, 3 }
 0x530   :  { %v2338_v38 = vsel %vm2335_vm9, %v2337_v2, %v2333_v33  ;;  %v2352_v3 = vsel %vm2351_vm8, %v2796_v31, %v2348_v4  ;;  %vm2371_vm14 = vmor %vm2369_vm12, %vm2370_vm11  ;;  %v2418_v51 = vsel %vm569_vm0, %v2401_v44, %v2410_v58 }
 0x531   :  { %v2357_v13 = vsel %vm2354_vm10, %v2356_v28, %v2352_v3  ;;  %v2380_v17 = vmul.f32 %v2800_v21, %v2338_v38  ;;  %v2366_v27 = vsub.f32 1.0, %v2365_v5  ;;  %v2419_v22 = vsel %vm569_vm0, %v2402_v20, %v2411_v14 }
 0x532   :  { %v2379_v29 = vmul.f32 %v2357_v13, %v4319_v15  ;;  %v2432_v26 = vadd.f32 %v2424_v40, %v2419_v22 }
 0x533   :  { %v2367_v11 = vmul.f32 %v2798_v42, %v2366_v27 }
 0x534   :  { %v4385_v34 = vadd.f32 %v2380_v17, %v2379_v29 }
 0x535   :  { %v2368_v59 = vadd.f32 %v2798_v42, %v2367_v11 }
 0x536   :  { %2801 = vtanh.f32 %v4385_v34 }
 0x537   :  { %v2372_v12 = vsel %vm2371_vm14, %v2798_v42, %v2368_v59  ;;  %v2431_v42 = vadd.f32 %v2423_v8, %v2418_v51 }
 0x538   :  { %v2377_v63 = vsel %vm2374_vm15, %v2376_v45, %v2372_v12 }
 0x53c   :  { %v2802_v56 = vpop.eup %2801 }
 0x53d   :  { %v2383_v55 = vmul.f32 %v2802_v56, %v2377_v63 }
 0x53f   :  { %2384 = vrot.lane.b32.xlu0 %v2383_v55, %s2928_s6  ;;  %2513 = vmatmul.f32.vlgmr.msra.gmra.mxu0 %v2383_v55 }
 0x540   :  { %2533 = vmatmul.f32.vlgmr.msra.gmra.mxu1 %v2383_v55  ;;  %2553 = vmatmul.f32.vlgmr.msra.gmra.mxu2 %v2383_v55 }
 0x541   :  { %2573 = vmatmul.f32.vlgmr.msra.gmra.mxu3 %v2383_v55 }
 0x5b1   :  { %v2385_v15 = vpop.permute.xlu0 %2384 }
 0x5b2   :  { %v2387_v48 = vrot.slane %v2385_v15, 1  ;;  %2391 = vst [vmem:[%s4423_s8 + $0xb] sm:$0x4] %v2385_v15 }
 0x5b4   :  { %v2389_v62 = vsel %vm572_vm13, %v2383_v55, %v2387_v48 }
 0x5b5   :  { %2390 = vst [vmem:[%s4423_s8 + $0xc] sm:$0x1] %v2389_v62 }
 0x5bc   :  { %v2514_v36 = vpop.f32.mrf.mxu0 }
 0x5bd   :  { %v2577_v39 = vadd.f32 %v2514_v36, %v2429_v24  ;;  %v2534_v7 = vpop.f32.mrf.mxu1 }
 0x5be   :  { %v2578_v50 = vadd.f32 %v2534_v7, %v2430_v25 }
 0x5bf   :  { %v2680_v16 = vmul.f32 -1.442695, %v2577_v39 }
 0x5c0   :  { %v2681_v18 = vmul.f32 -1.442695, %v2578_v50 }
 0x5c1   :  { %2803 = vpow2.f32 %v2680_v16 }
 0x5c2   :  { %2805 = vpow2.f32 %v2681_v18 }
 0x5c3   :  { %v2554_v61 = vpop.f32.mrf.mxu2 }
 0x5c4   :  { %v2574_v31 = vpop.f32.mrf.mxu3  ;;  %v2579_v28 = vadd.f32 %v2554_v61, %v2431_v42 }
 0x5c5   :  { %v2580_v46 = vadd.f32 %v2574_v31, %v2432_v26 }
 0x5c7   :  { %v2804_v52 = vpop.eup %2803  ;;  %v2682_v54 = vmul.f32 -1.442695, %v2580_v46 }
 0x5c8   :  { %v2806_v60 = vpop.eup %2805  ;;  %v2584_v0 = vadd.f32 1.0, %v2804_v52 }
 0x5c9   :  { %v2603_v1 = vadd.f32 1.0, %v2806_v60  ;;  %2807 = vpow2.f32 %v2682_v54 }
 0x5ca   :  { %2809 = vrcp.f32 %v2584_v0  ;;  %v2596_v17 = vand.u32 2147483648, %v2584_v0  ;;  %v2594_v11 = vand.u32 2147483647, %v2584_v0  ;;  %vm2590_vm2 = vweird.f32 %v2584_v0 }
 0x5cb   :  { %2811 = vrcp.f32 %v2603_v1  ;;  %v2615_v27 = vand.u32 2147483648, %v2603_v1  ;;  %v2613_v59 = vand.u32 2147483647, %v2603_v1  ;;  %vm2609_vm3 = vweird.f32 %v2603_v1 }
 0x5cc   :  { %v2597_v12 = vor.u32 1.1754944e-38, %v2596_v17  ;;  %vm2595_vm6 = vcmp.eq.f32.partialorder %v2594_v11, 8.507059e+37 }
 0x5cd   :  { %v2616_v56 = vor.u32 1.1754944e-38, %v2615_v27  ;;  %vm2614_vm7 = vcmp.eq.f32.partialorder %v2613_v59, 8.507059e+37 }
 0x5cf   :  { %v2808_v2 = vpop.eup %2807 }
 0x5d0   :  { %v2810_v4 = vpop.eup %2809  ;;  %v2623_v33 = vadd.f32 1.0, %v2808_v2 }
 0x5d1   :  { %v2812_v5 = vpop.eup %2811  ;;  %v2586_v21 = vmul.f32 %v2810_v4, %v2584_v0  ;;  %vm2591_vm1 = vweird.f32 %v2810_v4 }
 0x5d2   :  { %v2605_v38 = vmul.f32 %v2812_v5, %v2603_v1  ;;  %2813 = vrcp.f32 %v2623_v33  ;;  %vm2610_vm0 = vweird.f32 %v2812_v5  ;;  %vm2592_vm4 = vmor %vm2590_vm2, %vm2591_vm1  ;;  %v2635_v9 = vand.u32 2147483648, %v2623_v33 }
 0x5d3   :  { %v2587_v3 = vsub.f32 1.0, %v2586_v21  ;;  %2815 = vtanh.f32 %v2579_v28  ;;  %vm2611_vm5 = vmor %vm2609_vm3, %vm2610_vm0  ;;  %vm2629_vm9 = vweird.f32 %v2623_v33  ;;  %v2633_v53 = vand.u32 2147483647, %v2623_v33 }
 0x5d4   :  { %v2606_v13 = vsub.f32 1.0, %v2605_v38  ;;  %v2636_v24 = vor.u32 1.1754944e-38, %v2635_v9 }
 0x5d5   :  { %v2588_v29 = vmul.f32 %v2810_v4, %v2587_v3  ;;  %vm2634_vm11 = vcmp.eq.f32.partialorder %v2633_v53, 8.507059e+37 }
 0x5d6   :  { %v2607_v6 = vmul.f32 %v2812_v5, %v2606_v13 }
 0x5d7   :  { %v2589_v19 = vadd.f32 %v2810_v4, %v2588_v29 }
 0x5d8   :  { %v2814_v41 = vpop.eup %2813  ;;  %v2608_v45 = vadd.f32 %v2812_v5, %v2607_v6 }
 0x5d9   :  { %v2593_v63 = vsel %vm2592_vm4, %v2810_v4, %v2589_v19  ;;  %v2625_v55 = vmul.f32 %v2814_v41, %v2623_v33  ;;  %v2816_v15 = vpop.eup %2815  ;;  %vm2630_vm8 = vweird.f32 %v2814_v41 }
 0x5da   :  { %v2598_v48 = vsel %vm2595_vm6, %v2597_v12, %v2593_v63  ;;  %v2612_v32 = vsel %vm2611_vm5, %v2812_v5, %v2608_v45  ;;  %vm2631_vm10 = vmor %vm2629_vm9, %vm2630_vm8 }
 0x5db   :  { %v2617_v62 = vsel %vm2614_vm7, %v2616_v56, %v2612_v32  ;;  %v2640_v47 = vmul.f32 %v2816_v15, %v2598_v48  ;;  %v2626_v30 = vsub.f32 1.0, %v2625_v55 }
 0x5dc   :  { %v2639_v23 = vmul.f32 %v2617_v62, %v4385_v34 }
 0x5dd   :  { %v2627_v35 = vmul.f32 %v2814_v41, %v2626_v30 }
 0x5de   :  { %v2641_v43 = vadd.f32 %v2640_v47, %v2639_v23 }
 0x5df   :  { %v2628_v10 = vadd.f32 %v2814_v41, %v2627_v35 }
 0x5e0   :  { %2817 = vtanh.f32 %v2641_v43 }
 0x5e1   :  { %v2632_v49 = vsel %vm2631_vm10, %v2814_v41, %v2628_v10 }
 0x5e2   :  { %v2637_v36 = vsel %vm2634_vm11, %v2636_v24, %v2632_v49 }
 0x5e6   :  { %v2818_v37 = vpop.eup %2817 }
 0x5e7   :  { %v2643_v25 = vmul.f32 %v2818_v37, %v2637_v36 }
 0x5e9   :  { %2644 = vrot.lane.b32.xlu1 %v2643_v25, %s2928_s6 }
 0x65b   :  { %v2645_v39 = vpop.permute.xlu1 %2644 }
 0x65c   :  { %v2647_v7 = vrot.slane %v2645_v39, 1  ;;  %2651 = vst [vmem:[%s4423_s8 + $0xd] sm:$0x4] %v2645_v39 }
 0x65e   :  { %v2649_v34 = vsel %vm572_vm13, %v2643_v25, %v2647_v7 }
 0x65f   :  { %2650 = vst [vmem:[%s4423_s8 + $0xe] sm:$0x1] %v2649_v34 }
 0x660   :  { %2656 = vsyncpa [#allocation6], 1 }
 0x661   :  { %2657 = vsyncpa [#allocation8], 1 }
 0x662   :  { %2658 = vsyncpa [#allocation11], 1 }

</bundles_post_ra>
